<compile_context>
chip_gen: v5e
topology: v5e:2x2
jax: 0.10.0
libtpu: 0.0.40
codegen_flags: <defaults>
</compile_context>

<pallas_src>
import functools
import math

import jax
import jax.numpy as jnp
from jax.experimental import pallas as pl
from jax.experimental.pallas import tpu as pltpu


# ----------------------------------------------------------------------------
# Fused kernel factory: one batch tile (bt images) per grid step.
# Activation layout: rows = spatial_row * bt + batch  (sublane aligned),
#                    lanes = channel * W + x.
# ----------------------------------------------------------------------------
def _make_lenet_kernel(bt):
    assert bt % 8 == 0

    def kernel(x_ref, w1_ref, b1_ref, s1e_ref, s1o_ref,
               w2_ref, b2_ref, s2e_ref, s2o_ref,
               v1_ref, fb1_ref, w3_ref, fb2_ref, o_ref):
        f32 = jnp.float32
        X = x_ref[0]                                   # (28*bt, 28), row = h*bt + b

        # ---- conv1 (5x5, 1->6) + ReLU: 5 block-Toeplitz matmuls --------------
        acc = jnp.dot(X[0:24 * bt, :], w1_ref[0], preferred_element_type=f32)
        for i in range(1, 5):
            acc = acc + jnp.dot(X[i * bt:(i + 24) * bt, :], w1_ref[i],
                                preferred_element_type=f32)
        c1 = jnp.maximum(acc + b1_ref[...], 0.0)       # (24*bt, 144), lanes = co*24+x

        # ---- maxpool 2x2 -> (12*bt, 72), lanes = ci*12 + x --------------------
        # Vertical pair-max via a layout-preserving reshape (rows grouped in
        # multiples of bt >= 8 sublanes), no per-row concatenations.
        c1r = c1.reshape(12, 2 * bt, 144)
        v = jnp.maximum(c1r[:, :bt, :], c1r[:, bt:, :]).reshape(12 * bt, 144)
        # Horizontal pair-max + stride-2 via constant even/odd column selectors.
        p1 = jnp.maximum(
            jnp.dot(v, s1e_ref[...], preferred_element_type=f32),
            jnp.dot(v, s1o_ref[...], preferred_element_type=f32))   # (12*bt, 72)

        # ---- conv2 (5x5, 6->16) + ReLU: 5 block-Toeplitz matmuls -------------
        acc2 = jnp.dot(p1[0:8 * bt, :], w2_ref[0], preferred_element_type=f32)
        for i in range(1, 5):
            acc2 = acc2 + jnp.dot(p1[i * bt:(i + 8) * bt, :], w2_ref[i],
                                  preferred_element_type=f32)
        c2 = jnp.maximum(acc2 + b2_ref[...], 0.0)      # (8*bt, 128), lanes = co*8+x

        # ---- maxpool 2x2 -> (4*bt, 64), lanes = co*4 + x ----------------------
        c2r = c2.reshape(4, 2 * bt, 128)
        v2 = jnp.maximum(c2r[:, :bt, :], c2r[:, bt:, :]).reshape(4 * bt, 128)
        p2 = jnp.maximum(
            jnp.dot(v2, s2e_ref[...], preferred_element_type=f32),
            jnp.dot(v2, s2o_ref[...], preferred_element_type=f32))  # (4*bt, 64)

        # ---- fc1 (256 -> 256) + ReLU: 4 matmuls over the spatial-row groups --
        acc3 = jnp.dot(p2[0:bt, :], v1_ref[0], preferred_element_type=f32)
        for y in range(1, 4):
            acc3 = acc3 + jnp.dot(p2[y * bt:(y + 1) * bt, :], v1_ref[y],
                                  preferred_element_type=f32)
        f1 = jnp.maximum(acc3 + fb1_ref[...], 0.0)     # (bt, 256)

        # ---- fc2 (256 -> 10) ---------------------------------------------------
        out = jnp.dot(f1, w3_ref[...], preferred_element_type=f32) + fb2_ref[...]
        o_ref[...] = out.astype(o_ref.dtype)

    return kernel


# ----------------------------------------------------------------------------
# One-time weight packing (outside the jitted forward).
# ----------------------------------------------------------------------------
def prepare_params(p):
    f32 = jnp.float32

    # conv1 Toeplitz slabs: W1[i, xin, co*24 + xo] = w1[co, 0, i, xin - xo]
    w1 = p["conv1_w"]                                   # (6, 1, 5, 5)
    D = jnp.arange(28)[:, None] - jnp.arange(24)[None, :]       # xin - xo
    mask = ((D >= 0) & (D < 5)).astype(f32)
    Dc = jnp.clip(D, 0, 4)
    g = w1[:, 0, :, :][:, :, Dc] * mask[None, None, :, :]       # (co,i,xin,xo)
    W1 = g.transpose(1, 2, 0, 3).reshape(5, 28, 6 * 24)         # (5, 28, 144)
    b1 = jnp.repeat(p["conv1_b"], 24).reshape(1, 144)

    # pool1 even/odd column selectors: (144, 72)
    r = jnp.arange(144)[:, None]
    c = jnp.arange(72)[None, :]
    base = (c // 12) * 24 + 2 * (c % 12)
    S1e = (r == base).astype(f32)
    S1o = (r == base + 1).astype(f32)

    # conv2 Toeplitz slabs: W2[i, ci*12+xin, co*8+xo] = w2[co, ci, i, xin-xo]
    w2 = p["conv2_w"]                                   # (16, 6, 5, 5)
    D2 = jnp.arange(12)[:, None] - jnp.arange(8)[None, :]
    mask2 = ((D2 >= 0) & (D2 < 5)).astype(f32)
    Dc2 = jnp.clip(D2, 0, 4)
    g2 = w2[:, :, :, Dc2] * mask2[None, None, None, :, :]       # (co,ci,i,xin,xo)
    W2 = g2.transpose(2, 1, 3, 0, 4).reshape(5, 6 * 12, 16 * 8)  # (5, 72, 128)
    b2 = jnp.repeat(p["conv2_b"], 8).reshape(1, 128)

    # pool2 even/odd column selectors: (128, 64)
    r2 = jnp.arange(128)[:, None]
    c2 = jnp.arange(64)[None, :]
    base2 = (c2 // 4) * 8 + 2 * (c2 % 4)
    S2e = (r2 == base2).astype(f32)
    S2o = (r2 == base2 + 1).astype(f32)

    # fc1 regrouped by spatial row y: V1[y, co*4+x, n] = fc1_w[n, co*16+y*4+x]
    f1w = p["fc1_w"].reshape(256, 16, 4, 4)             # (n, co, y, x)
    V1 = f1w.transpose(2, 1, 3, 0).reshape(4, 64, 256)
    fb1 = p["fc1_b"].reshape(1, 256)

    W3 = p["fc2_w"].T                                    # (256, 10)
    fb2 = p["fc2_b"].reshape(1, 10)

    return {"w1": W1, "b1": b1, "s1e": S1e, "s1o": S1o,
            "w2": W2, "b2": b2, "s2e": S2e, "s2o": S2o,
            "v1": V1, "fb1": fb1, "w3": W3, "fb2": fb2}


# ----------------------------------------------------------------------------
# Batch-tile selection: multiple of 8, capped by block_batch (default 128,
# chosen so per-step VMEM stays far below the v7x 64 MiB physical limit),
# and split into >= 2 grid steps when possible so both v7x cores get work.
# ----------------------------------------------------------------------------
def _pick_batch_tile(n, block_batch):
    n8 = max(8, ((n + 7) // 8) * 8)
    bt = min(block_batch, n8)
    if bt == n8 and n8 >= 16:
        bt = ((n8 // 2 + 7) // 8) * 8
    bt = max(8, (bt // 8) * 8)
    return bt


# ----------------------------------------------------------------------------
# Forward pass
# ----------------------------------------------------------------------------
@functools.partial(jax.jit, static_argnames=("block_batch",))
def mymodel_forward(prep, x, block_batch=128):
    n = x.shape[0]
    bt = _pick_batch_tile(n, block_batch)
    g = pl.cdiv(n, bt)
    npad = g * bt

    xr = x.reshape(n, 28, 28)
    if npad != n:
        xr = jnp.pad(xr, ((0, npad - n), (0, 0), (0, 0)))
    # layout per batch group: (28*bt, 28) with row = h*bt + b.
    # NOTE(perf review #7): this shuffle costs one extra HBM pass over the
    # inputs; accepted consciously (the Toeplitz conv needs h-major rows).
    xl = xr.reshape(g, bt, 28, 28).transpose(0, 2, 1, 3).reshape(g, 28 * bt, 28)

    # Advisory cost estimate (packed-matmul flops; ~2.47 MFLOP per image).
    flops_per_image = 2 * (5 * 24 * 28 * 144 + 2 * 12 * 144 * 72
                           + 5 * 8 * 72 * 128 + 2 * 4 * 128 * 64
                           + 4 * 64 * 256 + 256 * 10)
    weight_bytes = 4 * sum(int(v.size) for v in prep.values())
    cost = pl.CostEstimate(flops=flops_per_image * npad, transcendentals=0,
                           bytes_accessed=npad * (28 * 28 + 10) * 4 + weight_bytes)

    # Explicit scoped-VMEM limit (review #2).  Default block_batch=128 needs
    # ~15-20 MB; block_batch>128 is opt-in and gets a larger (v5e/v6e-only) cap.
    vmem_limit = 32 * 1024 * 1024 if bt <= 128 else 64 * 1024 * 1024

    out = pl.pallas_call(
        _make_lenet_kernel(bt),
        out_shape=jax.ShapeDtypeStruct((npad, 10), jnp.float32),
        grid=(g,),
        in_specs=[
            pl.BlockSpec((1, 28 * bt, 28), lambda i: (i, 0, 0)),   # images
            # Constant-index weight blocks: fetched once, VMEM-resident.
            pl.BlockSpec((5, 28, 144), lambda i: (0, 0, 0)),       # conv1 slabs
            pl.BlockSpec((1, 144), lambda i: (0, 0)),              # conv1 bias
            pl.BlockSpec((144, 72), lambda i: (0, 0)),             # pool1 even
            pl.BlockSpec((144, 72), lambda i: (0, 0)),             # pool1 odd
            pl.BlockSpec((5, 72, 128), lambda i: (0, 0, 0)),       # conv2 slabs
            pl.BlockSpec((1, 128), lambda i: (0, 0)),              # conv2 bias
            pl.BlockSpec((128, 64), lambda i: (0, 0)),             # pool2 even
            pl.BlockSpec((128, 64), lambda i: (0, 0)),             # pool2 odd
            pl.BlockSpec((4, 64, 256), lambda i: (0, 0, 0)),       # fc1 regrouped
            pl.BlockSpec((1, 256), lambda i: (0, 0)),              # fc1 bias
            pl.BlockSpec((256, 10), lambda i: (0, 0)),             # fc2 weight^T
            pl.BlockSpec((1, 10), lambda i: (0, 0)),               # fc2 bias
        ],
        out_specs=pl.BlockSpec((bt, 10), lambda i: (i, 0)),
        compiler_params=pltpu.CompilerParams(
            dimension_semantics=("parallel",),
            vmem_limit_bytes=vmem_limit),
        cost_estimate=cost,
    )(xl, prep["w1"], prep["b1"], prep["s1e"], prep["s1o"],
      prep["w2"], prep["b2"], prep["s2e"], prep["s2o"],
      prep["v1"], prep["fb1"], prep["w3"], prep["fb2"])
    return out[:n]


# ----------------------------------------------------------------------------
# Deterministic PyTorch-style init (uniform +-1/sqrt(fan_in))
# ----------------------------------------------------------------------------
def init_params(seed=0):
    keys = jax.random.split(jax.random.PRNGKey(seed), 8)

    def u(k, shape, bound):
        return jax.random.uniform(k, shape, jnp.float32, -bound, bound)

    p = {}
    b = 1.0 / math.sqrt(1 * 5 * 5)
    p["conv1_w"] = u(keys[0], (6, 1, 5, 5), b)
    p["conv1_b"] = u(keys[1], (6,), b)
    b = 1.0 / math.sqrt(6 * 5 * 5)
    p["conv2_w"] = u(keys[2], (16, 6, 5, 5), b)
    p["conv2_b"] = u(keys[3], (16,), b)
    b = 1.0 / math.sqrt(16 * 4 * 4)
    p["fc1_w"] = u(keys[4], (256, 256), b)
    p["fc1_b"] = u(keys[5], (256,), b)
    b = 1.0 / math.sqrt(256)
    p["fc2_w"] = u(keys[6], (10, 256), b)
    p["fc2_b"] = u(keys[7], (10,), b)
    return p


# ----------------------------------------------------------------------------
# Pure-JAX, HIGHEST-precision conv reference (exact f32 ground truth).
# ----------------------------------------------------------------------------
def _reference_forward(params, x):
    hp = jax.lax.Precision.HIGHEST
    dn = ("NCHW", "OIHW", "NCHW")
    y = jax.lax.conv_general_dilated(x, params["conv1_w"], (1, 1), "VALID",
                                     dimension_numbers=dn, precision=hp)
    y = jnp.maximum(y + params["conv1_b"][None, :, None, None], 0.0)
    y = jax.lax.reduce_window(y, -jnp.inf, jax.lax.max,
                              (1, 1, 2, 2), (1, 1, 2, 2), "VALID")
    y = jax.lax.conv_general_dilated(y, params["conv2_w"], (1, 1), "VALID",
                                     dimension_numbers=dn, precision=hp)
    y = jnp.maximum(y + params["conv2_b"][None, :, None, None], 0.0)
    y = jax.lax.reduce_window(y, -jnp.inf, jax.lax.max,
                              (1, 1, 2, 2), (1, 1, 2, 2), "VALID")
    y = y.reshape(y.shape[0], -1)
    y = jnp.maximum(jnp.dot(y, params["fc1_w"].T, precision=hp)
                    + params["fc1_b"], 0.0)
    return jnp.dot(y, params["fc2_w"].T, precision=hp) + params["fc2_b"]


# ----------------------------------------------------------------------------
# Pure-JAX replica of the packed kernel math (HIGHEST precision).  Validates
# the Toeplitz / selector / fc-regroup packing at tight tolerance, independent
# of the MXU's default f32 matmul precision.
# ----------------------------------------------------------------------------
def _packed_forward_jax(prep, x):
    hp = jax.lax.Precision.HIGHEST
    X = x.reshape(-1, 28, 28)
    acc = sum(jnp.einsum("nhk,kc->nhc", X[:, i:i + 24, :], prep["w1"][i],
                         precision=hp) for i in range(5))
    c1 = jnp.maximum(acc + prep["b1"], 0.0)                       # (n, 24, 144)
    v = jnp.maximum(c1[:, 0::2, :], c1[:, 1::2, :])               # (n, 12, 144)
    p1 = jnp.maximum(jnp.einsum("nhk,kc->nhc", v, prep["s1e"], precision=hp),
                     jnp.einsum("nhk,kc->nhc", v, prep["s1o"], precision=hp))
    acc2 = sum(jnp.einsum("nhk,kc->nhc", p1[:, i:i + 8, :], prep["w2"][i],
                          precision=hp) for i in range(5))
    c2 = jnp.maximum(acc2 + prep["b2"], 0.0)                      # (n, 8, 128)
    v2 = jnp.maximum(c2[:, 0::2, :], c2[:, 1::2, :])              # (n, 4, 128)
    p2 = jnp.maximum(jnp.einsum("nhk,kc->nhc", v2, prep["s2e"], precision=hp),
                     jnp.einsum("nhk,kc->nhc", v2, prep["s2o"], precision=hp))
    f1 = jnp.maximum(jnp.einsum("nyk,ykc->nc", p2, prep["v1"], precision=hp)
                     + prep["fb1"], 0.0)
    return jnp.dot(f1, prep["w3"], precision=hp) + prep["fb2"]


if __name__ == "__main__":
    params = init_params(seed=0)
    prep = prepare_params(params)

    key = jax.random.PRNGKey(0)
    # 16*4*4 flatten in the module implies 28x28 single-channel input (MNIST).
    # batch=2 exercises the single-step path; batch=24 exercises multi-step
    # grid (g>=2) + batch padding.
    for n in (2, 24):
        x = jax.random.normal(jax.random.fold_in(key, n), (n, 1, 28, 28),
                              dtype=jnp.float32)
        out = mymodel_forward(prep, x)
        jax.block_until_ready(out)
        assert out.shape == (n, 10) and out.dtype == jnp.float32

        ref = _reference_forward(params, x)
        packed = _packed_forward_jax(prep, x)
        # Tight check of the packing / layout algebra (exact-f32 path).
        assert jnp.allclose(packed, ref, atol=1e-4, rtol=1e-4), \
            float(jnp.max(jnp.abs(packed - ref)))
        # Pallas kernel vs exact reference: tolerance bounded by the MXU's
        # default f32 matmul precision (bf16 passes), not by packing.
        assert jnp.allclose(out, ref, atol=2e-2, rtol=2e-2), \
            float(jnp.max(jnp.abs(out - ref)))

    print("KERNEL_OK")
</pallas_src>

<mosaic_0001>
module attributes {stable_mosaic.version = 11 : i64} {
  func.func @kernel(%arg0: i32, %arg1: memref<1x224x28xf32, #tpu.memory_space<vmem>>, %arg2: memref<5x28x144xf32, #tpu.memory_space<vmem>>, %arg3: memref<1x144xf32, #tpu.memory_space<vmem>>, %arg4: memref<144x72xf32, #tpu.memory_space<vmem>>, %arg5: memref<144x72xf32, #tpu.memory_space<vmem>>, %arg6: memref<5x72x128xf32, #tpu.memory_space<vmem>>, %arg7: memref<1x128xf32, #tpu.memory_space<vmem>>, %arg8: memref<128x64xf32, #tpu.memory_space<vmem>>, %arg9: memref<128x64xf32, #tpu.memory_space<vmem>>, %arg10: memref<4x64x256xf32, #tpu.memory_space<vmem>>, %arg11: memref<1x256xf32, #tpu.memory_space<vmem>>, %arg12: memref<256x10xf32, #tpu.memory_space<vmem>>, %arg13: memref<1x10xf32, #tpu.memory_space<vmem>>, %arg14: memref<8x10xf32, #tpu.memory_space<vmem>>) attributes {dimension_semantics = [#tpu.dimension_semantics<parallel>], iteration_bounds = array<i64: 1>, scalar_prefetch = 0 : i64, scratch_operands = 0 : i64, tpu.core_type = #tpu.core_type<tc>, window_params = [{transform_indices = @transform_0, window_bounds = array<i64: 1, 224, 28>}, {pipeline_mode = #tpu.pipeline_mode<synchronous>, transform_indices = @transform_1, window_bounds = array<i64: 5, 28, 144>}, {pipeline_mode = #tpu.pipeline_mode<synchronous>, transform_indices = @transform_2, window_bounds = array<i64: 1, 144>}, {pipeline_mode = #tpu.pipeline_mode<synchronous>, transform_indices = @transform_3, window_bounds = array<i64: 144, 72>}, {pipeline_mode = #tpu.pipeline_mode<synchronous>, transform_indices = @transform_4, window_bounds = array<i64: 144, 72>}, {pipeline_mode = #tpu.pipeline_mode<synchronous>, transform_indices = @transform_5, window_bounds = array<i64: 5, 72, 128>}, {pipeline_mode = #tpu.pipeline_mode<synchronous>, transform_indices = @transform_6, window_bounds = array<i64: 1, 128>}, {pipeline_mode = #tpu.pipeline_mode<synchronous>, transform_indices = @transform_7, window_bounds = array<i64: 128, 64>}, {pipeline_mode = #tpu.pipeline_mode<synchronous>, transform_indices = @transform_8, window_bounds = array<i64: 128, 64>}, {pipeline_mode = #tpu.pipeline_mode<synchronous>, transform_indices = @transform_9, window_bounds = array<i64: 4, 64, 256>}, {pipeline_mode = #tpu.pipeline_mode<synchronous>, transform_indices = @transform_10, window_bounds = array<i64: 1, 256>}, {pipeline_mode = #tpu.pipeline_mode<synchronous>, transform_indices = @transform_11, window_bounds = array<i64: 256, 10>}, {pipeline_mode = #tpu.pipeline_mode<synchronous>, transform_indices = @transform_12, window_bounds = array<i64: 1, 10>}, {transform_indices = @transform_13, window_bounds = array<i64: 8, 10>}]} {
    %c0 = arith.constant 0 : index
    %c0_0 = arith.constant 0 : index
    %c0_1 = arith.constant 0 : index
    %0 = vector.load %arg1[%c0, %c0_0, %c0_1] : memref<1x224x28xf32, #tpu.memory_space<vmem>>, vector<1x224x28xf32>
    %1 = vector.shape_cast %0 : vector<1x224x28xf32> to vector<224x28xf32>
    %2 = vector.extract_strided_slice %1 {offsets = [0, 0], sizes = [192, 28], strides = [1, 1]} : vector<224x28xf32> to vector<192x28xf32>
    %c0_2 = arith.constant 0 : index
    %c0_3 = arith.constant 0 : index
    %c0_4 = arith.constant 0 : index
    %3 = vector.load %arg2[%c0_2, %c0_3, %c0_4] : memref<5x28x144xf32, #tpu.memory_space<vmem>>, vector<1x28x144xf32>
    %4 = vector.shape_cast %3 : vector<1x28x144xf32> to vector<28x144xf32>
    %cst = arith.constant dense<0.000000e+00> : vector<192x144xf32>
    %5 = tpu.matmul %2, %4, %cst {dimension_numbers = #tpu.dot_dimension_numbers<[1], [0], [0], [1], [0, 0, 1, 1], [], []>} : vector<192x28xf32>, vector<28x144xf32>, vector<192x144xf32> -> vector<192x144xf32>
    %6 = vector.extract_strided_slice %1 {offsets = [8, 0], sizes = [192, 28], strides = [1, 1]} : vector<224x28xf32> to vector<192x28xf32>
    %c1 = arith.constant 1 : index
    %c0_5 = arith.constant 0 : index
    %c0_6 = arith.constant 0 : index
    %7 = vector.load %arg2[%c1, %c0_5, %c0_6] : memref<5x28x144xf32, #tpu.memory_space<vmem>>, vector<1x28x144xf32>
    %8 = vector.shape_cast %7 : vector<1x28x144xf32> to vector<28x144xf32>
    %cst_7 = arith.constant dense<0.000000e+00> : vector<192x144xf32>
    %9 = tpu.matmul %6, %8, %cst_7 {dimension_numbers = #tpu.dot_dimension_numbers<[1], [0], [0], [1], [0, 0, 1, 1], [], []>} : vector<192x28xf32>, vector<28x144xf32>, vector<192x144xf32> -> vector<192x144xf32>
    %10 = arith.addf %5, %9 : vector<192x144xf32>
    %11 = vector.extract_strided_slice %1 {offsets = [16, 0], sizes = [192, 28], strides = [1, 1]} : vector<224x28xf32> to vector<192x28xf32>
    %c2 = arith.constant 2 : index
    %c0_8 = arith.constant 0 : index
    %c0_9 = arith.constant 0 : index
    %12 = vector.load %arg2[%c2, %c0_8, %c0_9] : memref<5x28x144xf32, #tpu.memory_space<vmem>>, vector<1x28x144xf32>
    %13 = vector.shape_cast %12 : vector<1x28x144xf32> to vector<28x144xf32>
    %cst_10 = arith.constant dense<0.000000e+00> : vector<192x144xf32>
    %14 = tpu.matmul %11, %13, %cst_10 {dimension_numbers = #tpu.dot_dimension_numbers<[1], [0], [0], [1], [0, 0, 1, 1], [], []>} : vector<192x28xf32>, vector<28x144xf32>, vector<192x144xf32> -> vector<192x144xf32>
    %15 = arith.addf %10, %14 : vector<192x144xf32>
    %16 = vector.extract_strided_slice %1 {offsets = [24, 0], sizes = [192, 28], strides = [1, 1]} : vector<224x28xf32> to vector<192x28xf32>
    %c3 = arith.constant 3 : index
    %c0_11 = arith.constant 0 : index
    %c0_12 = arith.constant 0 : index
    %17 = vector.load %arg2[%c3, %c0_11, %c0_12] : memref<5x28x144xf32, #tpu.memory_space<vmem>>, vector<1x28x144xf32>
    %18 = vector.shape_cast %17 : vector<1x28x144xf32> to vector<28x144xf32>
    %cst_13 = arith.constant dense<0.000000e+00> : vector<192x144xf32>
    %19 = tpu.matmul %16, %18, %cst_13 {dimension_numbers = #tpu.dot_dimension_numbers<[1], [0], [0], [1], [0, 0, 1, 1], [], []>} : vector<192x28xf32>, vector<28x144xf32>, vector<192x144xf32> -> vector<192x144xf32>
    %20 = arith.addf %15, %19 : vector<192x144xf32>
    %21 = vector.extract_strided_slice %1 {offsets = [32, 0], sizes = [192, 28], strides = [1, 1]} : vector<224x28xf32> to vector<192x28xf32>
    %c4 = arith.constant 4 : index
    %c0_14 = arith.constant 0 : index
    %c0_15 = arith.constant 0 : index
    %22 = vector.load %arg2[%c4, %c0_14, %c0_15] : memref<5x28x144xf32, #tpu.memory_space<vmem>>, vector<1x28x144xf32>
    %23 = vector.shape_cast %22 : vector<1x28x144xf32> to vector<28x144xf32>
    %cst_16 = arith.constant dense<0.000000e+00> : vector<192x144xf32>
    %24 = tpu.matmul %21, %23, %cst_16 {dimension_numbers = #tpu.dot_dimension_numbers<[1], [0], [0], [1], [0, 0, 1, 1], [], []>} : vector<192x28xf32>, vector<28x144xf32>, vector<192x144xf32> -> vector<192x144xf32>
    %25 = arith.addf %20, %24 : vector<192x144xf32>
    %c0_17 = arith.constant 0 : index
    %c0_18 = arith.constant 0 : index
    %26 = vector.load %arg3[%c0_17, %c0_18] : memref<1x144xf32, #tpu.memory_space<vmem>>, vector<1x144xf32>
    %27 = vector.broadcast %26 : vector<1x144xf32> to vector<192x144xf32>
    %28 = arith.addf %25, %27 : vector<192x144xf32>
    %cst_19 = arith.constant 0.000000e+00 : f32
    %29 = vector.broadcast %cst_19 : f32 to vector<192x144xf32>
    %30 = arith.maximumf %28, %29 : vector<192x144xf32>
    %31 = vector.shape_cast %30 : vector<192x144xf32> to vector<12x16x144xf32>
    %32 = vector.extract_strided_slice %31 {offsets = [0, 0, 0], sizes = [12, 8, 144], strides = [1, 1, 1]} : vector<12x16x144xf32> to vector<12x8x144xf32>
    %33 = vector.extract_strided_slice %31 {offsets = [0, 8, 0], sizes = [12, 8, 144], strides = [1, 1, 1]} : vector<12x16x144xf32> to vector<12x8x144xf32>
    %34 = arith.maximumf %32, %33 : vector<12x8x144xf32>
    %35 = vector.shape_cast %34 : vector<12x8x144xf32> to vector<96x144xf32>
    %c0_20 = arith.constant 0 : index
    %c0_21 = arith.constant 0 : index
    %36 = vector.load %arg4[%c0_20, %c0_21] : memref<144x72xf32, #tpu.memory_space<vmem>>, vector<144x72xf32>
    %cst_22 = arith.constant dense<0.000000e+00> : vector<96x72xf32>
    %37 = tpu.matmul %35, %36, %cst_22 {dimension_numbers = #tpu.dot_dimension_numbers<[1], [0], [0], [1], [0, 0, 1, 1], [], []>} : vector<96x144xf32>, vector<144x72xf32>, vector<96x72xf32> -> vector<96x72xf32>
    %c0_23 = arith.constant 0 : index
    %c0_24 = arith.constant 0 : index
    %38 = vector.load %arg5[%c0_23, %c0_24] : memref<144x72xf32, #tpu.memory_space<vmem>>, vector<144x72xf32>
    %cst_25 = arith.constant dense<0.000000e+00> : vector<96x72xf32>
    %39 = tpu.matmul %35, %38, %cst_25 {dimension_numbers = #tpu.dot_dimension_numbers<[1], [0], [0], [1], [0, 0, 1, 1], [], []>} : vector<96x144xf32>, vector<144x72xf32>, vector<96x72xf32> -> vector<96x72xf32>
    %40 = arith.maximumf %37, %39 : vector<96x72xf32>
    %41 = vector.extract_strided_slice %40 {offsets = [0, 0], sizes = [64, 72], strides = [1, 1]} : vector<96x72xf32> to vector<64x72xf32>
    %c0_26 = arith.constant 0 : index
    %c0_27 = arith.constant 0 : index
    %c0_28 = arith.constant 0 : index
    %42 = vector.load %arg6[%c0_26, %c0_27, %c0_28] : memref<5x72x128xf32, #tpu.memory_space<vmem>>, vector<1x72x128xf32>
    %43 = vector.shape_cast %42 : vector<1x72x128xf32> to vector<72x128xf32>
    %cst_29 = arith.constant dense<0.000000e+00> : vector<64x128xf32>
    %44 = tpu.matmul %41, %43, %cst_29 {dimension_numbers = #tpu.dot_dimension_numbers<[1], [0], [0], [1], [0, 0, 1, 1], [], []>} : vector<64x72xf32>, vector<72x128xf32>, vector<64x128xf32> -> vector<64x128xf32>
    %45 = vector.extract_strided_slice %40 {offsets = [8, 0], sizes = [64, 72], strides = [1, 1]} : vector<96x72xf32> to vector<64x72xf32>
    %c1_30 = arith.constant 1 : index
    %c0_31 = arith.constant 0 : index
    %c0_32 = arith.constant 0 : index
    %46 = vector.load %arg6[%c1_30, %c0_31, %c0_32] : memref<5x72x128xf32, #tpu.memory_space<vmem>>, vector<1x72x128xf32>
    %47 = vector.shape_cast %46 : vector<1x72x128xf32> to vector<72x128xf32>
    %cst_33 = arith.constant dense<0.000000e+00> : vector<64x128xf32>
    %48 = tpu.matmul %45, %47, %cst_33 {dimension_numbers = #tpu.dot_dimension_numbers<[1], [0], [0], [1], [0, 0, 1, 1], [], []>} : vector<64x72xf32>, vector<72x128xf32>, vector<64x128xf32> -> vector<64x128xf32>
    %49 = arith.addf %44, %48 : vector<64x128xf32>
    %50 = vector.extract_strided_slice %40 {offsets = [16, 0], sizes = [64, 72], strides = [1, 1]} : vector<96x72xf32> to vector<64x72xf32>
    %c2_34 = arith.constant 2 : index
    %c0_35 = arith.constant 0 : index
    %c0_36 = arith.constant 0 : index
    %51 = vector.load %arg6[%c2_34, %c0_35, %c0_36] : memref<5x72x128xf32, #tpu.memory_space<vmem>>, vector<1x72x128xf32>
    %52 = vector.shape_cast %51 : vector<1x72x128xf32> to vector<72x128xf32>
    %cst_37 = arith.constant dense<0.000000e+00> : vector<64x128xf32>
    %53 = tpu.matmul %50, %52, %cst_37 {dimension_numbers = #tpu.dot_dimension_numbers<[1], [0], [0], [1], [0, 0, 1, 1], [], []>} : vector<64x72xf32>, vector<72x128xf32>, vector<64x128xf32> -> vector<64x128xf32>
    %54 = arith.addf %49, %53 : vector<64x128xf32>
    %55 = vector.extract_strided_slice %40 {offsets = [24, 0], sizes = [64, 72], strides = [1, 1]} : vector<96x72xf32> to vector<64x72xf32>
    %c3_38 = arith.constant 3 : index
    %c0_39 = arith.constant 0 : index
    %c0_40 = arith.constant 0 : index
    %56 = vector.load %arg6[%c3_38, %c0_39, %c0_40] : memref<5x72x128xf32, #tpu.memory_space<vmem>>, vector<1x72x128xf32>
    %57 = vector.shape_cast %56 : vector<1x72x128xf32> to vector<72x128xf32>
    %cst_41 = arith.constant dense<0.000000e+00> : vector<64x128xf32>
    %58 = tpu.matmul %55, %57, %cst_41 {dimension_numbers = #tpu.dot_dimension_numbers<[1], [0], [0], [1], [0, 0, 1, 1], [], []>} : vector<64x72xf32>, vector<72x128xf32>, vector<64x128xf32> -> vector<64x128xf32>
    %59 = arith.addf %54, %58 : vector<64x128xf32>
    %60 = vector.extract_strided_slice %40 {offsets = [32, 0], sizes = [64, 72], strides = [1, 1]} : vector<96x72xf32> to vector<64x72xf32>
    %c4_42 = arith.constant 4 : index
    %c0_43 = arith.constant 0 : index
    %c0_44 = arith.constant 0 : index
    %61 = vector.load %arg6[%c4_42, %c0_43, %c0_44] : memref<5x72x128xf32, #tpu.memory_space<vmem>>, vector<1x72x128xf32>
    %62 = vector.shape_cast %61 : vector<1x72x128xf32> to vector<72x128xf32>
    %cst_45 = arith.constant dense<0.000000e+00> : vector<64x128xf32>
    %63 = tpu.matmul %60, %62, %cst_45 {dimension_numbers = #tpu.dot_dimension_numbers<[1], [0], [0], [1], [0, 0, 1, 1], [], []>} : vector<64x72xf32>, vector<72x128xf32>, vector<64x128xf32> -> vector<64x128xf32>
    %64 = arith.addf %59, %63 : vector<64x128xf32>
    %c0_46 = arith.constant 0 : index
    %c0_47 = arith.constant 0 : index
    %65 = vector.load %arg7[%c0_46, %c0_47] : memref<1x128xf32, #tpu.memory_space<vmem>>, vector<1x128xf32>
    %66 = vector.broadcast %65 : vector<1x128xf32> to vector<64x128xf32>
    %67 = arith.addf %64, %66 : vector<64x128xf32>
    %cst_48 = arith.constant 0.000000e+00 : f32
    %68 = vector.broadcast %cst_48 : f32 to vector<64x128xf32>
    %69 = arith.maximumf %67, %68 : vector<64x128xf32>
    %70 = vector.shape_cast %69 : vector<64x128xf32> to vector<4x16x128xf32>
    %71 = vector.extract_strided_slice %70 {offsets = [0, 0, 0], sizes = [4, 8, 128], strides = [1, 1, 1]} : vector<4x16x128xf32> to vector<4x8x128xf32>
    %72 = vector.extract_strided_slice %70 {offsets = [0, 8, 0], sizes = [4, 8, 128], strides = [1, 1, 1]} : vector<4x16x128xf32> to vector<4x8x128xf32>
    %73 = arith.maximumf %71, %72 : vector<4x8x128xf32>
    %74 = vector.shape_cast %73 : vector<4x8x128xf32> to vector<32x128xf32>
    %c0_49 = arith.constant 0 : index
    %c0_50 = arith.constant 0 : index
    %75 = vector.load %arg8[%c0_49, %c0_50] : memref<128x64xf32, #tpu.memory_space<vmem>>, vector<128x64xf32>
    %cst_51 = arith.constant dense<0.000000e+00> : vector<32x64xf32>
    %76 = tpu.matmul %74, %75, %cst_51 {dimension_numbers = #tpu.dot_dimension_numbers<[1], [0], [0], [1], [0, 0, 1, 1], [], []>} : vector<32x128xf32>, vector<128x64xf32>, vector<32x64xf32> -> vector<32x64xf32>
    %c0_52 = arith.constant 0 : index
    %c0_53 = arith.constant 0 : index
    %77 = vector.load %arg9[%c0_52, %c0_53] : memref<128x64xf32, #tpu.memory_space<vmem>>, vector<128x64xf32>
    %cst_54 = arith.constant dense<0.000000e+00> : vector<32x64xf32>
    %78 = tpu.matmul %74, %77, %cst_54 {dimension_numbers = #tpu.dot_dimension_numbers<[1], [0], [0], [1], [0, 0, 1, 1], [], []>} : vector<32x128xf32>, vector<128x64xf32>, vector<32x64xf32> -> vector<32x64xf32>
    %79 = arith.maximumf %76, %78 : vector<32x64xf32>
    %80 = vector.extract_strided_slice %79 {offsets = [0, 0], sizes = [8, 64], strides = [1, 1]} : vector<32x64xf32> to vector<8x64xf32>
    %c0_55 = arith.constant 0 : index
    %c0_56 = arith.constant 0 : index
    %c0_57 = arith.constant 0 : index
    %81 = vector.load %arg10[%c0_55, %c0_56, %c0_57] : memref<4x64x256xf32, #tpu.memory_space<vmem>>, vector<1x64x256xf32>
    %82 = vector.shape_cast %81 : vector<1x64x256xf32> to vector<64x256xf32>
    %cst_58 = arith.constant dense<0.000000e+00> : vector<8x256xf32>
    %83 = tpu.matmul %80, %82, %cst_58 {dimension_numbers = #tpu.dot_dimension_numbers<[1], [0], [0], [1], [0, 0, 1, 1], [], []>} : vector<8x64xf32>, vector<64x256xf32>, vector<8x256xf32> -> vector<8x256xf32>
    %84 = vector.extract_strided_slice %79 {offsets = [8, 0], sizes = [8, 64], strides = [1, 1]} : vector<32x64xf32> to vector<8x64xf32>
    %c1_59 = arith.constant 1 : index
    %c0_60 = arith.constant 0 : index
    %c0_61 = arith.constant 0 : index
    %85 = vector.load %arg10[%c1_59, %c0_60, %c0_61] : memref<4x64x256xf32, #tpu.memory_space<vmem>>, vector<1x64x256xf32>
    %86 = vector.shape_cast %85 : vector<1x64x256xf32> to vector<64x256xf32>
    %cst_62 = arith.constant dense<0.000000e+00> : vector<8x256xf32>
    %87 = tpu.matmul %84, %86, %cst_62 {dimension_numbers = #tpu.dot_dimension_numbers<[1], [0], [0], [1], [0, 0, 1, 1], [], []>} : vector<8x64xf32>, vector<64x256xf32>, vector<8x256xf32> -> vector<8x256xf32>
    %88 = arith.addf %83, %87 : vector<8x256xf32>
    %89 = vector.extract_strided_slice %79 {offsets = [16, 0], sizes = [8, 64], strides = [1, 1]} : vector<32x64xf32> to vector<8x64xf32>
    %c2_63 = arith.constant 2 : index
    %c0_64 = arith.constant 0 : index
    %c0_65 = arith.constant 0 : index
    %90 = vector.load %arg10[%c2_63, %c0_64, %c0_65] : memref<4x64x256xf32, #tpu.memory_space<vmem>>, vector<1x64x256xf32>
    %91 = vector.shape_cast %90 : vector<1x64x256xf32> to vector<64x256xf32>
    %cst_66 = arith.constant dense<0.000000e+00> : vector<8x256xf32>
    %92 = tpu.matmul %89, %91, %cst_66 {dimension_numbers = #tpu.dot_dimension_numbers<[1], [0], [0], [1], [0, 0, 1, 1], [], []>} : vector<8x64xf32>, vector<64x256xf32>, vector<8x256xf32> -> vector<8x256xf32>
    %93 = arith.addf %88, %92 : vector<8x256xf32>
    %94 = vector.extract_strided_slice %79 {offsets = [24, 0], sizes = [8, 64], strides = [1, 1]} : vector<32x64xf32> to vector<8x64xf32>
    %c3_67 = arith.constant 3 : index
    %c0_68 = arith.constant 0 : index
    %c0_69 = arith.constant 0 : index
    %95 = vector.load %arg10[%c3_67, %c0_68, %c0_69] : memref<4x64x256xf32, #tpu.memory_space<vmem>>, vector<1x64x256xf32>
    %96 = vector.shape_cast %95 : vector<1x64x256xf32> to vector<64x256xf32>
    %cst_70 = arith.constant dense<0.000000e+00> : vector<8x256xf32>
    %97 = tpu.matmul %94, %96, %cst_70 {dimension_numbers = #tpu.dot_dimension_numbers<[1], [0], [0], [1], [0, 0, 1, 1], [], []>} : vector<8x64xf32>, vector<64x256xf32>, vector<8x256xf32> -> vector<8x256xf32>
    %98 = arith.addf %93, %97 : vector<8x256xf32>
    %c0_71 = arith.constant 0 : index
    %c0_72 = arith.constant 0 : index
    %99 = vector.load %arg11[%c0_71, %c0_72] : memref<1x256xf32, #tpu.memory_space<vmem>>, vector<1x256xf32>
    %100 = vector.broadcast %99 : vector<1x256xf32> to vector<8x256xf32>
    %101 = arith.addf %98, %100 : vector<8x256xf32>
    %cst_73 = arith.constant 0.000000e+00 : f32
    %102 = vector.broadcast %cst_73 : f32 to vector<8x256xf32>
    %103 = arith.maximumf %101, %102 : vector<8x256xf32>
    %c0_74 = arith.constant 0 : index
    %c0_75 = arith.constant 0 : index
    %104 = vector.load %arg12[%c0_74, %c0_75] : memref<256x10xf32, #tpu.memory_space<vmem>>, vector<256x10xf32>
    %cst_76 = arith.constant dense<0.000000e+00> : vector<8x10xf32>
    %105 = tpu.matmul %103, %104, %cst_76 {dimension_numbers = #tpu.dot_dimension_numbers<[1], [0], [0], [1], [0, 0, 1, 1], [], []>} : vector<8x256xf32>, vector<256x10xf32>, vector<8x10xf32> -> vector<8x10xf32>
    %c0_77 = arith.constant 0 : index
    %c0_78 = arith.constant 0 : index
    %106 = vector.load %arg13[%c0_77, %c0_78] : memref<1x10xf32, #tpu.memory_space<vmem>>, vector<1x10xf32>
    %107 = vector.broadcast %106 : vector<1x10xf32> to vector<8x10xf32>
    %108 = arith.addf %105, %107 : vector<8x10xf32>
    %c0_79 = arith.constant 0 : index
    %c0_80 = arith.constant 0 : index
    %109 = vector.load %arg14[%c0_79, %c0_80] : memref<8x10xf32, #tpu.memory_space<vmem>>, vector<8x10xf32>
    tpu.vector_store %arg14[%c0_79, %c0_80], %108 {strides = array<i32>} : memref<8x10xf32, #tpu.memory_space<vmem>>, vector<8x10xf32>,
    return
  }
  func.func @transform_0(%arg0: i32) -> (i32, i32, i32) {
    %c0_i32 = arith.constant 0 : i32
    %c0_i32_0 = arith.constant 0 : i32
    %c0_i32_1 = arith.constant 0 : i32
    return %arg0, %c0_i32, %c0_i32_0 : i32, i32, i32
  }
  func.func @transform_1(%arg0: i32) -> (i32, i32, i32) {
    %c0_i32 = arith.constant 0 : i32
    %c0_i32_0 = arith.constant 0 : i32
    %c0_i32_1 = arith.constant 0 : i32
    %c0_i32_2 = arith.constant 0 : i32
    return %c0_i32, %c0_i32_0, %c0_i32_1 : i32, i32, i32
  }
  func.func @transform_2(%arg0: i32) -> (i32, i32) {
    %c0_i32 = arith.constant 0 : i32
    %c0_i32_0 = arith.constant 0 : i32
    %c0_i32_1 = arith.constant 0 : i32
    return %c0_i32, %c0_i32_0 : i32, i32
  }
  func.func @transform_3(%arg0: i32) -> (i32, i32) {
    %c0_i32 = arith.constant 0 : i32
    %c0_i32_0 = arith.constant 0 : i32
    %c0_i32_1 = arith.constant 0 : i32
    return %c0_i32, %c0_i32_0 : i32, i32
  }
  func.func @transform_4(%arg0: i32) -> (i32, i32) {
    %c0_i32 = arith.constant 0 : i32
    %c0_i32_0 = arith.constant 0 : i32
    %c0_i32_1 = arith.constant 0 : i32
    return %c0_i32, %c0_i32_0 : i32, i32
  }
  func.func @transform_5(%arg0: i32) -> (i32, i32, i32) {
    %c0_i32 = arith.constant 0 : i32
    %c0_i32_0 = arith.constant 0 : i32
    %c0_i32_1 = arith.constant 0 : i32
    %c0_i32_2 = arith.constant 0 : i32
    return %c0_i32, %c0_i32_0, %c0_i32_1 : i32, i32, i32
  }
  func.func @transform_6(%arg0: i32) -> (i32, i32) {
    %c0_i32 = arith.constant 0 : i32
    %c0_i32_0 = arith.constant 0 : i32
    %c0_i32_1 = arith.constant 0 : i32
    return %c0_i32, %c0_i32_0 : i32, i32
  }
  func.func @transform_7(%arg0: i32) -> (i32, i32) {
    %c0_i32 = arith.constant 0 : i32
    %c0_i32_0 = arith.constant 0 : i32
    %c0_i32_1 = arith.constant 0 : i32
    return %c0_i32, %c0_i32_0 : i32, i32
  }
  func.func @transform_8(%arg0: i32) -> (i32, i32) {
    %c0_i32 = arith.constant 0 : i32
    %c0_i32_0 = arith.constant 0 : i32
    %c0_i32_1 = arith.constant 0 : i32
    return %c0_i32, %c0_i32_0 : i32, i32
  }
  func.func @transform_9(%arg0: i32) -> (i32, i32, i32) {
    %c0_i32 = arith.constant 0 : i32
    %c0_i32_0 = arith.constant 0 : i32
    %c0_i32_1 = arith.constant 0 : i32
    %c0_i32_2 = arith.constant 0 : i32
    return %c0_i32, %c0_i32_0, %c0_i32_1 : i32, i32, i32
  }
  func.func @transform_10(%arg0: i32) -> (i32, i32) {
    %c0_i32 = arith.constant 0 : i32
    %c0_i32_0 = arith.constant 0 : i32
    %c0_i32_1 = arith.constant 0 : i32
    return %c0_i32, %c0_i32_0 : i32, i32
  }
  func.func @transform_11(%arg0: i32) -> (i32, i32) {
    %c0_i32 = arith.constant 0 : i32
    %c0_i32_0 = arith.constant 0 : i32
    %c0_i32_1 = arith.constant 0 : i32
    return %c0_i32, %c0_i32_0 : i32, i32
  }
  func.func @transform_12(%arg0: i32) -> (i32, i32) {
    %c0_i32 = arith.constant 0 : i32
    %c0_i32_0 = arith.constant 0 : i32
    %c0_i32_1 = arith.constant 0 : i32
    return %c0_i32, %c0_i32_0 : i32, i32
  }
  func.func @transform_13(%arg0: i32) -> (i32, i32) {
    %c0_i32 = arith.constant 0 : i32
    %c0_i32_0 = arith.constant 0 : i32
    return %arg0, %c0_i32 : i32, i32
  }
}

</mosaic_0001>

<bundles_post_ra>
// kernel: mymodel_forward.1
= control target key start
LH: loop header
LB: loop body
LE: loop exit
PB: predicated region body
PF: predicated region fallthrough
CT: control target
= control target key end

     0   :  { %18 = vsyncpa [#allocation3], 0  ;;  %s4942_s0 = inlined_call_operand.vmem [shape: f32[1,224,28], index: 0, kind: input, shape index: {}]   ;;  %s4943_s1 = inlined_call_operand.hbm [shape: f32[5,28,144], index: 1, kind: input, shape index: {}]   ;;  %s4944_s2 = inlined_call_operand.vmem [shape: f32[1,144], index: 2, kind: input, shape index: {}]   ;;  %s4945_s3 = inlined_call_operand.vmem [shape: f32[144,72], index: 3, kind: input, shape index: {}]   ;;  %s4946_s4 = inlined_call_operand.hbm [shape: f32[144,72], index: 4, kind: input, shape index: {}]   ;;  %s4947_s5 = inlined_call_operand.vmem [shape: f32[5,72,128], index: 5, kind: input, shape index: {}]   ;;  %s4948_s6 = inlined_call_operand.vmem [shape: f32[1,128], index: 6, kind: input, shape index: {}]   ;;  %s4949_s7 = inlined_call_operand.vmem [shape: f32[128,64], index: 7, kind: input, shape index: {}]   ;;  %s4950_s8 = inlined_call_operand.vmem [shape: f32[128,64], index: 8, kind: input, shape index: {}]   ;;  %s4951_s9 = inlined_call_operand.vmem [shape: f32[4,64,256], index: 9, kind: input, shape index: {}]   ;;  %s4952_s10 = inlined_call_operand.vmem [shape: f32[1,256], index: 10, kind: input, shape index: {}]   ;;  %s4953_s11 = inlined_call_operand.vmem [shape: f32[256,10], index: 11, kind: input, shape index: {}]   ;;  %s4954_s12 = inlined_call_operand.vmem [shape: f32[1,10], index: 12, kind: input, shape index: {}]   ;;  %s4955_s13 = inlined_call_operand.vmem [shape: f32[8,10], index: 13, kind: output, shape index: {}]  }
   0x1   :  { %s26_s27 = sshll.u32 %s4943_s1, 4  ;;  %s27_s27 = int_to_ptr.hbm [resolvable:$true] %s26_s27 }
   0x2   :  { %19 = vsyncpa [#allocation5], 0  ;;  %s2964_s28 = smov [#allocation2]   ;;  %s43_s15 = sshll.u32 %s4946_s4, 4  ;;  %s44_s15 = int_to_ptr.hbm [resolvable:$true] %s43_s15 }
   0x3   :  { %s28_s29 = sshll.u32 %s2964_s28, 4  ;;  %s2965_s16 = smov 256   ;;  %s29_s29 = int_to_ptr.vmem [resolvable:$true] %s28_s29 }
   0x4   :  { %s2966_s17 = smov 16   ;;  %s2967_s18 = smov [#allocation4]  }
   0x5   :  { %34 = dma.hbm_to_vmem [thread:$0]  %s27_s27, 5120, %s29_s29, [#allocation3], %s2965_s16, %s2965_s16, %s2966_s17  }
   0x6   :  { %s45_s19 = sshll.u32 %s2967_s18, 4  ;;  %s2968_s20 = smov 128   ;;  %s46_s19 = int_to_ptr.vmem [resolvable:$true] %s45_s19 }
   0x7   :  { %s2969_s21 = smov 8  }
   0x8   :  { %51 = dma.hbm_to_vmem [thread:$0]  %s44_s15, 2304, %s46_s19, [#allocation5], %s2968_s20, %s2968_s20, %s2969_s21  }
   0x9   :  { %2960 = dma.done.wait [#allocation3], 5120  }
   0xa   :  { %2961 = vsyncadd [#allocation3], 4294962176 }
   0xb   :  { %2962 = dma.done.wait [#allocation5], 2304  }
   0xc   :  { %2963 = vsyncadd [#allocation5], 4294964992  ;;  %vm194_vm0 = vcmask 1043456   ;;  %v119_v0 = vld [vmem:[#allocation2 + $0x70] sm:$0xf]  ;;  %v117_v3 = vld [vmem:[#allocation2 + $0x60] sm:$0xff] }
   0xd   :  { %v120_v1 = vld [vmem:[#allocation2 + $0x78] sm:$0xf]  ;;  %2492 = vmatpush.msk.msra.mxu0 %vm194_vm0, %v119_v0  ;;  %v118_v4 = vld [vmem:[#allocation2 + $0x68] sm:$0xff]  ;;  %v115_v6 = vld [vmem:[#allocation2 + $0x50] sm:$0xff]  ;;  %vm121_vm1 = vcmask 228352   ;;  %vm1442_vm2 = vcmask 130048  }
   0xe   :  { %v111_v2 = vld [vmem:[#allocation2 + $0x38] sm:$0xf]  ;;  %2517 = vmatpush.msk.msra.mxu1 %vm194_vm0, %v120_v1  ;;  %v109_v5 = vld [vmem:[#allocation2 + $0x28] sm:$0xff]  ;;  %2898 = vmatpush.msk.msra.mxu2 %vm194_vm0, %v120_v1  ;;  %v113_v9 = vld [vmem:[#allocation2 + $0x40] sm:$0xff]  ;;  %vm1740_vm3 = vcmask 588800   ;;  %vm2187_vm4 = vcmask 523264  }
   0xf   :  { %2567 = vmatpush.msk.msra.mxu3 %vm194_vm0, %v111_v2  ;;  %v116_v7 = vld [vmem:[#allocation2 + $0x58] sm:$0xff]  ;;  %214 = vmatpush.msra.mxu0 %v117_v3  ;;  %v114_v10 = vld [vmem:[#allocation2 + $0x48] sm:$0xff]  ;;  %v76_v14 = vld [vmem:[%s4942_s0] sm:$0xff]  ;;  %vm2484_vm5 = vcmask 80896  }
  0x10   :  { %303 = vmatpush.msra.mxu1 %v118_v4  ;;  %v107_v8 = vld [vmem:[#allocation2 + $0x18] sm:$0xff]  ;;  %2899 = vmatpush.msra.mxu2 %v118_v4  ;;  %v105_v11 = vld [vmem:[#allocation2 + $0x8] sm:$0xff]  ;;  %v573_v15 = vld [vmem:[#allocation2 + $0xb0] sm:$0xf] }
  0x11   :  { %490 = vmatpush.msra.mxu3 %v109_v5  ;;  %215 = vmatpush.msra.mxu0 %v115_v6  ;;  %v77_v12 = vld [vmem:[%s4942_s0 + $0x8] sm:$0xff]  ;;  %v3056_v13 = vld [vmem:[%s4942_s0 + $0xb8] sm:$0xff]  ;;  %v110_v16 = vld [vmem:[#allocation2 + $0x30] sm:$0xf] }
  0x12   :  { %304 = vmatpush.msra.mxu1 %v116_v7  ;;  %2900 = vmatpush.msra.mxu2 %v116_v7  ;;  %v574_v17 = vld [vmem:[#allocation2 + $0xb8] sm:$0xf]  ;;  %v108_v18 = vld [vmem:[#allocation2 + $0x20] sm:$0xff]  ;;  %v106_v19 = vld [vmem:[#allocation2 + $0x10] sm:$0xff] }
  0x13   :  { %491 = vmatpush.msra.mxu3 %v107_v8  ;;  %216 = vmatpush.msra.mxu0 %v113_v9  ;;  %v3072_v20 = vld [vmem:[%s4942_s0 + $0x10] sm:$0xff]  ;;  %v3077_v21 = vld [vmem:[%s4942_s0 + $0xc0] sm:$0xff]  ;;  %v3089_v23 = vld [vmem:[%s4942_s0 + $0x18] sm:$0xff] }
  0x14   :  { %305 = vmatpush.msra.mxu1 %v114_v10  ;;  %2901 = vmatpush.msra.mxu2 %v114_v10  ;;  %v104_v22 = vld [vmem:[#allocation2] sm:$0xff]  ;;  %v572_v26 = vld [vmem:[#allocation2 + $0xa8] sm:$0xff]  ;;  %v3126_v28 = vld [vmem:[%s4942_s0 + $0x30] sm:$0xff] }
  0x15   :  { %492 = vmatpush.msra.mxu3 %v105_v11  ;;  %2493 = vmatmul.msk.f32.vlgmr.msra.gmra.mxu0 %vm121_vm1, %v77_v12  ;;  %v571_v24 = vld [vmem:[#allocation2 + $0xa0] sm:$0xff]  ;;  %v3113_v27 = vld [vmem:[%s4942_s0 + $0x28] sm:$0xff]  ;;  %v3139_v29 = vld [vmem:[%s4942_s0 + $0x38] sm:$0xff] }
  0x16   :  { %2518 = vmatmul.msk.f32.vlgmr.msra.gmra.mxu1 %vm121_vm1, %v77_v12  ;;  %2540 = vmatmul.msk.f32.vlgmr.msra.gmra.mxu2 %vm121_vm1, %v3056_v13  ;;  %v3101_v25 = vld [vmem:[%s4942_s0 + $0x20] sm:$0xff]  ;;  %v3165_v31 = vld [vmem:[%s4942_s0 + $0x48] sm:$0xff]  ;;  %v569_v32 = vld [vmem:[#allocation2 + $0x90] sm:$0xff] }
  0x17   :  { %2568 = vmatmul.msk.f32.vlgmr.msra.gmra.mxu3 %vm121_vm1, %v76_v14  ;;  %2592 = vmatpush.msk.msrb.mxu0 %vm194_vm0, %v573_v15  ;;  %v3152_v30 = vld [vmem:[%s4942_s0 + $0x40] sm:$0xff]  ;;  %v3178_v33 = vld [vmem:[%s4942_s0 + $0x50] sm:$0xff]  ;;  %v570_v34 = vld [vmem:[#allocation2 + $0x98] sm:$0xff] }
  0x18   :  { %2542 = vmatpush.msk.msrb.mxu2 %vm194_vm0, %v110_v16  ;;  %2617 = vmatpush.msk.msrb.mxu1 %vm194_vm0, %v574_v17  ;;  %v3191_v35 = vld [vmem:[%s4942_s0 + $0x58] sm:$0xff]  ;;  %v3204_v36 = vld [vmem:[%s4942_s0 + $0x60] sm:$0xff]  ;;  %v3217_v37 = vld [vmem:[%s4942_s0 + $0x68] sm:$0xff] }
  0x19   :  { %597 = vmatpush.msrb.mxu0 %v571_v24  ;;  %v3230_v38 = vld [vmem:[%s4942_s0 + $0x70] sm:$0xff]  ;;  %v3243_v39 = vld [vmem:[%s4942_s0 + $0x78] sm:$0xff]  ;;  %v567_v40 = vld [vmem:[#allocation2 + $0x80] sm:$0xff] }
  0x1a   :  { %401 = vmatpush.msrb.mxu2 %v108_v18  ;;  %686 = vmatpush.msrb.mxu1 %v572_v26  ;;  %v3256_v41 = vld [vmem:[%s4942_s0 + $0x80] sm:$0xff]  ;;  %v568_v42 = vld [vmem:[#allocation2 + $0x88] sm:$0xff]  ;;  %v3286_v51 = vld [vmem:[%s4942_s0 + $0x90] sm:$0xff] }
  0x1b   :  { %598 = vmatpush.msrb.mxu0 %v569_v32  ;;  %v3269_v45 = vld [vmem:[%s4942_s0 + $0x88] sm:$0xff]  ;;  %v3303_v57 = vld [vmem:[%s4942_s0 + $0x98] sm:$0xff]  ;;  %v3320_v0 = vld [vmem:[%s4942_s0 + $0xa0] sm:$0xff] }
  0x1c   :  { %402 = vmatpush.msrb.mxu2 %v106_v19  ;;  %687 = vmatpush.msrb.mxu1 %v570_v34  ;;  %v817_v1 = vld [vmem:[#allocation2 + $0xf0] sm:$0xf]  ;;  %v818_v2 = vld [vmem:[#allocation2 + $0xf8] sm:$0xf]  ;;  %v816_v3 = vld [vmem:[#allocation2 + $0xe8] sm:$0xff] }
  0x1d   :  { %2494 = vmatmul.msk.f32.gmra.mxu0 %vm121_vm1, %v3072_v20  ;;  %2667 = vmatpush.msk.msrb.mxu3 %vm194_vm0, %v818_v2  ;;  %v3339_v10 = vld [vmem:[%s4942_s0 + $0xa8] sm:$0xff]  ;;  %v814_v11 = vld [vmem:[#allocation2 + $0xd8] sm:$0xff]  ;;  %v3358_v26 = vld [vmem:[%s4942_s0 + $0xb0] sm:$0xff] }
  0x1e   :  { %2519 = vmatmul.msk.f32.gmra.mxu1 %vm121_vm1, %v3072_v20  ;;  %2541 = vmatmul.msk.f32.gmra.mxu2 %vm121_vm1, %v3077_v21  ;;  %v1062_v15 = vld [vmem:[#allocation2 + $0x138] sm:$0xf]  ;;  %v815_v32 = vld [vmem:[#allocation2 + $0xe0] sm:$0xff] }
  0x1f   :  { %2569 = vmatmul.msk.f32.gmra.mxu3 %vm121_vm1, %v77_v12  ;;  %403 = vmatpush.msrb.mxu2 %v104_v22 }
  0x20   :  { %599 = vmatpush.msrb.mxu0 %v567_v40  ;;  %688 = vmatpush.msrb.mxu1 %v568_v42 }
  0x21   :  { %2642 = vmatpush.msk.msra.mxu2 %vm194_vm0, %v817_v1  ;;  %930 = vmatpush.msrb.mxu3 %v816_v3 }
  0x22   :  { %2717 = vmatpush.msk.msra.mxu1 %vm194_vm0, %v1062_v15 }
  0x23   :  { %931 = vmatpush.msrb.mxu3 %v814_v11  ;;  %841 = vmatpush.msra.mxu2 %v815_v32 }
  0x25   :  { %2495 = vmatmul.msk.f32.gmra.mxu0 %vm121_vm1, %v3089_v23 }
  0x26   :  { %2520 = vmatmul.msk.f32.gmra.mxu1 %vm121_vm1, %v3089_v23  ;;  %2543 = vmatmul.msk.f32.vlgmr.msrb.gmra.mxu2 %vm121_vm1, %v76_v14  ;;  %v1061_v14 = vld [vmem:[#allocation2 + $0x130] sm:$0xf] }
  0x27   :  { %2570 = vmatmul.msk.f32.gmra.mxu3 %vm121_vm1, %v3072_v20  ;;  %2692 = vmatpush.msk.msra.mxu0 %vm194_vm0, %v1061_v14 }
  0x2d   :  { %2496 = vmatmul.msk.f32.gmra.mxu0 %vm121_vm1, %v3101_v25 }
  0x2e   :  { %2521 = vmatmul.msk.f32.gmra.mxu1 %vm121_vm1, %v3101_v25  ;;  %2544 = vmatmul.msk.f32.gmra.mxu2 %vm121_vm1, %v77_v12  ;;  %v812_v12 = vld [vmem:[#allocation2 + $0xc8] sm:$0xff] }
  0x2f   :  { %2571 = vmatmul.msk.f32.gmra.mxu3 %vm121_vm1, %v3089_v23 }
  0x30   :  { %932 = vmatpush.msrb.mxu3 %v812_v12 }
  0x35   :  { %2497 = vmatmul.msk.f32.gmra.mxu0 %vm121_vm1, %v3113_v27 }
  0x36   :  { %2522 = vmatmul.msk.f32.gmra.mxu1 %vm121_vm1, %v3113_v27  ;;  %2545 = vmatmul.msk.f32.gmra.mxu2 %vm121_vm1, %v3072_v20 }
  0x37   :  { %2572 = vmatmul.msk.f32.gmra.mxu3 %vm121_vm1, %v3101_v25 }
  0x3d   :  { %2498 = vmatmul.msk.f32.gmra.mxu0 %vm121_vm1, %v3126_v28 }
  0x3e   :  { %2523 = vmatmul.msk.f32.gmra.mxu1 %vm121_vm1, %v3126_v28  ;;  %2546 = vmatmul.msk.f32.gmra.mxu2 %vm121_vm1, %v3089_v23 }
  0x3f   :  { %2573 = vmatmul.msk.f32.gmra.mxu3 %vm121_vm1, %v3113_v27 }
  0x45   :  { %2499 = vmatmul.msk.f32.gmra.mxu0 %vm121_vm1, %v3139_v29 }
  0x46   :  { %2524 = vmatmul.msk.f32.gmra.mxu1 %vm121_vm1, %v3139_v29  ;;  %2547 = vmatmul.msk.f32.gmra.mxu2 %vm121_vm1, %v3101_v25 }
  0x47   :  { %2574 = vmatmul.msk.f32.gmra.mxu3 %vm121_vm1, %v3126_v28 }
  0x4d   :  { %2500 = vmatmul.msk.f32.gmra.mxu0 %vm121_vm1, %v3152_v30 }
  0x4e   :  { %2525 = vmatmul.msk.f32.gmra.mxu1 %vm121_vm1, %v3152_v30  ;;  %2548 = vmatmul.msk.f32.gmra.mxu2 %vm121_vm1, %v3113_v27 }
  0x4f   :  { %2575 = vmatmul.msk.f32.gmra.mxu3 %vm121_vm1, %v3139_v29 }
  0x55   :  { %2501 = vmatmul.msk.f32.gmra.mxu0 %vm121_vm1, %v3165_v31 }
  0x56   :  { %2526 = vmatmul.msk.f32.gmra.mxu1 %vm121_vm1, %v3165_v31  ;;  %2549 = vmatmul.msk.f32.gmra.mxu2 %vm121_vm1, %v3126_v28 }
  0x57   :  { %2576 = vmatmul.msk.f32.gmra.mxu3 %vm121_vm1, %v3152_v30 }
  0x5d   :  { %2502 = vmatmul.msk.f32.gmra.mxu0 %vm121_vm1, %v3178_v33 }
  0x5e   :  { %2527 = vmatmul.msk.f32.gmra.mxu1 %vm121_vm1, %v3178_v33  ;;  %2550 = vmatmul.msk.f32.gmra.mxu2 %vm121_vm1, %v3139_v29 }
  0x5f   :  { %2577 = vmatmul.msk.f32.gmra.mxu3 %vm121_vm1, %v3165_v31 }
  0x65   :  { %2503 = vmatmul.msk.f32.gmra.mxu0 %vm121_vm1, %v3191_v35 }
  0x66   :  { %2528 = vmatmul.msk.f32.gmra.mxu1 %vm121_vm1, %v3191_v35  ;;  %2551 = vmatmul.msk.f32.gmra.mxu2 %vm121_vm1, %v3152_v30 }
  0x67   :  { %2578 = vmatmul.msk.f32.gmra.mxu3 %vm121_vm1, %v3178_v33 }
  0x6d   :  { %2504 = vmatmul.msk.f32.gmra.mxu0 %vm121_vm1, %v3204_v36 }
  0x6e   :  { %2529 = vmatmul.msk.f32.gmra.mxu1 %vm121_vm1, %v3204_v36  ;;  %2552 = vmatmul.msk.f32.gmra.mxu2 %vm121_vm1, %v3165_v31 }
  0x6f   :  { %2579 = vmatmul.msk.f32.gmra.mxu3 %vm121_vm1, %v3191_v35 }
  0x75   :  { %2505 = vmatmul.msk.f32.gmra.mxu0 %vm121_vm1, %v3217_v37 }
  0x76   :  { %2530 = vmatmul.msk.f32.gmra.mxu1 %vm121_vm1, %v3217_v37  ;;  %2553 = vmatmul.msk.f32.gmra.mxu2 %vm121_vm1, %v3178_v33 }
  0x77   :  { %2580 = vmatmul.msk.f32.gmra.mxu3 %vm121_vm1, %v3204_v36 }
  0x7d   :  { %2506 = vmatmul.msk.f32.gmra.mxu0 %vm121_vm1, %v3230_v38 }
  0x7e   :  { %2531 = vmatmul.msk.f32.gmra.mxu1 %vm121_vm1, %v3230_v38  ;;  %2554 = vmatmul.msk.f32.gmra.mxu2 %vm121_vm1, %v3191_v35 }
  0x7f   :  { %2581 = vmatmul.msk.f32.gmra.mxu3 %vm121_vm1, %v3217_v37 }
  0x85   :  { %2507 = vmatmul.msk.f32.gmra.mxu0 %vm121_vm1, %v3243_v39 }
  0x86   :  { %2532 = vmatmul.msk.f32.gmra.mxu1 %vm121_vm1, %v3243_v39  ;;  %2555 = vmatmul.msk.f32.gmra.mxu2 %vm121_vm1, %v3204_v36 }
  0x87   :  { %2582 = vmatmul.msk.f32.gmra.mxu3 %vm121_vm1, %v3230_v38 }
  0x8d   :  { %2508 = vmatmul.msk.f32.gmra.mxu0 %vm121_vm1, %v3256_v41 }
  0x8e   :  { %2533 = vmatmul.msk.f32.gmra.mxu1 %vm121_vm1, %v3256_v41  ;;  %2556 = vmatmul.msk.f32.gmra.mxu2 %vm121_vm1, %v3217_v37 }
  0x8f   :  { %2583 = vmatmul.msk.f32.gmra.mxu3 %vm121_vm1, %v3243_v39 }
  0x92   :  { %v218_v43 = vpop.f32.mrf.mxu0 }
  0x93   :  { %v307_v44 = vpop.f32.mrf.mxu1 }
  0x95   :  { %2509 = vmatmul.msk.f32.gmra.mxu0 %vm121_vm1, %v3269_v45 }
  0x96   :  { %2534 = vmatmul.msk.f32.gmra.mxu1 %vm121_vm1, %v3269_v45  ;;  %2557 = vmatmul.msk.f32.gmra.mxu2 %vm121_vm1, %v3230_v38 }
  0x97   :  { %2584 = vmatmul.msk.f32.gmra.mxu3 %vm121_vm1, %v3256_v41 }
  0x99   :  { %v3279_v46 = vpop.f32.mrf.mxu2 }
  0x9a   :  { %4956 = vst [vmem:[#allocation8_spill] sm:$0xff] %v3279_v46  ;;  %v494_v47 = vpop.f32.mrf.mxu3  ;;  %v221_v49 = vpop.f32.mrf.mxu0 }
  0x9b   :  { %v3281_v48 = vadd.f32 %v494_v47, %v307_v44  ;;  %v310_v50 = vpop.f32.mrf.mxu1 }
  0x9d   :  { %2510 = vmatmul.msk.f32.gmra.mxu0 %vm121_vm1, %v3286_v51 }
  0x9e   :  { %2535 = vmatmul.msk.f32.gmra.mxu1 %vm121_vm1, %v3286_v51  ;;  %2558 = vmatmul.msk.f32.gmra.mxu2 %vm121_vm1, %v3243_v39 }
  0x9f   :  { %2585 = vmatmul.msk.f32.gmra.mxu3 %vm121_vm1, %v3269_v45 }
  0xa1   :  { %v3296_v52 = vpop.f32.mrf.mxu2 }
  0xa2   :  { %4957 = vst [vmem:[#allocation9_spill] sm:$0xff] %v3296_v52  ;;  %v497_v53 = vpop.f32.mrf.mxu3  ;;  %v224_v55 = vpop.f32.mrf.mxu0 }
  0xa3   :  { %v3298_v54 = vadd.f32 %v497_v53, %v310_v50  ;;  %v313_v56 = vpop.f32.mrf.mxu1  ;;  %v811_v50 = vld [vmem:[#allocation2 + $0xc0] sm:$0xff] }
  0xa5   :  { %2511 = vmatmul.msk.f32.gmra.mxu0 %vm121_vm1, %v3303_v57 }
  0xa6   :  { %2536 = vmatmul.msk.f32.gmra.mxu1 %vm121_vm1, %v3303_v57  ;;  %2559 = vmatmul.msk.f32.gmra.mxu2 %vm121_vm1, %v3256_v41 }
  0xa7   :  { %2586 = vmatmul.msk.f32.gmra.mxu3 %vm121_vm1, %v3286_v51 }
  0xa9   :  { %v405_v58 = vpop.f32.mrf.mxu2 }
  0xaa   :  { %v500_v59 = vpop.f32.mrf.mxu3  ;;  %v3313_v60 = vadd.f32 %v405_v58, %v218_v43  ;;  %v227_v62 = vpop.f32.mrf.mxu0 }
  0xab   :  { %v3315_v61 = vadd.f32 %v500_v59, %v313_v56  ;;  %v316_v63 = vpop.f32.mrf.mxu1 }
  0xad   :  { %2512 = vmatmul.msk.f32.gmra.mxu0 %vm121_vm1, %v3320_v0 }
  0xae   :  { %2537 = vmatmul.msk.f32.gmra.mxu1 %vm121_vm1, %v3320_v0  ;;  %2560 = vmatmul.msk.f32.gmra.mxu2 %vm121_vm1, %v3269_v45 }
  0xaf   :  { %2587 = vmatmul.msk.f32.gmra.mxu3 %vm121_vm1, %v3303_v57 }
  0xb1   :  { %v408_v4 = vpop.f32.mrf.mxu2 }
  0xb2   :  { %v503_v5 = vpop.f32.mrf.mxu3  ;;  %v3332_v6 = vadd.f32 %v408_v4, %v221_v49  ;;  %v230_v8 = vpop.f32.mrf.mxu0  ;;  %v813_v49 = vld [vmem:[#allocation2 + $0xd0] sm:$0xff] }
  0xb3   :  { %v3334_v7 = vadd.f32 %v503_v5, %v316_v63  ;;  %v319_v9 = vpop.f32.mrf.mxu1  ;;  %842 = vmatpush.msra.mxu2 %v813_v49 }
  0xb5   :  { %2513 = vmatmul.msk.f32.gmra.mxu0 %vm121_vm1, %v3339_v10  ;;  %843 = vmatpush.msra.mxu2 %v811_v50 }
  0xb6   :  { %2538 = vmatmul.msk.f32.gmra.mxu1 %vm121_vm1, %v3339_v10  ;;  %2561 = vmatmul.msk.f32.gmra.mxu2 %vm121_vm1, %v3286_v51 }
  0xb7   :  { %2588 = vmatmul.msk.f32.gmra.mxu3 %vm121_vm1, %v3320_v0 }
  0xb9   :  { %v411_v16 = vpop.f32.mrf.mxu2 }
  0xba   :  { %v506_v17 = vpop.f32.mrf.mxu3  ;;  %v3351_v18 = vadd.f32 %v411_v16, %v224_v55  ;;  %v233_v22 = vpop.f32.mrf.mxu0 }
  0xbb   :  { %v3353_v19 = vadd.f32 %v506_v17, %v319_v9  ;;  %v322_v24 = vpop.f32.mrf.mxu1 }
  0xbd   :  { %2514 = vmatmul.msk.f32.gmra.mxu0 %vm121_vm1, %v3358_v26 }
  0xbe   :  { %2539 = vmatmul.msk.f32.gmra.mxu1 %vm121_vm1, %v3358_v26  ;;  %2562 = vmatmul.msk.f32.gmra.mxu2 %vm121_vm1, %v3303_v57 }
  0xbf   :  { %2589 = vmatmul.msk.f32.gmra.mxu3 %vm121_vm1, %v3339_v10 }
  0xc1   :  { %v414_v34 = vpop.f32.mrf.mxu2 }
  0xc2   :  { %v509_v40 = vpop.f32.mrf.mxu3  ;;  %v3368_v42 = vadd.f32 %v414_v34, %v227_v62  ;;  %v236_v44 = vpop.f32.mrf.mxu0  ;;  %v1059_v34 = vld [vmem:[#allocation2 + $0x120] sm:$0xff] }
  0xc3   :  { %v3370_v43 = vadd.f32 %v509_v40, %v322_v24  ;;  %v325_v47 = vpop.f32.mrf.mxu1  ;;  %v1060_v40 = vld [vmem:[#allocation2 + $0x128] sm:$0xff]  ;;  %1085 = vmatpush.msra.mxu0 %v1059_v34 }
  0xc4   :  { %1174 = vmatpush.msra.mxu1 %v1060_v40 }
  0xc5   :  { %2515 = vmatmul.msk.f32.gmra.mxu0 %vm121_vm1, %v3056_v13 }
  0xc6   :  { %2618 = vmatmul.msk.f32.vlgmr.msrb.gmra.mxu1 %vm121_vm1, %v3072_v20  ;;  %2563 = vmatmul.msk.f32.gmra.mxu2 %vm121_vm1, %v3320_v0 }
  0xc7   :  { %2590 = vmatmul.msk.f32.gmra.mxu3 %vm121_vm1, %v3358_v26 }
  0xc9   :  { %v417_v53 = vpop.f32.mrf.mxu2 }
  0xca   :  { %v512_v55 = vpop.f32.mrf.mxu3  ;;  %v3380_v56 = vadd.f32 %v417_v53, %v230_v8  ;;  %v239_v59 = vpop.f32.mrf.mxu0 }
  0xcb   :  { %v3382_v58 = vadd.f32 %v512_v55, %v325_v47  ;;  %v328_v62 = vpop.f32.mrf.mxu1 }
  0xcd   :  { %2516 = vmatmul.msk.f32.gmra.mxu0 %vm121_vm1, %v3077_v21 }
  0xce   :  { %2619 = vmatmul.msk.f32.gmra.mxu1 %vm121_vm1, %v3089_v23  ;;  %2564 = vmatmul.msk.f32.gmra.mxu2 %vm121_vm1, %v3339_v10 }
  0xcf   :  { %2591 = vmatmul.msk.f32.gmra.mxu3 %vm121_vm1, %v3056_v13 }
  0xd1   :  { %v420_v63 = vpop.f32.mrf.mxu2 }
  0xd2   :  { %v515_v1 = vpop.f32.mrf.mxu3  ;;  %v3392_v2 = vadd.f32 %v420_v63, %v233_v22  ;;  %v242_v4 = vpop.f32.mrf.mxu0 }
  0xd3   :  { %v3394_v3 = vadd.f32 %v515_v1, %v328_v62  ;;  %v331_v5 = vpop.f32.mrf.mxu1 }
  0xd5   :  { %2593 = vmatmul.msk.f32.vlgmr.msrb.gmra.mxu0 %vm121_vm1, %v3072_v20 }
  0xd6   :  { %2620 = vmatmul.msk.f32.gmra.mxu1 %vm121_vm1, %v3101_v25  ;;  %2565 = vmatmul.msk.f32.gmra.mxu2 %vm121_vm1, %v3358_v26 }
  0xd7   :  { %2668 = vmatmul.msk.f32.vlgmr.msrb.gmra.mxu3 %vm121_vm1, %v3089_v23 }
  0xd9   :  { %v423_v8 = vpop.f32.mrf.mxu2 }
  0xda   :  { %v518_v9 = vpop.f32.mrf.mxu3  ;;  %v3404_v11 = vadd.f32 %v423_v8, %v236_v44  ;;  %v245_v14 = vpop.f32.mrf.mxu0 }
  0xdb   :  { %v3406_v12 = vadd.f32 %v518_v9, %v331_v5  ;;  %v334_v15 = vpop.f32.mrf.mxu1 }
  0xdd   :  { %2594 = vmatmul.msk.f32.gmra.mxu0 %vm121_vm1, %v3089_v23 }
  0xde   :  { %2621 = vmatmul.msk.f32.gmra.mxu1 %vm121_vm1, %v3113_v27  ;;  %2566 = vmatmul.msk.f32.gmra.mxu2 %vm121_vm1, %v3056_v13 }
  0xdf   :  { %2669 = vmatmul.msk.f32.gmra.mxu3 %vm121_vm1, %v3101_v25 }
  0xe1   :  { %v426_v20 = vpop.f32.mrf.mxu2 }
  0xe2   :  { %v521_v16 = vpop.f32.mrf.mxu3  ;;  %v3416_v17 = vadd.f32 %v426_v20, %v239_v59  ;;  %v248_v24 = vpop.f32.mrf.mxu0 }
  0xe3   :  { %v3418_v22 = vadd.f32 %v521_v16, %v334_v15  ;;  %v337_v32 = vpop.f32.mrf.mxu1 }
  0xe5   :  { %2595 = vmatmul.msk.f32.gmra.mxu0 %vm121_vm1, %v3101_v25 }
  0xe6   :  { %2622 = vmatmul.msk.f32.gmra.mxu1 %vm121_vm1, %v3126_v28  ;;  %2643 = vmatmul.msk.f32.vlgmr.msra.gmra.mxu2 %vm121_vm1, %v3089_v23 }
  0xe7   :  { %2670 = vmatmul.msk.f32.gmra.mxu3 %vm121_vm1, %v3113_v27 }
  0xe9   :  { %v429_v44 = vpop.f32.mrf.mxu2 }
  0xea   :  { %v524_v47 = vpop.f32.mrf.mxu3  ;;  %v3428_v49 = vadd.f32 %v429_v44, %v242_v4  ;;  %v251_v53 = vpop.f32.mrf.mxu0 }
  0xeb   :  { %v3430_v50 = vadd.f32 %v524_v47, %v337_v32  ;;  %v340_v55 = vpop.f32.mrf.mxu1 }
  0xed   :  { %4958 = vst [vmem:[#allocation10_spill] sm:$0xff] %v3430_v50  ;;  %2596 = vmatmul.msk.f32.gmra.mxu0 %vm121_vm1, %v3113_v27 }
  0xee   :  { %2623 = vmatmul.msk.f32.gmra.mxu1 %vm121_vm1, %v3139_v29  ;;  %2644 = vmatmul.msk.f32.gmra.mxu2 %vm121_vm1, %v3101_v25 }
  0xef   :  { %2671 = vmatmul.msk.f32.gmra.mxu3 %vm121_vm1, %v3126_v28 }
  0xf1   :  { %v432_v23 = vpop.f32.mrf.mxu2 }
  0xf2   :  { %v527_v59 = vpop.f32.mrf.mxu3  ;;  %v3440_v62 = vadd.f32 %v432_v23, %v245_v14  ;;  %v254_v1 = vpop.f32.mrf.mxu0 }
  0xf3   :  { %v3442_v63 = vadd.f32 %v527_v59, %v340_v55  ;;  %v343_v4 = vpop.f32.mrf.mxu1 }
  0xf4   :  { %4959 = vst [vmem:[#allocation11_spill] sm:$0xff] %v3440_v62 }
  0xf5   :  { %4960 = vst [vmem:[#allocation12_spill] sm:$0xff] %v3442_v63  ;;  %2597 = vmatmul.msk.f32.gmra.mxu0 %vm121_vm1, %v3126_v28 }
  0xf6   :  { %2624 = vmatmul.msk.f32.gmra.mxu1 %vm121_vm1, %v3152_v30  ;;  %2645 = vmatmul.msk.f32.gmra.mxu2 %vm121_vm1, %v3113_v27 }
  0xf7   :  { %2672 = vmatmul.msk.f32.gmra.mxu3 %vm121_vm1, %v3139_v29 }
  0xf9   :  { %v435_v5 = vpop.f32.mrf.mxu2 }
  0xfa   :  { %v530_v8 = vpop.f32.mrf.mxu3  ;;  %v3452_v9 = vadd.f32 %v435_v5, %v248_v24  ;;  %v257_v15 = vpop.f32.mrf.mxu0 }
  0xfb   :  { %v3454_v14 = vadd.f32 %v530_v8, %v343_v4  ;;  %v346_v20 = vpop.f32.mrf.mxu1 }
  0xfc   :  { %4961 = vst [vmem:[#allocation13_spill] sm:$0xff] %v3452_v9 }
  0xfd   :  { %4962 = vst [vmem:[#allocation14_spill] sm:$0xff] %v3454_v14  ;;  %2598 = vmatmul.msk.f32.gmra.mxu0 %vm121_vm1, %v3139_v29 }
  0xfe   :  { %2625 = vmatmul.msk.f32.gmra.mxu1 %vm121_vm1, %v3165_v31  ;;  %2646 = vmatmul.msk.f32.gmra.mxu2 %vm121_vm1, %v3126_v28 }
  0xff   :  { %2673 = vmatmul.msk.f32.gmra.mxu3 %vm121_vm1, %v3152_v30 }
 0x101   :  { %v438_v16 = vpop.f32.mrf.mxu2 }
 0x102   :  { %v533_v32 = vpop.f32.mrf.mxu3  ;;  %v3464_v24 = vadd.f32 %v438_v16, %v251_v53  ;;  %v260_v40 = vpop.f32.mrf.mxu0 }
 0x103   :  { %v3466_v34 = vadd.f32 %v533_v32, %v346_v20  ;;  %v349_v44 = vpop.f32.mrf.mxu1 }
 0x104   :  { %4963 = vst [vmem:[#allocation15_spill] sm:$0xff] %v3464_v24 }
 0x105   :  { %4964 = vst [vmem:[#allocation16_spill] sm:$0xff] %v3466_v34  ;;  %2599 = vmatmul.msk.f32.gmra.mxu0 %vm121_vm1, %v3152_v30 }
 0x106   :  { %2626 = vmatmul.msk.f32.gmra.mxu1 %vm121_vm1, %v3178_v33  ;;  %2647 = vmatmul.msk.f32.gmra.mxu2 %vm121_vm1, %v3139_v29 }
 0x107   :  { %2674 = vmatmul.msk.f32.gmra.mxu3 %vm121_vm1, %v3165_v31 }
 0x109   :  { %v441_v47 = vpop.f32.mrf.mxu2 }
 0x10a   :  { %v536_v55 = vpop.f32.mrf.mxu3  ;;  %v3476_v53 = vadd.f32 %v441_v47, %v254_v1  ;;  %v263_v59 = vpop.f32.mrf.mxu0  ;;  %v1058_v47 = vld [vmem:[#allocation2 + $0x118] sm:$0xff] }
 0x10b   :  { %v3478_v23 = vadd.f32 %v536_v55, %v349_v44  ;;  %v352_v4 = vpop.f32.mrf.mxu1  ;;  %v1057_v44 = vld [vmem:[#allocation2 + $0x110] sm:$0xff]  ;;  %1175 = vmatpush.msra.mxu1 %v1058_v47 }
 0x10c   :  { %4965 = vst [vmem:[#allocation17_spill] sm:$0xff] %v3476_v53  ;;  %1086 = vmatpush.msra.mxu0 %v1057_v44 }
 0x10d   :  { %4966 = vst [vmem:[#allocation18_spill] sm:$0xff] %v3478_v23  ;;  %2600 = vmatmul.msk.f32.gmra.mxu0 %vm121_vm1, %v3165_v31 }
 0x10e   :  { %2627 = vmatmul.msk.f32.gmra.mxu1 %vm121_vm1, %v3191_v35  ;;  %2648 = vmatmul.msk.f32.gmra.mxu2 %vm121_vm1, %v3152_v30 }
 0x10f   :  { %2675 = vmatmul.msk.f32.gmra.mxu3 %vm121_vm1, %v3178_v33 }
 0x111   :  { %v444_v5 = vpop.f32.mrf.mxu2 }
 0x112   :  { %v539_v8 = vpop.f32.mrf.mxu3  ;;  %v3488_v1 = vadd.f32 %v444_v5, %v257_v15  ;;  %v266_v16 = vpop.f32.mrf.mxu0 }
 0x113   :  { %v3490_v20 = vadd.f32 %v539_v8, %v352_v4  ;;  %v355_v32 = vpop.f32.mrf.mxu1 }
 0x114   :  { %4967 = vst [vmem:[#allocation19_spill] sm:$0xff] %v3488_v1  ;;  %v3659_v1 = vld [vmem:[%s4942_s0 + $0xc8] sm:$0xff] }
 0x115   :  { %4968 = vst [vmem:[#allocation20_spill] sm:$0xff] %v3490_v20  ;;  %2601 = vmatmul.msk.f32.gmra.mxu0 %vm121_vm1, %v3178_v33 }
 0x116   :  { %2628 = vmatmul.msk.f32.gmra.mxu1 %vm121_vm1, %v3204_v36  ;;  %2649 = vmatmul.msk.f32.gmra.mxu2 %vm121_vm1, %v3165_v31 }
 0x117   :  { %2676 = vmatmul.msk.f32.gmra.mxu3 %vm121_vm1, %v3191_v35 }
 0x119   :  { %v447_v15 = vpop.f32.mrf.mxu2 }
 0x11a   :  { %v542_v55 = vpop.f32.mrf.mxu3  ;;  %v3500_v4 = vadd.f32 %v447_v15, %v260_v40  ;;  %v269_v8 = vpop.f32.mrf.mxu0 }
 0x11b   :  { %v3502_v5 = vadd.f32 %v542_v55, %v355_v32  ;;  %v358_v52 = vpop.f32.mrf.mxu1 }
 0x11c   :  { %4969 = vst [vmem:[#allocation21_spill] sm:$0xff] %v3500_v4 }
 0x11d   :  { %4970 = vst [vmem:[#allocation22_spill] sm:$0xff] %v3502_v5  ;;  %2602 = vmatmul.msk.f32.gmra.mxu0 %vm121_vm1, %v3191_v35 }
 0x11e   :  { %2629 = vmatmul.msk.f32.gmra.mxu1 %vm121_vm1, %v3217_v37  ;;  %2650 = vmatmul.msk.f32.gmra.mxu2 %vm121_vm1, %v3178_v33 }
 0x11f   :  { %2677 = vmatmul.msk.f32.gmra.mxu3 %vm121_vm1, %v3204_v36 }
 0x121   :  { %v450_v44 = vpop.f32.mrf.mxu2 }
 0x122   :  { %v545_v47 = vpop.f32.mrf.mxu3  ;;  %v3512_v40 = vadd.f32 %v450_v44, %v263_v59  ;;  %v272_v15 = vpop.f32.mrf.mxu0 }
 0x123   :  { %v3514_v32 = vadd.f32 %v545_v47, %v358_v52  ;;  %v361_v55 = vpop.f32.mrf.mxu1 }
 0x124   :  { %4971 = vst [vmem:[#allocation23_spill] sm:$0xff] %v3512_v40 }
 0x125   :  { %4972 = vst [vmem:[#allocation24_spill] sm:$0xff] %v3514_v32  ;;  %2603 = vmatmul.msk.f32.gmra.mxu0 %vm121_vm1, %v3204_v36 }
 0x126   :  { %2630 = vmatmul.msk.f32.gmra.mxu1 %vm121_vm1, %v3230_v38  ;;  %2651 = vmatmul.msk.f32.gmra.mxu2 %vm121_vm1, %v3191_v35 }
 0x127   :  { %2678 = vmatmul.msk.f32.gmra.mxu3 %vm121_vm1, %v3217_v37 }
 0x129   :  { %v453_v46 = vpop.f32.mrf.mxu2 }
 0x12a   :  { %v548_v5 = vpop.f32.mrf.mxu3  ;;  %v3524_v59 = vadd.f32 %v453_v46, %v266_v16  ;;  %v275_v44 = vpop.f32.mrf.mxu0 }
 0x12b   :  { %v3526_v52 = vadd.f32 %v548_v5, %v361_v55  ;;  %v364_v47 = vpop.f32.mrf.mxu1 }
 0x12c   :  { %4973 = vst [vmem:[#allocation25_spill] sm:$0xff] %v3524_v59 }
 0x12d   :  { %4974 = vst [vmem:[#allocation26_spill] sm:$0xff] %v3526_v52  ;;  %2604 = vmatmul.msk.f32.gmra.mxu0 %vm121_vm1, %v3217_v37 }
 0x12e   :  { %2631 = vmatmul.msk.f32.gmra.mxu1 %vm121_vm1, %v3243_v39  ;;  %2652 = vmatmul.msk.f32.gmra.mxu2 %vm121_vm1, %v3204_v36 }
 0x12f   :  { %2679 = vmatmul.msk.f32.gmra.mxu3 %vm121_vm1, %v3230_v38 }
 0x131   :  { %v456_v32 = vpop.f32.mrf.mxu2 }
 0x132   :  { %v551_v40 = vpop.f32.mrf.mxu3  ;;  %v3536_v46 = vadd.f32 %v456_v32, %v269_v8  ;;  %v278_v5 = vpop.f32.mrf.mxu0 }
 0x133   :  { %v3538_v16 = vadd.f32 %v551_v40, %v364_v47  ;;  %v367_v55 = vpop.f32.mrf.mxu1 }
 0x134   :  { %4975 = vst [vmem:[#allocation27_spill] sm:$0xff] %v3536_v46 }
 0x135   :  { %4976 = vst [vmem:[#allocation28_spill] sm:$0xff] %v3538_v16  ;;  %2605 = vmatmul.msk.f32.gmra.mxu0 %vm121_vm1, %v3230_v38 }
 0x136   :  { %2632 = vmatmul.msk.f32.gmra.mxu1 %vm121_vm1, %v3256_v41  ;;  %2653 = vmatmul.msk.f32.gmra.mxu2 %vm121_vm1, %v3217_v37 }
 0x137   :  { %2680 = vmatmul.msk.f32.gmra.mxu3 %vm121_vm1, %v3243_v39 }
 0x139   :  { %v459_v52 = vpop.f32.mrf.mxu2 }
 0x13a   :  { %v554_v59 = vpop.f32.mrf.mxu3  ;;  %v3548_v8 = vadd.f32 %v459_v52, %v272_v15  ;;  %v281_v32 = vpop.f32.mrf.mxu0 }
 0x13b   :  { %v3550_v40 = vadd.f32 %v554_v59, %v367_v55  ;;  %v370_v47 = vpop.f32.mrf.mxu1 }
 0x13c   :  { %4977 = vst [vmem:[#allocation29_spill] sm:$0xff] %v3548_v8 }
 0x13d   :  { %4978 = vst [vmem:[#allocation30_spill] sm:$0xff] %v3550_v40  ;;  %2606 = vmatmul.msk.f32.gmra.mxu0 %vm121_vm1, %v3243_v39  ;;  %v1055_v40 = vld [vmem:[#allocation2 + $0x100] sm:$0xff] }
 0x13e   :  { %2633 = vmatmul.msk.f32.gmra.mxu1 %vm121_vm1, %v3269_v45  ;;  %2654 = vmatmul.msk.f32.gmra.mxu2 %vm121_vm1, %v3230_v38 }
 0x13f   :  { %2681 = vmatmul.msk.f32.gmra.mxu3 %vm121_vm1, %v3256_v41  ;;  %1087 = vmatpush.msra.mxu0 %v1055_v40 }
 0x141   :  { %v462_v16 = vpop.f32.mrf.mxu2 }
 0x142   :  { %v557_v46 = vpop.f32.mrf.mxu3  ;;  %v3560_v15 = vadd.f32 %v462_v16, %v275_v44  ;;  %v284_v52 = vpop.f32.mrf.mxu0  ;;  %v1056_v44 = vld [vmem:[#allocation2 + $0x108] sm:$0xff] }
 0x143   :  { %v3562_v59 = vadd.f32 %v557_v46, %v370_v47  ;;  %v3564_v55 = vpop.f32.mrf.mxu1  ;;  %1176 = vmatpush.msra.mxu1 %v1056_v44 }
 0x144   :  { %4979 = vst [vmem:[#allocation31_spill] sm:$0xff] %v3560_v15 }
 0x145   :  { %4980 = vst [vmem:[#allocation32_spill] sm:$0xff] %v3562_v59  ;;  %2607 = vmatmul.msk.f32.gmra.mxu0 %vm121_vm1, %v3256_v41 }
 0x146   :  { %2634 = vmatmul.msk.f32.gmra.mxu1 %vm121_vm1, %v3286_v51  ;;  %2655 = vmatmul.msk.f32.gmra.mxu2 %vm121_vm1, %v3243_v39 }
 0x147   :  { %2682 = vmatmul.msk.f32.gmra.mxu3 %vm121_vm1, %v3269_v45 }
 0x149   :  { %v465_v46 = vpop.f32.mrf.mxu2 }
 0x14a   :  { %v3574_v16 = vadd.f32 %v465_v46, %v278_v5  ;;  %v287_v47 = vpop.f32.mrf.mxu0  ;;  %v3673_v34 = vpop.f32.mrf.mxu3 }
 0x14b   :  { %v3576_v59 = vpop.f32.mrf.mxu1  ;;  %4985 = vst [vmem:[#allocation37_spill] sm:$0xff] %v3673_v34  ;;  %v3690_v34 = vld [vmem:[%s4942_s0 + $0xd0] sm:$0xff] }
 0x14c   :  { %4981 = vst [vmem:[#allocation33_spill] sm:$0xff] %v3574_v16 }
 0x14d   :  { %2608 = vmatmul.msk.f32.gmra.mxu0 %vm121_vm1, %v3269_v45 }
 0x14e   :  { %2635 = vmatmul.msk.f32.gmra.mxu1 %vm121_vm1, %v3303_v57  ;;  %2656 = vmatmul.msk.f32.gmra.mxu2 %vm121_vm1, %v3256_v41 }
 0x14f   :  { %2683 = vmatmul.msk.f32.gmra.mxu3 %vm121_vm1, %v3286_v51 }
 0x151   :  { %v468_v40 = vpop.f32.mrf.mxu2 }
 0x152   :  { %v3586_v44 = vadd.f32 %v468_v40, %v281_v32  ;;  %v3588_v5 = vpop.f32.mrf.mxu0  ;;  %v3696_v9 = vpop.f32.mrf.mxu3 }
 0x153   :  { %v3590_v46 = vpop.f32.mrf.mxu1  ;;  %4986 = vst [vmem:[#allocation38_spill] sm:$0xff] %v3696_v9 }
 0x154   :  { %4982 = vst [vmem:[#allocation34_spill] sm:$0xff] %v3586_v44 }
 0x155   :  { %2609 = vmatmul.msk.f32.gmra.mxu0 %vm121_vm1, %v3286_v51 }
 0x156   :  { %2636 = vmatmul.msk.f32.gmra.mxu1 %vm121_vm1, %v3320_v0  ;;  %2657 = vmatmul.msk.f32.gmra.mxu2 %vm121_vm1, %v3269_v45 }
 0x157   :  { %2684 = vmatmul.msk.f32.gmra.mxu3 %vm121_vm1, %v3303_v57 }
 0x159   :  { %v471_v16 = vpop.f32.mrf.mxu2 }
 0x15a   :  { %v3600_v15 = vadd.f32 %v471_v16, %v284_v52  ;;  %v3602_v32 = vpop.f32.mrf.mxu0 }
 0x15b   :  { %v3604_v40 = vpop.f32.mrf.mxu1 }
 0x15c   :  { %4983 = vst [vmem:[#allocation35_spill] sm:$0xff] %v3600_v15 }
 0x15d   :  { %2610 = vmatmul.msk.f32.gmra.mxu0 %vm121_vm1, %v3303_v57 }
 0x15e   :  { %2637 = vmatmul.msk.f32.gmra.mxu1 %vm121_vm1, %v3339_v10  ;;  %2658 = vmatmul.msk.f32.gmra.mxu2 %vm121_vm1, %v3286_v51 }
 0x15f   :  { %2685 = vmatmul.msk.f32.gmra.mxu3 %vm121_vm1, %v3320_v0 }
 0x161   :  { %v474_v44 = vpop.f32.mrf.mxu2 }
 0x162   :  { %v3614_v8 = vadd.f32 %v474_v44, %v287_v47  ;;  %v3616_v52 = vpop.f32.mrf.mxu0 }
 0x163   :  { %v3618_v16 = vpop.f32.mrf.mxu1 }
 0x164   :  { %4984 = vst [vmem:[#allocation36_spill] sm:$0xff] %v3614_v8 }
 0x165   :  { %2611 = vmatmul.msk.f32.gmra.mxu0 %vm121_vm1, %v3320_v0 }
 0x166   :  { %2638 = vmatmul.msk.f32.gmra.mxu1 %vm121_vm1, %v3358_v26  ;;  %2659 = vmatmul.msk.f32.gmra.mxu2 %vm121_vm1, %v3303_v57 }
 0x167   :  { %2686 = vmatmul.msk.f32.gmra.mxu3 %vm121_vm1, %v3339_v10 }
 0x16a   :  { %v3628_v15 = vpop.f32.mrf.mxu0 }
 0x16b   :  { %v3630_v47 = vpop.f32.mrf.mxu1 }
 0x16d   :  { %2612 = vmatmul.msk.f32.gmra.mxu0 %vm121_vm1, %v3339_v10 }
 0x16e   :  { %2639 = vmatmul.msk.f32.gmra.mxu1 %vm121_vm1, %v3056_v13  ;;  %2660 = vmatmul.msk.f32.gmra.mxu2 %vm121_vm1, %v3320_v0 }
 0x16f   :  { %2687 = vmatmul.msk.f32.gmra.mxu3 %vm121_vm1, %v3358_v26 }
 0x172   :  { %v3640_v44 = vpop.f32.mrf.mxu0 }
 0x173   :  { %v3642_v8 = vpop.f32.mrf.mxu1 }
 0x175   :  { %2613 = vmatmul.msk.f32.gmra.mxu0 %vm121_vm1, %v3358_v26 }
 0x176   :  { %2640 = vmatmul.msk.f32.gmra.mxu1 %vm121_vm1, %v3077_v21  ;;  %2661 = vmatmul.msk.f32.gmra.mxu2 %vm121_vm1, %v3339_v10 }
 0x177   :  { %2688 = vmatmul.msk.f32.gmra.mxu3 %vm121_vm1, %v3056_v13 }
 0x17a   :  { %v3652_v4 = vpop.f32.mrf.mxu0 }
 0x17b   :  { %v3654_v20 = vpop.f32.mrf.mxu1 }
 0x17d   :  { %2614 = vmatmul.msk.f32.gmra.mxu0 %vm121_vm1, %v3056_v13 }
 0x17e   :  { %2641 = vmatmul.msk.f32.gmra.mxu1 %vm121_vm1, %v3659_v1  ;;  %2662 = vmatmul.msk.f32.gmra.mxu2 %vm121_vm1, %v3358_v26 }
 0x17f   :  { %2689 = vmatmul.msk.f32.gmra.mxu3 %vm121_vm1, %v3077_v21 }
 0x182   :  { %v3669_v23 = vpop.f32.mrf.mxu0 }
 0x183   :  { %v3671_v53 = vpop.f32.mrf.mxu1 }
 0x185   :  { %2615 = vmatmul.msk.f32.gmra.mxu0 %vm121_vm1, %v3077_v21 }
 0x186   :  { %2718 = vmatmul.msk.f32.vlgmr.msra.gmra.mxu1 %vm121_vm1, %v3101_v25  ;;  %2663 = vmatmul.msk.f32.gmra.mxu2 %vm121_vm1, %v3056_v13 }
 0x187   :  { %2690 = vmatmul.msk.f32.gmra.mxu3 %vm121_vm1, %v3659_v1 }
 0x18a   :  { %v3683_v24 = vpop.f32.mrf.mxu0 }
 0x18b   :  { %v3685_v14 = vpop.f32.mrf.mxu1 }
 0x18d   :  { %2616 = vmatmul.msk.f32.gmra.mxu0 %vm121_vm1, %v3659_v1 }
 0x18e   :  { %2719 = vmatmul.msk.f32.gmra.mxu1 %vm121_vm1, %v3113_v27  ;;  %2664 = vmatmul.msk.f32.gmra.mxu2 %vm121_vm1, %v3077_v21  ;;  %v1439_v21 = vld [vmem:[%s4945_s3 + $0x78] sm:$0xff] }
 0x18f   :  { %2691 = vmatmul.msk.f32.gmra.mxu3 %vm121_vm1, %v3690_v34  ;;  %1479 = vmatpush.msrb.mxu2 %v1439_v21 }
 0x192   :  { %v3702_v13 = vpop.f32.mrf.mxu0 }
 0x193   :  { %4987 = vst [vmem:[#allocation39_spill] sm:$0xff] %v3702_v13  ;;  %v3704_v63 = vpop.f32.mrf.mxu1 }
 0x194   :  { %4988 = vst [vmem:[#allocation40_spill] sm:$0xff] %v3704_v63  ;;  %v1441_v63 = vld [vmem:[%s4945_s3 + $0x88] sm:$0xff] }
 0x195   :  { %2693 = vmatmul.msk.f32.vlgmr.msra.gmra.mxu0 %vm121_vm1, %v3101_v25  ;;  %1546 = vmatpush.msra.mxu3 %v1441_v63 }
 0x196   :  { %2720 = vmatmul.msk.f32.gmra.mxu1 %vm121_vm1, %v3126_v28  ;;  %2665 = vmatmul.msk.f32.gmra.mxu2 %vm121_vm1, %v3659_v1 }
 0x19a   :  { %v3712_v9 = vpop.f32.mrf.mxu0 }
 0x19b   :  { %4989 = vst [vmem:[#allocation41_spill] sm:$0xff] %v3712_v9  ;;  %v3714_v62 = vpop.f32.mrf.mxu1 }
 0x19c   :  { %4990 = vst [vmem:[#allocation42_spill] sm:$0xff] %v3714_v62 }
 0x19d   :  { %2694 = vmatmul.msk.f32.gmra.mxu0 %vm121_vm1, %v3113_v27  ;;  %v1438_v27 = vld [vmem:[%s4945_s3 + $0x70] sm:$0xff] }
 0x19e   :  { %2721 = vmatmul.msk.f32.gmra.mxu1 %vm121_vm1, %v3139_v29  ;;  %2666 = vmatmul.msk.f32.gmra.mxu2 %vm121_vm1, %v3690_v34 }
 0x19f   :  { %1480 = vmatpush.msrb.mxu2 %v1438_v27 }
 0x1a2   :  { %v3728_v25 = vpop.f32.mrf.mxu0 }
 0x1a3   :  { %4991 = vst [vmem:[#allocation43_spill] sm:$0xff] %v3728_v25  ;;  %v3730_v62 = vpop.f32.mrf.mxu1  ;;  %v1437_v25 = vld [vmem:[%s4945_s3 + $0x68] sm:$0xff] }
 0x1a4   :  { %4992 = vst [vmem:[#allocation44_spill] sm:$0xff] %v3730_v62  ;;  %1481 = vmatpush.msrb.mxu2 %v1437_v25  ;;  %v1436_v25 = vld [vmem:[%s4945_s3 + $0x60] sm:$0xff] }
 0x1a5   :  { %2695 = vmatmul.msk.f32.gmra.mxu0 %vm121_vm1, %v3126_v28 }
 0x1a6   :  { %2722 = vmatmul.msk.f32.gmra.mxu1 %vm121_vm1, %v3152_v30  ;;  %1482 = vmatpush.msrb.mxu2 %v1436_v25  ;;  %v934_v25 = vpop.f32.mrf.mxu3 }
 0x1aa   :  { %v3739_v63 = vpop.f32.mrf.mxu0 }
 0x1ab   :  { %4993 = vst [vmem:[#allocation45_spill] sm:$0xff] %v3739_v63  ;;  %v3741_v21 = vpop.f32.mrf.mxu1 }
 0x1ac   :  { %4994 = vst [vmem:[#allocation46_spill] sm:$0xff] %v3741_v21 }
 0x1ad   :  { %2696 = vmatmul.msk.f32.gmra.mxu0 %vm121_vm1, %v3139_v29 }
 0x1ae   :  { %2723 = vmatmul.msk.f32.gmra.mxu1 %vm121_vm1, %v3165_v31 }
 0x1b2   :  { %v3747_v62 = vpop.f32.mrf.mxu0 }
 0x1b3   :  { %4995 = vst [vmem:[#allocation47_spill] sm:$0xff] %v3747_v62  ;;  %v3749_v28 = vpop.f32.mrf.mxu1 }
 0x1b4   :  { %4996 = vst [vmem:[#allocation48_spill] sm:$0xff] %v3749_v28 }
 0x1b5   :  { %2697 = vmatmul.msk.f32.gmra.mxu0 %vm121_vm1, %v3152_v30 }
 0x1b6   :  { %2724 = vmatmul.msk.f32.gmra.mxu1 %vm121_vm1, %v3178_v33 }
 0x1ba   :  { %v3758_v27 = vpop.f32.mrf.mxu0 }
 0x1bb   :  { %4997 = vst [vmem:[#allocation49_spill] sm:$0xff] %v3758_v27  ;;  %v3760_v29 = vpop.f32.mrf.mxu1  ;;  %v1435_v27 = vld [vmem:[%s4945_s3 + $0x58] sm:$0xff] }
 0x1bc   :  { %4998 = vst [vmem:[#allocation50_spill] sm:$0xff] %v3760_v29  ;;  %1483 = vmatpush.msrb.mxu2 %v1435_v27  ;;  %v1434_v27 = vld [vmem:[%s4945_s3 + $0x50] sm:$0xff] }
 0x1bd   :  { %2698 = vmatmul.msk.f32.gmra.mxu0 %vm121_vm1, %v3165_v31 }
 0x1be   :  { %2725 = vmatmul.msk.f32.gmra.mxu1 %vm121_vm1, %v3191_v35  ;;  %1484 = vmatpush.msrb.mxu2 %v1434_v27 }
 0x1c2   :  { %v3769_v28 = vpop.f32.mrf.mxu0 }
 0x1c3   :  { %4999 = vst [vmem:[#allocation51_spill] sm:$0xff] %v3769_v28  ;;  %v3771_v30 = vpop.f32.mrf.mxu1 }
 0x1c4   :  { %5000 = vst [vmem:[#allocation52_spill] sm:$0xff] %v3771_v30 }
 0x1c5   :  { %2699 = vmatmul.msk.f32.gmra.mxu0 %vm121_vm1, %v3178_v33 }
 0x1c6   :  { %2726 = vmatmul.msk.f32.gmra.mxu1 %vm121_vm1, %v3204_v36 }
 0x1ca   :  { %v3777_v29 = vpop.f32.mrf.mxu0 }
 0x1cb   :  { %5001 = vst [vmem:[#allocation53_spill] sm:$0xff] %v3777_v29  ;;  %v3779_v31 = vpop.f32.mrf.mxu1 }
 0x1cc   :  { %5002 = vst [vmem:[#allocation54_spill] sm:$0xff] %v3779_v31 }
 0x1cd   :  { %2700 = vmatmul.msk.f32.gmra.mxu0 %vm121_vm1, %v3191_v35  ;;  %v937_v35 = vpop.f32.mrf.mxu3 }
 0x1ce   :  { %2727 = vmatmul.msk.f32.gmra.mxu1 %vm121_vm1, %v3217_v37 }
 0x1d2   :  { %v3788_v33 = vpop.f32.mrf.mxu0 }
 0x1d3   :  { %5003 = vst [vmem:[#allocation55_spill] sm:$0xff] %v3788_v33  ;;  %v3790_v30 = vpop.f32.mrf.mxu1 }
 0x1d4   :  { %5004 = vst [vmem:[#allocation56_spill] sm:$0xff] %v3790_v30 }
 0x1d5   :  { %2701 = vmatmul.msk.f32.gmra.mxu0 %vm121_vm1, %v3204_v36  ;;  %v3807_v36 = vpop.f32.mrf.mxu2  ;;  %v3813_v28 = vpop.f32.mrf.mxu3 }
 0x1d6   :  { %2728 = vmatmul.msk.f32.gmra.mxu1 %vm121_vm1, %v3230_v38 }
 0x1da   :  { %v3799_v31 = vpop.f32.mrf.mxu0 }
 0x1db   :  { %5005 = vst [vmem:[#allocation57_spill] sm:$0xff] %v3799_v31  ;;  %v3801_v29 = vpop.f32.mrf.mxu1 }
 0x1dc   :  { %5006 = vst [vmem:[#allocation58_spill] sm:$0xff] %v3801_v29 }
 0x1dd   :  { %2702 = vmatmul.msk.f32.gmra.mxu0 %vm121_vm1, %v3217_v37  ;;  %v1433_v37 = vld [vmem:[%s4945_s3 + $0x48] sm:$0xff]  ;;  %v3822_v27 = vpop.f32.mrf.mxu2 }
 0x1de   :  { %2729 = vmatmul.msk.f32.gmra.mxu1 %vm121_vm1, %v3243_v39  ;;  %1485 = vmatpush.msrb.mxu2 %v1433_v37 }
 0x1e2   :  { %v3809_v30 = vpop.f32.mrf.mxu0 }
 0x1e3   :  { %5007 = vst [vmem:[#allocation59_spill] sm:$0xff] %v3809_v30  ;;  %v3811_v33 = vpop.f32.mrf.mxu1 }
 0x1e4   :  { %5008 = vst [vmem:[#allocation60_spill] sm:$0xff] %v3811_v33  ;;  %v3828_v33 = vpop.f32.mrf.mxu3 }
 0x1e5   :  { %2703 = vmatmul.msk.f32.gmra.mxu0 %vm121_vm1, %v3230_v38  ;;  %v1432_v38 = vld [vmem:[%s4945_s3 + $0x40] sm:$0xff] }
 0x1e6   :  { %2730 = vmatmul.msk.f32.gmra.mxu1 %vm121_vm1, %v3256_v41  ;;  %1486 = vmatpush.msrb.mxu2 %v1432_v38  ;;  %v1430_v38 = vld [vmem:[%s4945_s3 + $0x30] sm:$0xff] }
 0x1ea   :  { %v3824_v29 = vpop.f32.mrf.mxu0 }
 0x1eb   :  { %5009 = vst [vmem:[#allocation61_spill] sm:$0xff] %v3824_v29  ;;  %v3826_v30 = vpop.f32.mrf.mxu1  ;;  %v3844_v29 = vpop.f32.mrf.mxu2 }
 0x1ec   :  { %5010 = vst [vmem:[#allocation62_spill] sm:$0xff] %v3826_v30  ;;  %v1440_v30 = vld [vmem:[%s4945_s3 + $0x80] sm:$0xff] }
 0x1ed   :  { %2704 = vmatmul.msk.f32.gmra.mxu0 %vm121_vm1, %v3243_v39  ;;  %1547 = vmatpush.msra.mxu3 %v1440_v30  ;;  %v1431_v39 = vld [vmem:[%s4945_s3 + $0x38] sm:$0xff]  ;;  %v1429_v30 = vld [vmem:[%s4945_s3 + $0x28] sm:$0xff] }
 0x1ee   :  { %2731 = vmatmul.msk.f32.gmra.mxu1 %vm121_vm1, %v3269_v45  ;;  %1487 = vmatpush.msrb.mxu2 %v1431_v39  ;;  %v1427_v39 = vld [vmem:[%s4945_s3 + $0x18] sm:$0xff] }
 0x1f0   :  { %1488 = vmatpush.msrb.mxu2 %v1430_v38  ;;  %v1426_v38 = vld [vmem:[%s4945_s3 + $0x10] sm:$0xff] }
 0x1f2   :  { %v3837_v31 = vpop.f32.mrf.mxu0  ;;  %1489 = vmatpush.msrb.mxu2 %v1429_v30  ;;  %v1425_v30 = vld [vmem:[%s4945_s3 + $0x8] sm:$0xff] }
 0x1f3   :  { %5011 = vst [vmem:[#allocation63_spill] sm:$0xff] %v3837_v31  ;;  %v3839_v37 = vpop.f32.mrf.mxu1  ;;  %v3871_v21 = vpop.f32.mrf.mxu2 }
 0x1f4   :  { %5012 = vst [vmem:[#allocation64_spill] sm:$0xff] %v3839_v37  ;;  %v3856_v37 = vpop.f32.mrf.mxu3 }
 0x1f5   :  { %2705 = vmatmul.msk.f32.gmra.mxu0 %vm121_vm1, %v3256_v41  ;;  %v1428_v41 = vld [vmem:[%s4945_s3 + $0x20] sm:$0xff] }
 0x1f6   :  { %2732 = vmatmul.msk.f32.gmra.mxu1 %vm121_vm1, %v3286_v51  ;;  %1490 = vmatpush.msrb.mxu2 %v1428_v41 }
 0x1f8   :  { %1491 = vmatpush.msrb.mxu2 %v1427_v39  ;;  %v763_v39 = vadd.f32 %v3564_v55, %v3281_v48 }
 0x1fa   :  { %v3861_v31 = vpop.f32.mrf.mxu0  ;;  %1492 = vmatpush.msrb.mxu2 %v1426_v38  ;;  %v1298_v38 = vld [vmem:[%s4944_s2] sm:$0x3]  ;;  %v1007_v63 = vadd.f32 %v934_v25, %v763_v39 }
 0x1fb   :  { %5013 = vst [vmem:[#allocation65_spill] sm:$0xff] %v3861_v31  ;;  %v3863_v62 = vpop.f32.mrf.mxu1  ;;  %v3903_v50 = vperm.slane %v1298_v38, 1 }
 0x1fc   :  { %5014 = vst [vmem:[#allocation66_spill] sm:$0xff] %v3863_v62  ;;  %v3883_v41 = vpop.f32.mrf.mxu3  ;;  %1493 = vmatpush.msrb.mxu2 %v1425_v30  ;;  %v765_v30 = vadd.f32 %v3576_v59, %v3298_v54 }
 0x1fd   :  { %2706 = vmatmul.msk.f32.gmra.mxu0 %vm121_vm1, %v3269_v45  ;;  %v1424_v45 = vld [vmem:[%s4945_s3] sm:$0xff] }
 0x1fe   :  { %2733 = vmatmul.msk.f32.gmra.mxu1 %vm121_vm1, %v3303_v57  ;;  %1494 = vmatpush.msrb.mxu2 %v1424_v45  ;;  %v1009_v48 = vadd.f32 %v937_v35, %v765_v30 }
 0x202   :  { %v3885_v62 = vpop.f32.mrf.mxu0 }
 0x203   :  { %5015 = vst [vmem:[#allocation67_spill] sm:$0xff] %v3885_v62  ;;  %v1178_v31 = vpop.f32.mrf.mxu1  ;;  %v3901_v62 = vpop.f32.mrf.mxu2 }
 0x204   :  { %v1251_v9 = vadd.f32 %v1178_v31, %v1007_v63  ;;  %v3907_v45 = vpop.f32.mrf.mxu3 }
 0x205   :  { %2707 = vmatmul.msk.f32.gmra.mxu0 %vm121_vm1, %v3286_v51 }
 0x206   :  { %2734 = vmatmul.msk.f32.gmra.mxu1 %vm121_vm1, %v3320_v0  ;;  %v1305_v25 = vadd.f32 %v3903_v50, %v1251_v9  ;;  %v762_v9 = vadd.f32 %v3588_v5, %v3313_v60  ;;  %v764_v60 = vadd.f32 %v3602_v32, %v3332_v6 }
 0x208   :  { %v1353_v54 = vmax.f32 %v1305_v25, 0.0 }
 0x20a   :  { %v3905_v55 = vpop.f32.mrf.mxu0 }
 0x20b   :  { %v1181_v13 = vpop.f32.mrf.mxu1  ;;  %v3915_v63 = vpop.f32.mrf.mxu2 }
 0x20c   :  { %v1253_v51 = vadd.f32 %v1181_v13, %v1009_v48  ;;  %v767_v13 = vadd.f32 %v3590_v46, %v3315_v61  ;;  %v3927_v25 = vpop.f32.mrf.mxu3  ;;  %v769_v61 = vadd.f32 %v3604_v40, %v3334_v7  ;;  %v3937_v46 = vperm.slane %v1298_v38, 0 }
 0x20d   :  { %2708 = vmatmul.msk.f32.gmra.mxu0 %vm121_vm1, %v3303_v57  ;;  %v1006_v57 = vadd.f32 %v3807_v36, %v762_v9 }
 0x20e   :  { %v1307_v39 = vadd.f32 %v3903_v50, %v1253_v51  ;;  %2735 = vmatmul.msk.f32.gmra.mxu1 %vm121_vm1, %v3339_v10  ;;  %v1011_v48 = vadd.f32 %v3813_v28, %v767_v13  ;;  %v1008_v28 = vadd.f32 %v3822_v27, %v764_v60  ;;  %v1013_v51 = vadd.f32 %v3828_v33, %v769_v61  ;;  %v2910_v33 = vld [vmem:[%s4942_s0 + $0xb8] sm:$0xff] }
 0x210   :  { %v1355_v59 = vmax.f32 %v1307_v39, 0.0 }
 0x212   :  { %v3917_v31 = vmax.f32 %v1353_v54, %v1355_v59  ;;  %v1089_v35 = vpop.f32.mrf.mxu0 }
 0x213   :  { %v1184_v30 = vpop.f32.mrf.mxu1  ;;  %v1250_v5 = vadd.f32 %v1089_v35, %v1006_v57 }
 0x214   :  { %2742 = vmatmul.msk.f32.vlgmr.msra.gmra.mxu3 %vm1442_vm2, %v3917_v31  ;;  %v1255_v36 = vadd.f32 %v1184_v30, %v1011_v48  ;;  %v3953_v27 = vpop.f32.mrf.mxu3 }
 0x215   :  { %2709 = vmatmul.msk.f32.gmra.mxu0 %vm121_vm1, %v3320_v0  ;;  %v3941_v0 = vpop.f32.mrf.mxu2  ;;  %v1304_v59 = vadd.f32 %v3937_v46, %v1250_v5  ;;  %v771_v5 = vadd.f32 %v3618_v16, %v3353_v19  ;;  %v768_v19 = vadd.f32 %v3628_v15, %v3368_v42 }
 0x216   :  { %2736 = vmatmul.msk.f32.gmra.mxu1 %vm121_vm1, %v3358_v26  ;;  %v1309_v9 = vadd.f32 %v3903_v50, %v1255_v36 }
 0x217   :  { %v1352_v38 = vmax.f32 %v1304_v59, 0.0 }
 0x218   :  { %v1357_v35 = vmax.f32 %v1309_v9, 0.0 }
 0x21a   :  { %v1092_v39 = vpop.f32.mrf.mxu0 }
 0x21b   :  { %v1187_v54 = vpop.f32.mrf.mxu1  ;;  %v1252_v6 = vadd.f32 %v1092_v39, %v1008_v28  ;;  %v1015_v28 = vadd.f32 %v3856_v37, %v771_v5  ;;  %v1012_v37 = vadd.f32 %v3871_v21, %v768_v19 }
 0x21c   :  { %v1257_v32 = vadd.f32 %v1187_v54, %v1013_v51  ;;  %v3982_v54 = vpop.f32.mrf.mxu3 }
 0x21d   :  { %v1306_v7 = vadd.f32 %v3937_v46, %v1252_v6  ;;  %2710 = vmatmul.msk.f32.gmra.mxu0 %vm121_vm1, %v3339_v10  ;;  %v766_v10 = vadd.f32 %v3616_v52, %v3351_v18  ;;  %v3968_v51 = vpop.f32.mrf.mxu2  ;;  %v2911_v18 = vld [vmem:[%s4942_s0 + $0xc0] sm:$0xff]  ;;  %v773_v52 = vadd.f32 %v3630_v47, %v3370_v43 }
 0x21e   :  { %v1311_v40 = vadd.f32 %v3903_v50, %v1257_v32  ;;  %2737 = vmatmul.msk.f32.gmra.mxu1 %vm121_vm1, %v2910_v33 }
 0x21f   :  { %v1354_v30 = vmax.f32 %v1306_v7, 0.0  ;;  %v1010_v36 = vadd.f32 %v3844_v29, %v766_v10  ;;  %v1017_v39 = vadd.f32 %v3883_v41, %v773_v52 }
 0x220   :  { %v1359_v13 = vmax.f32 %v1311_v40, 0.0 }
 0x221   :  { %v3955_v57 = vmax.f32 %v1352_v38, %v1354_v30 }
 0x222   :  { %v3957_v48 = vmax.f32 %v1357_v35, %v1359_v13  ;;  %v1095_v60 = vpop.f32.mrf.mxu0 }
 0x223   :  { %v1190_v61 = vpop.f32.mrf.mxu1  ;;  %1495 = vmatmul.f32.vlgmr.msrb.gmra.mxu2 %v3955_v57  ;;  %v1254_v16 = vadd.f32 %v1095_v60, %v1010_v36  ;;  %v770_v60 = vadd.f32 %v3640_v44, %v3380_v56  ;;  %v772_v56 = vadd.f32 %v3652_v4, %v3392_v2 }
 0x224   :  { %2743 = vmatmul.msk.f32.gmra.mxu3 %vm1442_vm2, %v3957_v48  ;;  %v1259_v29 = vadd.f32 %v1190_v61, %v1015_v28  ;;  %v4001_v61 = vpop.f32.mrf.mxu3 }
 0x225   :  { %2711 = vmatmul.msk.f32.gmra.mxu0 %vm121_vm1, %v3358_v26  ;;  %v1308_v9 = vadd.f32 %v3937_v46, %v1254_v16  ;;  %v3991_v15 = vpop.f32.mrf.mxu2  ;;  %v1014_v10 = vadd.f32 %v3901_v62, %v770_v60  ;;  %v1016_v36 = vadd.f32 %v3915_v63, %v772_v56 }
 0x226   :  { %2738 = vmatmul.msk.f32.gmra.mxu1 %vm121_vm1, %v2911_v18  ;;  %v1313_v6 = vadd.f32 %v3903_v50, %v1259_v29 }
 0x227   :  { %v1356_v47 = vmax.f32 %v1308_v9, 0.0 }
 0x228   :  { %v1361_v21 = vmax.f32 %v1313_v6, 0.0 }
 0x22a   :  { %v1098_v26 = vpop.f32.mrf.mxu0 }
 0x22b   :  { %v1193_v59 = vpop.f32.mrf.mxu1  ;;  %v1256_v32 = vadd.f32 %v1098_v26, %v1012_v37 }
 0x22c   :  { %v1261_v7 = vadd.f32 %v1193_v59, %v1017_v39 }
 0x22d   :  { %v1310_v42 = vadd.f32 %v3937_v46, %v1256_v32  ;;  %2712 = vmatmul.msk.f32.gmra.mxu0 %vm121_vm1, %v2910_v33  ;;  %v775_v33 = vadd.f32 %v3642_v8, %v3382_v58  ;;  %v777_v58 = vadd.f32 %v3654_v20, %v3394_v3  ;;  %v4017_v62 = vpop.f32.mrf.mxu2  ;;  %v967_v20 = vpop.f32.mrf.mxu3  ;;  %v774_v32 = vadd.f32 %v3669_v23, %v3404_v11 }
 0x22e   :  { %v1315_v43 = vadd.f32 %v3903_v50, %v1261_v7  ;;  %2739 = vmatmul.msk.f32.gmra.mxu1 %vm121_vm1, %v3659_v1  ;;  %v779_v7 = vadd.f32 %v3671_v53, %v3406_v12  ;;  %v776_v11 = vadd.f32 %v3683_v24, %v3416_v17  ;;  %v781_v12 = vadd.f32 %v3685_v14, %v3418_v22 }
 0x22f   :  { %v1358_v41 = vmax.f32 %v1310_v42, 0.0  ;;  %v1019_v5 = vadd.f32 %v3907_v45, %v775_v33  ;;  %v1021_v28 = vadd.f32 %v3927_v25, %v777_v58 }
 0x230   :  { %v1363_v40 = vmax.f32 %v1315_v43, 0.0  ;;  %v1023_v43 = vadd.f32 %v3953_v27, %v779_v7 }
 0x231   :  { %v3995_v35 = vmax.f32 %v1356_v47, %v1358_v41  ;;  %v1025_v41 = vadd.f32 %v3982_v54, %v781_v12 }
 0x232   :  { %v3993_v38 = vmax.f32 %v1361_v21, %v1363_v40  ;;  %v1101_v30 = vpop.f32.mrf.mxu0  ;;  %v1020_v21 = vadd.f32 %v3968_v51, %v776_v11 }
 0x233   :  { %v1196_v13 = vpop.f32.mrf.mxu1  ;;  %1498 = vmatmul.f32.gmra.mxu2 %v3995_v35  ;;  %v1258_v8 = vadd.f32 %v1101_v30, %v1014_v10 }
 0x234   :  { %2744 = vmatmul.msk.f32.gmra.mxu3 %vm1442_vm2, %v3993_v38  ;;  %v1263_v44 = vadd.f32 %v1196_v13, %v1019_v5 }
 0x235   :  { %2713 = vmatmul.msk.f32.gmra.mxu0 %vm121_vm1, %v2911_v18  ;;  %v103_v18 = vld [vmem:[%s4942_s0 + $0xd8] sm:$0xff]  ;;  %v1312_v52 = vadd.f32 %v3937_v46, %v1258_v8  ;;  %v4037_v42 = vpop.f32.mrf.mxu2  ;;  %v4050_v53 = vpop.f32.mrf.mxu3  ;;  %v5016_v8 = vld [vmem:[#allocation39_spill] sm:$0xff] }
 0x236   :  { %2740 = vmatmul.msk.f32.gmra.mxu1 %vm121_vm1, %v3690_v34  ;;  %v1317_v2 = vadd.f32 %v3903_v50, %v1263_v44  ;;  %v778_v44 = vadd.f32 %v5016_v8, %v3428_v49  ;;  %v5027_v8 = vld [vmem:[#allocation15_spill] sm:$0xff] }
 0x237   :  { %v1360_v25 = vmax.f32 %v1312_v52, 0.0  ;;  %v5019_v52 = vld [vmem:[#allocation11_spill] sm:$0xff] }
 0x238   :  { %v1365_v29 = vmax.f32 %v1317_v2, 0.0  ;;  %v5020_v2 = vld [vmem:[#allocation41_spill] sm:$0xff] }
 0x23a   :  { %v1104_v45 = vpop.f32.mrf.mxu0 }
 0x23b   :  { %v1199_v19 = vpop.f32.mrf.mxu1  ;;  %v1260_v4 = vadd.f32 %v1104_v45, %v1016_v36  ;;  %v5017_v36 = vld [vmem:[#allocation10_spill] sm:$0xff] }
 0x23c   :  { %v1265_v3 = vadd.f32 %v1199_v19, %v1021_v28  ;;  %v5018_v28 = vld [vmem:[#allocation40_spill] sm:$0xff]  ;;  %v1022_v19 = vadd.f32 %v3991_v15, %v778_v44  ;;  %v5028_v44 = vld [vmem:[#allocation45_spill] sm:$0xff] }
 0x23d   :  { %v1314_v16 = vadd.f32 %v3937_v46, %v1260_v4  ;;  %2714 = vmatmul.msk.f32.gmra.mxu0 %vm121_vm1, %v3659_v1  ;;  %v1018_v1 = vadd.f32 %v3941_v0, %v774_v32  ;;  %v4056_v17 = vpop.f32.mrf.mxu2  ;;  %v973_v33 = vpop.f32.mrf.mxu3  ;;  %v783_v45 = vadd.f32 %v5018_v28, %v5017_v36  ;;  %v780_v4 = vadd.f32 %v5020_v2, %v5019_v52  ;;  %v5029_v28 = vld [vmem:[#allocation16_spill] sm:$0xff]  ;;  %v1598_v2 = vld [vmem:[#allocation4 + $0x68] sm:$0xff] }
 0x23e   :  { %v1319_v63 = vadd.f32 %v3903_v50, %v1265_v3  ;;  %2741 = vmatmul.msk.f32.gmra.mxu1 %vm121_vm1, %v103_v18  ;;  %v5021_v3 = vld [vmem:[#allocation12_spill] sm:$0xff]  ;;  %v784_v36 = vadd.f32 %v5028_v44, %v5027_v8  ;;  %v1596_v44 = vld [vmem:[#allocation4 + $0x58] sm:$0xff] }
 0x23f   :  { %v1362_v37 = vmax.f32 %v1314_v16, 0.0  ;;  %v5022_v16 = vld [vmem:[#allocation42_spill] sm:$0xff] }
 0x240   :  { %v1367_v39 = vmax.f32 %v1319_v63, 0.0  ;;  %v785_v63 = vadd.f32 %v5022_v16, %v5021_v3 }
 0x241   :  { %v4031_v59 = vmax.f32 %v1360_v25, %v1362_v37  ;;  %v1024_v37 = vadd.f32 %v4017_v62, %v780_v4  ;;  %v1028_v4 = vadd.f32 %v4056_v17, %v784_v36  ;;  %v1595_v36 = vld [vmem:[#allocation4 + $0x50] sm:$0xff] }
 0x242   :  { %v4029_v26 = vmax.f32 %v1365_v29, %v1367_v39  ;;  %v1107_v9 = vpop.f32.mrf.mxu0  ;;  %v1029_v39 = vadd.f32 %v967_v20, %v785_v63 }
 0x243   :  { %v1202_v6 = vpop.f32.mrf.mxu1  ;;  %1501 = vmatmul.f32.gmra.mxu2 %v4031_v59  ;;  %v1262_v23 = vadd.f32 %v1107_v9, %v1018_v1 }
 0x244   :  { %2745 = vmatmul.msk.f32.gmra.mxu3 %vm1442_vm2, %v4029_v26  ;;  %v1267_v47 = vadd.f32 %v1202_v6, %v1023_v43 }
 0x245   :  { %2715 = vmatmul.msk.f32.gmra.mxu0 %vm121_vm1, %v3690_v34  ;;  %v1316_v27 = vadd.f32 %v3937_v46, %v1262_v23  ;;  %v4078_v25 = vpop.f32.mrf.mxu2  ;;  %v976_v32 = vpop.f32.mrf.mxu3 }
 0x246   :  { %v1321_v34 = vadd.f32 %v3903_v50, %v1267_v47 }
 0x247   :  { %v1364_v24 = vmax.f32 %v1316_v27, 0.0  ;;  %v1599_v27 = vld [vmem:[#allocation4 + $0x70] sm:$0xff] }
 0x248   :  { %v1369_v51 = vmax.f32 %v1321_v34, 0.0 }
 0x24a   :  { %v1110_v0 = vpop.f32.mrf.mxu0 }
 0x24b   :  { %v1205_v40 = vpop.f32.mrf.mxu1  ;;  %v1264_v30 = vadd.f32 %v1110_v0, %v1020_v21  ;;  %v1600_v0 = vld [vmem:[#allocation4 + $0x78] sm:$0xff] }
 0x24c   :  { %v1269_v13 = vadd.f32 %v1205_v40, %v1025_v41  ;;  %v1602_v40 = vld [vmem:[#allocation4 + $0x88] sm:$0xff]  ;;  %1603 = vmatpush.msra.mxu2 %v1600_v0  ;;  %v5033_v0 = vld [vmem:[#allocation18_spill] sm:$0xff] }
 0x24d   :  { %v1318_v22 = vadd.f32 %v3937_v46, %v1264_v30  ;;  %2716 = vmatmul.msk.f32.gmra.mxu0 %vm121_vm1, %v103_v18  ;;  %v1027_v18 = vadd.f32 %v4001_v61, %v783_v45  ;;  %v884_v41 = vpop.f32.mrf.mxu2  ;;  %1670 = vmatpush.msrb.mxu3 %v1602_v40  ;;  %v5030_v45 = vld [vmem:[#allocation46_spill] sm:$0xff]  ;;  %v5034_v40 = vld [vmem:[#allocation48_spill] sm:$0xff] }
 0x24e   :  { %v1323_v14 = vadd.f32 %v3903_v50, %v1269_v13  ;;  %v5023_v13 = vld [vmem:[#allocation13_spill] sm:$0xff]  ;;  %1604 = vmatpush.msra.mxu2 %v1599_v27  ;;  %v791_v27 = vadd.f32 %v5034_v40, %v5033_v0  ;;  %v5043_v0 = vld [vmem:[#allocation23_spill] sm:$0xff] }
 0x24f   :  { %v1366_v60 = vmax.f32 %v1318_v22, 0.0  ;;  %v5024_v22 = vld [vmem:[#allocation43_spill] sm:$0xff]  ;;  %v5044_v40 = vld [vmem:[#allocation53_spill] sm:$0xff] }
 0x250   :  { %v1371_v54 = vmax.f32 %v1323_v14, 0.0  ;;  %v782_v14 = vadd.f32 %v5024_v22, %v5023_v13  ;;  %1605 = vmatpush.msra.mxu2 %v1598_v2  ;;  %v5035_v22 = vld [vmem:[#allocation19_spill] sm:$0xff] }
 0x251   :  { %v4063_v5 = vmax.f32 %v1364_v24, %v1366_v60  ;;  %v5025_v24 = vld [vmem:[#allocation14_spill] sm:$0xff] }
 0x252   :  { %v4061_v10 = vmax.f32 %v1369_v51, %v1371_v54  ;;  %v1113_v56 = vpop.f32.mrf.mxu0  ;;  %v5026_v51 = vld [vmem:[#allocation44_spill] sm:$0xff]  ;;  %v1026_v54 = vadd.f32 %v4037_v42, %v782_v14  ;;  %v5036_v14 = vld [vmem:[#allocation49_spill] sm:$0xff] }
 0x253   :  { %v1208_v58 = vpop.f32.mrf.mxu1  ;;  %1504 = vmatmul.f32.gmra.mxu2 %v4063_v5  ;;  %v1266_v49 = vadd.f32 %v1113_v56, %v1022_v19  ;;  %v787_v60 = vadd.f32 %v5026_v51, %v5025_v24  ;;  %v789_v19 = vadd.f32 %v5030_v45, %v5029_v28  ;;  %v788_v24 = vadd.f32 %v5036_v14, %v5035_v22  ;;  %v5037_v51 = vld [vmem:[#allocation20_spill] sm:$0xff] }
 0x254   :  { %2746 = vmatmul.msk.f32.gmra.mxu3 %vm1442_vm2, %v4061_v10  ;;  %v1271_v29 = vadd.f32 %v1208_v58, %v1027_v18  ;;  %v979_v58 = vpop.f32.mrf.mxu3 }
 0x255   :  { %v1320_v15 = vadd.f32 %v3937_v46, %v1266_v49  ;;  %v1031_v56 = vadd.f32 %v4050_v53, %v787_v60  ;;  %v1033_v3 = vadd.f32 %v973_v33, %v789_v19  ;;  %v887_v49 = vpop.f32.mrf.mxu2  ;;  %v5038_v60 = vld [vmem:[#allocation50_spill] sm:$0xff]  ;;  %v1032_v28 = vadd.f32 %v884_v41, %v788_v24 }
 0x256   :  { %v1325_v61 = vadd.f32 %v3903_v50, %v1271_v29 }
 0x257   :  { %v1368_v12 = vmax.f32 %v1320_v15, 0.0 }
 0x258   :  { %v1373_v23 = vmax.f32 %v1325_v61, 0.0 }
 0x25a   :  { %v1116_v9 = vpop.f32.mrf.mxu0 }
 0x25b   :  { %v1211_v6 = vpop.f32.mrf.mxu1  ;;  %v1268_v7 = vadd.f32 %v1116_v9, %v1024_v37 }
 0x25c   :  { %v1273_v1 = vadd.f32 %v1211_v6, %v1029_v39  ;;  %v982_v6 = vpop.f32.mrf.mxu3 }
 0x25d   :  { %v1322_v43 = vadd.f32 %v3937_v46, %v1268_v7  ;;  %v890_v13 = vpop.f32.mrf.mxu2 }
 0x25e   :  { %v1327_v11 = vadd.f32 %v3903_v50, %v1273_v1 }
 0x25f   :  { %v1370_v47 = vmax.f32 %v1322_v43, 0.0  ;;  %v1597_v43 = vld [vmem:[#allocation4 + $0x60] sm:$0xff] }
 0x260   :  { %v1375_v21 = vmax.f32 %v1327_v11, 0.0  ;;  %1606 = vmatpush.msra.mxu2 %v1597_v43  ;;  %v5041_v43 = vld [vmem:[#allocation22_spill] sm:$0xff] }
 0x261   :  { %v4087_v20 = vmax.f32 %v1368_v12, %v1370_v47  ;;  %v5032_v47 = vld [vmem:[#allocation47_spill] sm:$0xff] }
 0x262   :  { %v4085_v62 = vmax.f32 %v1373_v23, %v1375_v21  ;;  %v1119_v34 = vpop.f32.mrf.mxu0  ;;  %v5031_v23 = vld [vmem:[#allocation17_spill] sm:$0xff]  ;;  %1607 = vmatpush.msra.mxu2 %v1596_v44 }
 0x263   :  { %v1214_v30 = vpop.f32.mrf.mxu1  ;;  %1507 = vmatmul.f32.gmra.mxu2 %v4087_v20  ;;  %v1270_v18 = vadd.f32 %v1119_v34, %v1026_v54  ;;  %v786_v21 = vadd.f32 %v5032_v47, %v5031_v23  ;;  %v793_v54 = vadd.f32 %v5038_v60, %v5037_v51  ;;  %v1593_v51 = vld [vmem:[#allocation4 + $0x40] sm:$0xff] }
 0x264   :  { %2747 = vmatmul.msk.f32.gmra.mxu3 %vm1442_vm2, %v4085_v62  ;;  %v1275_v52 = vadd.f32 %v1214_v30, %v1031_v56  ;;  %v1035_v30 = vadd.f32 %v976_v32, %v791_v27  ;;  %v985_v19 = vpop.f32.mrf.mxu3  ;;  %1608 = vmatpush.msra.mxu2 %v1595_v36  ;;  %v792_v27 = vadd.f32 %v5044_v40, %v5043_v0  ;;  %v5053_v40 = vld [vmem:[#allocation28_spill] sm:$0xff] }
 0x265   :  { %v1324_v42 = vadd.f32 %v3937_v46, %v1270_v18  ;;  %v1030_v34 = vadd.f32 %v4078_v25, %v786_v21  ;;  %v1037_v45 = vadd.f32 %v979_v58, %v793_v54 }
 0x266   :  { %v1329_v53 = vadd.f32 %v3903_v50, %v1275_v52  ;;  %v1036_v60 = vadd.f32 %v890_v13, %v792_v27  ;;  %v5054_v27 = vld [vmem:[#allocation58_spill] sm:$0xff] }
 0x267   :  { %v1372_v15 = vmax.f32 %v1324_v42, 0.0 }
 0x268   :  { %v1377_v61 = vmax.f32 %v1329_v53, 0.0 }
 0x26a   :  { %v1122_v16 = vpop.f32.mrf.mxu0 }
 0x26b   :  { %v1217_v63 = vpop.f32.mrf.mxu1  ;;  %v1272_v29 = vadd.f32 %v1122_v16, %v1028_v4 }
 0x26c   :  { %v1277_v37 = vadd.f32 %v1217_v63, %v1033_v3  ;;  %v893_v63 = vpop.f32.mrf.mxu2  ;;  %v988_v23 = vpop.f32.mrf.mxu3 }
 0x26d   :  { %v1326_v39 = vadd.f32 %v3937_v46, %v1272_v29 }
 0x26e   :  { %v1331_v9 = vadd.f32 %v3903_v50, %v1277_v37 }
 0x26f   :  { %v1374_v7 = vmax.f32 %v1326_v39, 0.0  ;;  %v1594_v39 = vld [vmem:[#allocation4 + $0x48] sm:$0xff] }
 0x270   :  { %v1379_v1 = vmax.f32 %v1331_v9, 0.0  ;;  %1609 = vmatpush.msra.mxu2 %v1594_v39  ;;  %v5047_v39 = vld [vmem:[#allocation25_spill] sm:$0xff] }
 0x271   :  { %v4109_v33 = vmax.f32 %v1372_v15, %v1374_v7  ;;  %v5040_v7 = vld [vmem:[#allocation51_spill] sm:$0xff] }
 0x272   :  { %v4107_v17 = vmax.f32 %v1377_v61, %v1379_v1  ;;  %v1125_v11 = vpop.f32.mrf.mxu0  ;;  %v5039_v61 = vld [vmem:[#allocation21_spill] sm:$0xff]  ;;  %1610 = vmatpush.msra.mxu2 %v1593_v51 }
 0x273   :  { %v1220_v12 = vpop.f32.mrf.mxu1  ;;  %1510 = vmatmul.f32.gmra.mxu2 %v4109_v33  ;;  %v1274_v56 = vadd.f32 %v1125_v11, %v1030_v34  ;;  %v790_v1 = vadd.f32 %v5040_v7, %v5039_v61  ;;  %v5042_v11 = vld [vmem:[#allocation52_spill] sm:$0xff]  ;;  %v5049_v61 = vld [vmem:[#allocation26_spill] sm:$0xff] }
 0x274   :  { %2748 = vmatmul.msk.f32.gmra.mxu3 %vm1442_vm2, %v4107_v17  ;;  %v1279_v8 = vadd.f32 %v1220_v12, %v1035_v30  ;;  %v795_v12 = vadd.f32 %v5042_v11, %v5041_v43  ;;  %v5045_v34 = vld [vmem:[#allocation24_spill] sm:$0xff]  ;;  %v5046_v30 = vld [vmem:[#allocation54_spill] sm:$0xff] }
 0x275   :  { %v1328_v25 = vadd.f32 %v3937_v46, %v1274_v56  ;;  %v1034_v47 = vadd.f32 %v887_v49, %v790_v1  ;;  %v797_v22 = vadd.f32 %v5046_v30, %v5045_v34  ;;  %v896_v56 = vpop.f32.mrf.mxu2  ;;  %v5050_v7 = vld [vmem:[#allocation56_spill] sm:$0xff]  ;;  %v801_v34 = vadd.f32 %v5054_v27, %v5053_v40 }
 0x276   :  { %v1333_v32 = vadd.f32 %v3903_v50, %v1279_v8  ;;  %v1039_v21 = vadd.f32 %v982_v6, %v795_v12  ;;  %v799_v1 = vadd.f32 %v5050_v7, %v5049_v61 }
 0x277   :  { %v1376_v42 = vmax.f32 %v1328_v25, 0.0  ;;  %v1041_v54 = vadd.f32 %v985_v19, %v797_v22 }
 0x278   :  { %v1381_v53 = vmax.f32 %v1333_v32, 0.0  ;;  %v1043_v12 = vadd.f32 %v988_v23, %v799_v1  ;;  %v5059_v1 = vld [vmem:[#allocation31_spill] sm:$0xff] }
 0x27a   :  { %v1128_v18 = vpop.f32.mrf.mxu0 }
 0x27b   :  { %v1223_v52 = vpop.f32.mrf.mxu1  ;;  %v1276_v2 = vadd.f32 %v1128_v18, %v1032_v28 }
 0x27c   :  { %v1281_v4 = vadd.f32 %v1223_v52, %v1037_v45  ;;  %v991_v45 = vpop.f32.mrf.mxu3 }
 0x27d   :  { %v1330_v3 = vadd.f32 %v3937_v46, %v1276_v2  ;;  %v899_v43 = vpop.f32.mrf.mxu2 }
 0x27e   :  { %v1335_v16 = vadd.f32 %v3903_v50, %v1281_v4 }
 0x27f   :  { %v1378_v29 = vmax.f32 %v1330_v3, 0.0  ;;  %v1592_v3 = vld [vmem:[#allocation4 + $0x38] sm:$0xff] }
 0x280   :  { %v1383_v41 = vmax.f32 %v1335_v16, 0.0  ;;  %v1601_v16 = vld [vmem:[#allocation4 + $0x80] sm:$0xff]  ;;  %1611 = vmatpush.msra.mxu2 %v1592_v3 }
 0x281   :  { %v4129_v37 = vmax.f32 %v1376_v42, %v1378_v29  ;;  %v2774_v42 = vld [vmem:[%s4947_s5 + $0x88] sm:$0xff]  ;;  %1671 = vmatpush.msrb.mxu3 %v1601_v16  ;;  %v2773_v3 = vld [vmem:[%s4947_s5 + $0x80] sm:$0xff] }
 0x282   :  { %v4127_v58 = vmax.f32 %v1381_v53, %v1383_v41  ;;  %v1131_v9 = vpop.f32.mrf.mxu0  ;;  %v1591_v41 = vld [vmem:[#allocation4 + $0x30] sm:$0xff]  ;;  %1772 = vmatpush.msrb.mxu0 %v2774_v42 }
 0x283   :  { %v1226_v15 = vpop.f32.mrf.mxu1  ;;  %1513 = vmatmul.f32.gmra.mxu2 %v4129_v37  ;;  %v1278_v14 = vadd.f32 %v1131_v9, %v1034_v47  ;;  %v5048_v9 = vld [vmem:[#allocation55_spill] sm:$0xff] }
 0x284   :  { %2749 = vmatmul.msk.f32.gmra.mxu3 %vm1442_vm2, %v4127_v58  ;;  %v1283_v24 = vadd.f32 %v1226_v15, %v1039_v21  ;;  %v794_v15 = vadd.f32 %v5048_v9, %v5047_v39  ;;  %1612 = vmatpush.msra.mxu2 %v1591_v41  ;;  %v5051_v47 = vld [vmem:[#allocation27_spill] sm:$0xff]  ;;  %v5052_v21 = vld [vmem:[#allocation57_spill] sm:$0xff]  ;;  %v994_v30 = vpop.f32.mrf.mxu3  ;;  %v5057_v39 = vld [vmem:[#allocation30_spill] sm:$0xff] }
 0x285   :  { %v1332_v36 = vadd.f32 %v3937_v46, %v1278_v14  ;;  %v796_v0 = vadd.f32 %v5052_v21, %v5051_v47  ;;  %1773 = vmatpush.msrb.mxu0 %v2773_v3  ;;  %v5058_v9 = vld [vmem:[#allocation60_spill] sm:$0xff]  ;;  %v5062_v21 = vld [vmem:[#allocation62_spill] sm:$0xff] }
 0x286   :  { %v1337_v49 = vadd.f32 %v3903_v50, %v1283_v24  ;;  %v1038_v11 = vadd.f32 %v893_v63, %v794_v15  ;;  %v1590_v24 = vld [vmem:[#allocation4 + $0x28] sm:$0xff]  ;;  %v803_v15 = vadd.f32 %v5058_v9, %v5057_v39  ;;  %v5061_v47 = vld [vmem:[#allocation32_spill] sm:$0xff] }
 0x287   :  { %v1380_v25 = vmax.f32 %v1332_v36, 0.0  ;;  %1613 = vmatpush.msra.mxu2 %v1590_v24  ;;  %v1040_v51 = vadd.f32 %v896_v56, %v796_v0  ;;  %v805_v0 = vadd.f32 %v5062_v21, %v5061_v47  ;;  %v5067_v9 = vld [vmem:[#allocation64_spill] sm:$0xff] }
 0x288   :  { %v1385_v32 = vmax.f32 %v1337_v49, 0.0  ;;  %v902_v49 = vpop.f32.mrf.mxu2  ;;  %v1047_v7 = vadd.f32 %v994_v30, %v803_v15 }
 0x28a   :  { %v1134_v8 = vpop.f32.mrf.mxu0 }
 0x28b   :  { %v1229_v44 = vpop.f32.mrf.mxu1  ;;  %v1280_v6 = vadd.f32 %v1134_v8, %v1036_v60  ;;  %v1045_v60 = vadd.f32 %v991_v45, %v801_v34 }
 0x28c   :  { %v1285_v28 = vadd.f32 %v1229_v44, %v1041_v54 }
 0x28d   :  { %v1334_v18 = vadd.f32 %v3937_v46, %v1280_v6 }
 0x28e   :  { %v1339_v52 = vadd.f32 %v3903_v50, %v1285_v28 }
 0x28f   :  { %v1382_v2 = vmax.f32 %v1334_v18, 0.0 }
 0x290   :  { %v1387_v4 = vmax.f32 %v1339_v52, 0.0  ;;  %v905_v40 = vpop.f32.mrf.mxu2 }
 0x291   :  { %v4148_v19 = vmax.f32 %v1380_v25, %v1382_v2  ;;  %v997_v2 = vpop.f32.mrf.mxu3 }
 0x292   :  { %v4146_v13 = vmax.f32 %v1385_v32, %v1387_v4  ;;  %v1137_v53 = vpop.f32.mrf.mxu0  ;;  %v1589_v4 = vld [vmem:[#allocation4 + $0x20] sm:$0xff] }
 0x293   :  { %v1232_v29 = vpop.f32.mrf.mxu1  ;;  %1516 = vmatmul.f32.gmra.mxu2 %v4148_v19  ;;  %v1282_v22 = vadd.f32 %v1137_v53, %v1038_v11  ;;  %v5055_v53 = vld [vmem:[#allocation29_spill] sm:$0xff] }
 0x294   :  { %2750 = vmatmul.msk.f32.gmra.mxu3 %vm1442_vm2, %v4146_v13  ;;  %v1287_v14 = vadd.f32 %v1232_v29, %v1043_v12  ;;  %1614 = vmatpush.msra.mxu2 %v1589_v4  ;;  %v5056_v29 = vld [vmem:[#allocation59_spill] sm:$0xff]  ;;  %v5060_v11 = vld [vmem:[#allocation61_spill] sm:$0xff] }
 0x295   :  { %v1336_v44 = vadd.f32 %v3937_v46, %v1282_v22  ;;  %v798_v41 = vadd.f32 %v5056_v29, %v5055_v53  ;;  %v800_v12 = vadd.f32 %v5060_v11, %v5059_v1  ;;  %v1588_v22 = vld [vmem:[#allocation4 + $0x18] sm:$0xff]  ;;  %v5069_v1 = vld [vmem:[#allocation38_spill] sm:$0xff] }
 0x296   :  { %v1341_v63 = vadd.f32 %v3903_v50, %v1287_v14  ;;  %v1587_v14 = vld [vmem:[#allocation4 + $0x10] sm:$0xff]  ;;  %1615 = vmatpush.msra.mxu2 %v1588_v22  ;;  %v5065_v29 = vld [vmem:[#allocation33_spill] sm:$0xff]  ;;  %v5072_v22 = vld [vmem:[#allocation66_spill] sm:$0xff] }
 0x297   :  { %v1384_v18 = vmax.f32 %v1336_v44, 0.0  ;;  %v1042_v61 = vadd.f32 %v899_v43, %v798_v41  ;;  %v1044_v24 = vadd.f32 %v902_v49, %v800_v12  ;;  %v1586_v49 = vld [vmem:[#allocation4 + $0x8] sm:$0xff] }
 0x298   :  { %v1389_v52 = vmax.f32 %v1341_v63, 0.0  ;;  %1616 = vmatpush.msra.mxu2 %v1587_v14  ;;  %v908_v4 = vpop.f32.mrf.mxu2  ;;  %v5066_v41 = vld [vmem:[#allocation63_spill] sm:$0xff] }
 0x299   :  { %v1000_v63 = vpop.f32.mrf.mxu3  ;;  %v802_v39 = vadd.f32 %v5066_v41, %v5065_v29 }
 0x29a   :  { %v1140_v54 = vpop.f32.mrf.mxu0  ;;  %1617 = vmatpush.msra.mxu2 %v1586_v49 }
 0x29b   :  { %v1235_v8 = vpop.f32.mrf.mxu1  ;;  %v1284_v23 = vadd.f32 %v1140_v54, %v1040_v51  ;;  %v1049_v51 = vadd.f32 %v997_v2, %v805_v0  ;;  %v1046_v12 = vadd.f32 %v905_v40, %v802_v39  ;;  %v5070_v0 = vld [vmem:[#allocation34_spill] sm:$0xff] }
 0x29c   :  { %v1289_v36 = vadd.f32 %v1235_v8, %v1045_v60 }
 0x29d   :  { %v1338_v6 = vadd.f32 %v3937_v46, %v1284_v23 }
 0x29e   :  { %v1343_v28 = vadd.f32 %v3903_v50, %v1289_v36 }
 0x29f   :  { %v1386_v25 = vmax.f32 %v1338_v6, 0.0 }
 0x2a0   :  { %v1391_v32 = vmax.f32 %v1343_v28, 0.0 }
 0x2a1   :  { %v4170_v45 = vmax.f32 %v1384_v18, %v1386_v25  ;;  %v5063_v25 = vld [vmem:[#allocation8_spill] sm:$0xff]  ;;  %v1003_v21 = vpop.f32.mrf.mxu3 }
 0x2a2   :  { %v4168_v56 = vmax.f32 %v1389_v52, %v1391_v32  ;;  %v1143_v16 = vpop.f32.mrf.mxu0  ;;  %v5064_v32 = vld [vmem:[#allocation37_spill] sm:$0xff] }
 0x2a3   :  { %v1238_v42 = vpop.f32.mrf.mxu1  ;;  %1519 = vmatmul.f32.gmra.mxu2 %v4170_v45  ;;  %v1286_v27 = vadd.f32 %v1143_v16, %v1042_v61  ;;  %v561_v2 = vadd.f32 %v5064_v32, %v5063_v25  ;;  %v1585_v61 = vld [vmem:[#allocation4] sm:$0xff] }
 0x2a4   :  { %2751 = vmatmul.msk.f32.gmra.mxu3 %vm1442_vm2, %v4168_v56  ;;  %v1291_v34 = vadd.f32 %v1238_v42, %v1047_v7  ;;  %1618 = vmatpush.msra.mxu2 %v1585_v61  ;;  %v5068_v7 = vld [vmem:[#allocation9_spill] sm:$0xff] }
 0x2a5   :  { %v1340_v43 = vadd.f32 %v3937_v46, %v1286_v27  ;;  %v807_v15 = vadd.f32 %v5067_v9, %v561_v2  ;;  %v564_v11 = vadd.f32 %v5069_v1, %v5068_v7  ;;  %v5071_v27 = vld [vmem:[#allocation65_spill] sm:$0xff]  ;;  %v5075_v9 = vld [vmem:[#allocation36_spill] sm:$0xff] }
 0x2a6   :  { %v1345_v30 = vadd.f32 %v3903_v50, %v1291_v34  ;;  %v804_v34 = vadd.f32 %v5071_v27, %v5070_v0 }
 0x2a7   :  { %v1388_v6 = vmax.f32 %v1340_v43, 0.0  ;;  %v1051_v47 = vadd.f32 %v1000_v63, %v807_v15  ;;  %v809_v14 = vadd.f32 %v5072_v22, %v564_v11  ;;  %v808_v15 = vadd.f32 %v3905_v55, %v5075_v9  ;;  %v1728_v55 = vld [vmem:[%s4947_s5 + $0x38] sm:$0xff]  ;;  %v2799_v22 = vld [vmem:[%s4947_s5 + $0xd0] sm:$0xff] }
 0x2a8   :  { %v1393_v28 = vmax.f32 %v1345_v30, 0.0  ;;  %1870 = vmatpush.msrb.mxu2 %v2799_v22  ;;  %v2832_v9 = vld [vmem:[%s4947_s5 + $0x158] sm:$0xff] }
 0x2a9   :  { %v1053_v43 = vadd.f32 %v1003_v21, %v809_v14 }
 0x2aa   :  { %v1146_v60 = vpop.f32.mrf.mxu0 }
 0x2ab   :  { %v1241_v54 = vpop.f32.mrf.mxu1  ;;  %v1288_v8 = vadd.f32 %v1146_v60, %v1044_v24  ;;  %v2772_v60 = vld [vmem:[%s4947_s5 + $0x78] sm:$0xff] }
 0x2ac   :  { %v1293_v44 = vadd.f32 %v1241_v54, %v1049_v51  ;;  %1774 = vmatpush.msrb.mxu0 %v2772_v60  ;;  %v1048_v54 = vadd.f32 %v908_v4, %v804_v34 }
 0x2ad   :  { %v1342_v23 = vadd.f32 %v3937_v46, %v1288_v8 }
 0x2ae   :  { %v1347_v36 = vadd.f32 %v3903_v50, %v1293_v44 }
 0x2af   :  { %v1390_v18 = vmax.f32 %v1342_v23, 0.0 }
 0x2b0   :  { %v1395_v52 = vmax.f32 %v1347_v36, 0.0  ;;  %v911_v36 = vpop.f32.mrf.mxu2 }
 0x2b1   :  { %v4194_v16 = vmax.f32 %v1388_v6, %v1390_v18 }
 0x2b2   :  { %v4192_v3 = vmax.f32 %v1393_v28, %v1395_v52  ;;  %v1149_v42 = vpop.f32.mrf.mxu0 }
 0x2b3   :  { %v1244_v53 = vpop.f32.mrf.mxu1  ;;  %1522 = vmatmul.f32.gmra.mxu2 %v4194_v16  ;;  %v1290_v24 = vadd.f32 %v1149_v42, %v1046_v12  ;;  %v5073_v42 = vld [vmem:[#allocation35_spill] sm:$0xff] }
 0x2b4   :  { %2752 = vmatmul.msk.f32.gmra.mxu3 %vm1442_vm2, %v4192_v3  ;;  %v1295_v51 = vadd.f32 %v1244_v53, %v1051_v47  ;;  %v5074_v53 = vld [vmem:[#allocation67_spill] sm:$0xff]  ;;  %v2771_v47 = vld [vmem:[%s4947_s5 + $0x70] sm:$0xff] }
 0x2b5   :  { %v1344_v40 = vadd.f32 %v3937_v46, %v1290_v24  ;;  %v806_v29 = vadd.f32 %v5074_v53, %v5073_v42  ;;  %1775 = vmatpush.msrb.mxu0 %v2771_v47  ;;  %v2831_v47 = vld [vmem:[%s4947_s5 + $0x150] sm:$0xff] }
 0x2b6   :  { %v1349_v44 = vadd.f32 %v3903_v50, %v1295_v51 }
 0x2b7   :  { %v1392_v18 = vmax.f32 %v1344_v40, 0.0  ;;  %v1050_v41 = vadd.f32 %v911_v36, %v806_v29  ;;  %v2797_v40 = vld [vmem:[%s4947_s5 + $0xc0] sm:$0xff]  ;;  %v1723_v36 = vld [vmem:[%s4947_s5 + $0x10] sm:$0xff] }
 0x2b8   :  { %v1397_v52 = vmax.f32 %v1349_v44, 0.0  ;;  %v914_v39 = vpop.f32.mrf.mxu2  ;;  %v2814_v44 = vld [vmem:[%s4947_s5 + $0x108] sm:$0xff]  ;;  %v2793_v29 = vld [vmem:[%s4947_s5 + $0xa0] sm:$0xff] }
 0x2b9   :  { %v1052_v7 = vadd.f32 %v914_v39, %v808_v15  ;;  %v2791_v39 = vld [vmem:[%s4947_s5 + $0x90] sm:$0xff] }
 0x2ba   :  { %v1152_v30 = vpop.f32.mrf.mxu0  ;;  %v2811_v15 = vld [vmem:[%s4947_s5 + $0xf0] sm:$0xff] }
 0x2bb   :  { %v1247_v8 = vpop.f32.mrf.mxu1  ;;  %v1292_v63 = vadd.f32 %v1152_v30, %v1048_v54  ;;  %v1724_v54 = vld [vmem:[%s4947_s5 + $0x18] sm:$0xff] }
 0x2bc   :  { %v1297_v23 = vadd.f32 %v1247_v8, %v1053_v43  ;;  %v2766_v8 = vld [vmem:[%s4947_s5 + $0x48] sm:$0xff] }
 0x2bd   :  { %v1346_v6 = vadd.f32 %v3937_v46, %v1292_v63 }
 0x2be   :  { %v1351_v28 = vadd.f32 %v3903_v50, %v1297_v23  ;;  %v1729_v50 = vld [vmem:[%s4947_s5 + $0x40] sm:$0xff] }
 0x2bf   :  { %v1394_v49 = vmax.f32 %v1346_v6, 0.0  ;;  %1816 = vmatpush.msrb.mxu1 %v1729_v50  ;;  %v1722_v6 = vld [vmem:[%s4947_s5 + $0x8] sm:$0xff]  ;;  %v2792_v50 = vld [vmem:[%s4947_s5 + $0x98] sm:$0xff] }
 0x2c0   :  { %v1399_v25 = vmax.f32 %v1351_v28, 0.0  ;;  %v2796_v28 = vld [vmem:[%s4947_s5 + $0xb8] sm:$0xff] }
 0x2c1   :  { %v4216_v2 = vmax.f32 %v1392_v18, %v1394_v49  ;;  %1817 = vmatpush.msrb.mxu1 %v1728_v55  ;;  %v1721_v18 = vld [vmem:[%s4947_s5] sm:$0xff] }
 0x2c2   :  { %v4214_v32 = vmax.f32 %v1397_v52, %v1399_v25  ;;  %v1155_v4 = vpop.f32.mrf.mxu0  ;;  %v2813_v52 = vld [vmem:[%s4947_s5 + $0x100] sm:$0xff] }
 0x2c3   :  { %1525 = vmatmul.f32.gmra.mxu2 %v4216_v2  ;;  %v1294_v61 = vadd.f32 %v1155_v4, %v1050_v41  ;;  %v2794_v4 = vld [vmem:[%s4947_s5 + $0xa8] sm:$0xff]  ;;  %v2812_v41 = vld [vmem:[%s4947_s5 + $0xf8] sm:$0xff] }
 0x2c4   :  { %2753 = vmatmul.msk.f32.gmra.mxu3 %vm1442_vm2, %v4214_v32 }
 0x2c5   :  { %v1348_v11 = vadd.f32 %v3937_v46, %v1294_v61 }
 0x2c7   :  { %v1396_v0 = vmax.f32 %v1348_v11, 0.0  ;;  %v2809_v11 = vld [vmem:[%s4947_s5 + $0xe0] sm:$0xff] }
 0x2ca   :  { %v1158_v1 = vpop.f32.mrf.mxu0 }
 0x2cb   :  { %v1296_v12 = vadd.f32 %v1158_v1, %v1052_v7  ;;  %v2810_v1 = vld [vmem:[%s4947_s5 + $0xe8] sm:$0xff] }
 0x2cc   :  { %2754 = vmatmul.msk.f32.vlgmr.msrb.gmra.mxu3 %vm1442_vm2, %v3917_v31  ;;  %v2770_v31 = vld [vmem:[%s4947_s5 + $0x68] sm:$0xff] }
 0x2cd   :  { %v1350_v21 = vadd.f32 %v3937_v46, %v1296_v12  ;;  %1776 = vmatpush.msrb.mxu0 %v2770_v31  ;;  %v1727_v46 = vld [vmem:[%s4947_s5 + $0x30] sm:$0xff]  ;;  %v2808_v12 = vld [vmem:[%s4947_s5 + $0xd8] sm:$0xff]  ;;  %v2830_v31 = vld [vmem:[%s4947_s5 + $0x148] sm:$0xff] }
 0x2ce   :  { %1818 = vmatpush.msrb.mxu1 %v1727_v46 }
 0x2cf   :  { %v1398_v27 = vmax.f32 %v1350_v21, 0.0 }
 0x2d1   :  { %v4235_v34 = vmax.f32 %v1396_v0, %v1398_v27 }
 0x2d3   :  { %1528 = vmatmul.f32.gmra.mxu2 %v4235_v34 }
 0x2d4   :  { %2755 = vmatmul.msk.f32.gmra.mxu3 %vm1442_vm2, %v3957_v48 }
 0x2db   :  { %1619 = vmatmul.f32.vlgmr.msra.gmra.mxu2 %v3955_v57  ;;  %v4258_v57 = vpop.f32.mrf.mxu3 }
 0x2dc   :  { %2756 = vmatmul.msk.f32.gmra.mxu3 %vm1442_vm2, %v3993_v38  ;;  %v2769_v38 = vld [vmem:[%s4947_s5 + $0x60] sm:$0xff] }
 0x2dd   :  { %1777 = vmatpush.msrb.mxu0 %v2769_v38 }
 0x2e3   :  { %1622 = vmatmul.f32.gmra.mxu2 %v3995_v35  ;;  %v4263_v48 = vpop.f32.mrf.mxu3  ;;  %v4271_v35 = vpop.f32.mrf.mxu2 }
 0x2e4   :  { %2757 = vmatmul.msk.f32.gmra.mxu3 %vm1442_vm2, %v4029_v26  ;;  %v1550_v27 = vadd.f32 %v4258_v57, %v4271_v35  ;;  %v2829_v57 = vld [vmem:[%s4947_s5 + $0x140] sm:$0xff] }
 0x2eb   :  { %1625 = vmatmul.f32.gmra.mxu2 %v4031_v59  ;;  %v4273_v26 = vpop.f32.mrf.mxu3  ;;  %v1726_v59 = vld [vmem:[%s4947_s5 + $0x28] sm:$0xff] }
 0x2ec   :  { %2758 = vmatmul.msk.f32.gmra.mxu3 %vm1442_vm2, %v4061_v10  ;;  %1819 = vmatpush.msrb.mxu1 %v1726_v59  ;;  %v4281_v10 = vpop.f32.mrf.mxu2 }
 0x2ed   :  { %v1553_v38 = vadd.f32 %v4263_v48, %v4281_v10  ;;  %v2828_v48 = vld [vmem:[%s4947_s5 + $0x138] sm:$0xff] }
 0x2f3   :  { %1628 = vmatmul.f32.gmra.mxu2 %v4063_v5  ;;  %v4283_v5 = vpop.f32.mrf.mxu3 }
 0x2f4   :  { %2759 = vmatmul.msk.f32.gmra.mxu3 %vm1442_vm2, %v4085_v62  ;;  %v2768_v62 = vld [vmem:[%s4947_s5 + $0x58] sm:$0xff] }
 0x2f5   :  { %1778 = vmatpush.msrb.mxu0 %v2768_v62 }
 0x2fb   :  { %1631 = vmatmul.f32.gmra.mxu2 %v4087_v20  ;;  %v4291_v20 = vpop.f32.mrf.mxu2 }
 0x2fc   :  { %2760 = vmatmul.msk.f32.gmra.mxu3 %vm1442_vm2, %v4107_v17  ;;  %v4293_v17 = vpop.f32.mrf.mxu3 }
 0x303   :  { %1634 = vmatmul.f32.gmra.mxu2 %v4109_v33  ;;  %v4298_v33 = vpop.f32.mrf.mxu2 }
 0x304   :  { %2761 = vmatmul.msk.f32.gmra.mxu3 %vm1442_vm2, %v4127_v58  ;;  %v4300_v58 = vpop.f32.mrf.mxu3 }
 0x30b   :  { %1637 = vmatmul.f32.gmra.mxu2 %v4129_v37  ;;  %v1725_v37 = vld [vmem:[%s4947_s5 + $0x20] sm:$0xff] }
 0x30c   :  { %2762 = vmatmul.msk.f32.gmra.mxu3 %vm1442_vm2, %v4146_v13  ;;  %v2767_v13 = vld [vmem:[%s4947_s5 + $0x50] sm:$0xff]  ;;  %1820 = vmatpush.msrb.mxu1 %v1725_v37  ;;  %v4319_v14 = vpop.f32.mrf.mxu3 }
 0x30d   :  { %1779 = vmatpush.msrb.mxu0 %v2767_v13  ;;  %v1556_v13 = vadd.f32 %v4273_v26, %v4291_v20  ;;  %v2827_v20 = vld [vmem:[%s4947_s5 + $0x130] sm:$0xff] }
 0x30e   :  { %1821 = vmatpush.msrb.mxu1 %v1724_v54 }
 0x30f   :  { %1780 = vmatpush.msrb.mxu0 %v2766_v8 }
 0x310   :  { %1822 = vmatpush.msrb.mxu1 %v1723_v36 }
 0x312   :  { %1823 = vmatpush.msrb.mxu1 %v1722_v6  ;;  %v2825_v6 = vld [vmem:[%s4947_s5 + $0x120] sm:$0xff] }
 0x313   :  { %1640 = vmatmul.f32.gmra.mxu2 %v4148_v19  ;;  %v2816_v19 = vld [vmem:[%s4947_s5 + $0x118] sm:$0xff] }
 0x314   :  { %2763 = vmatmul.msk.f32.gmra.mxu3 %vm1442_vm2, %v4168_v56  ;;  %v4317_v56 = vpop.f32.mrf.mxu2  ;;  %v4326_v51 = vpop.f32.mrf.mxu3  ;;  %1824 = vmatpush.msrb.mxu1 %v1721_v18 }
 0x315   :  { %1932 = vmatpush.msra.mxu3 %v2816_v19 }
 0x31b   :  { %1643 = vmatmul.f32.gmra.mxu2 %v4170_v45  ;;  %v2798_v45 = vld [vmem:[%s4947_s5 + $0xc8] sm:$0xff] }
 0x31c   :  { %2764 = vmatmul.msk.f32.gmra.mxu3 %vm1442_vm2, %v4192_v3  ;;  %v4324_v24 = vpop.f32.mrf.mxu2  ;;  %1871 = vmatpush.msrb.mxu2 %v2798_v45  ;;  %v4334_v60 = vpop.f32.mrf.mxu3 }
 0x31e   :  { %1872 = vmatpush.msrb.mxu2 %v2797_v40  ;;  %v1562_v40 = vadd.f32 %v4293_v17, %v4317_v56  ;;  %v1565_v17 = vadd.f32 %v4300_v58, %v4324_v24 }
 0x320   :  { %1873 = vmatpush.msrb.mxu2 %v2796_v28 }
 0x323   :  { %1646 = vmatmul.f32.gmra.mxu2 %v4194_v16  ;;  %v2815_v16 = vld [vmem:[%s4947_s5 + $0x110] sm:$0xff] }
 0x324   :  { %2765 = vmatmul.msk.f32.gmra.mxu3 %vm1442_vm2, %v4214_v32  ;;  %v4332_v3 = vpop.f32.mrf.mxu2  ;;  %v2795_v32 = vld [vmem:[%s4947_s5 + $0xb0] sm:$0xff] }
 0x325   :  { %1933 = vmatpush.msra.mxu3 %v2815_v16  ;;  %1874 = vmatpush.msrb.mxu2 %v2795_v32  ;;  %v1559_v16 = vadd.f32 %v4283_v5, %v4298_v33  ;;  %v2826_v5 = vld [vmem:[%s4947_s5 + $0x128] sm:$0xff] }
 0x327   :  { %v4345_v30 = vpop.f32.mrf.mxu3  ;;  %1934 = vmatpush.msra.mxu3 %v2814_v44  ;;  %1875 = vmatpush.msrb.mxu2 %v2794_v4 }
 0x329   :  { %1935 = vmatpush.msra.mxu3 %v2813_v52  ;;  %1876 = vmatpush.msrb.mxu2 %v2793_v29 }
 0x32b   :  { %1649 = vmatmul.f32.gmra.mxu2 %v4216_v2  ;;  %v2833_v2 = vld [vmem:[%s4947_s5 + $0x160] sm:$0xff]  ;;  %1936 = vmatpush.msra.mxu3 %v2812_v41 }
 0x32c   :  { %v4343_v43 = vpop.f32.mrf.mxu2  ;;  %1994 = vmatpush.msra.mxu0 %v2833_v2  ;;  %1877 = vmatpush.msrb.mxu2 %v2792_v50  ;;  %v1568_v2 = vadd.f32 %v4319_v14, %v4332_v3 }
 0x32d   :  { %1937 = vmatpush.msra.mxu3 %v2811_v15  ;;  %v1571_v24 = vadd.f32 %v4326_v51, %v4343_v43 }
 0x32e   :  { %1878 = vmatpush.msrb.mxu2 %v2791_v39  ;;  %1995 = vmatpush.msra.mxu0 %v2832_v9 }
 0x32f   :  { %1938 = vmatpush.msra.mxu3 %v2810_v1 }
 0x330   :  { %1996 = vmatpush.msra.mxu0 %v2831_v47 }
 0x331   :  { %1939 = vmatpush.msra.mxu3 %v2809_v11 }
 0x332   :  { %1997 = vmatpush.msra.mxu0 %v2830_v31  ;;  %v2119_v31 = vld [vmem:[%s4950_s8 + $0x70] sm:$0xff] }
 0x333   :  { %1652 = vmatmul.f32.gmra.mxu2 %v4235_v34  ;;  %1940 = vmatpush.msra.mxu3 %v2808_v12 }
 0x334   :  { %v4356_v63 = vpop.f32.mrf.mxu2  ;;  %1998 = vmatpush.msra.mxu0 %v2829_v57  ;;  %v2072_v57 = vld [vmem:[%s4949_s7 + $0x60] sm:$0xff] }
 0x335   :  { %v1574_v3 = vadd.f32 %v4334_v60, %v4356_v63 }
 0x336   :  { %1999 = vmatpush.msra.mxu0 %v2828_v48  ;;  %v2070_v48 = vld [vmem:[%s4949_s7 + $0x50] sm:$0xff] }
 0x337   :  { %v4358_v23 = vpop.f32.mrf.mxu3 }
 0x338   :  { %2000 = vmatpush.msra.mxu0 %v2827_v20  ;;  %v2112_v20 = vld [vmem:[%s4950_s8 + $0x38] sm:$0xff] }
 0x33a   :  { %2001 = vmatpush.msra.mxu0 %v2826_v5  ;;  %v2111_v5 = vld [vmem:[%s4950_s8 + $0x30] sm:$0xff] }
 0x33c   :  { %v4375_v49 = vpop.f32.mrf.mxu2  ;;  %2002 = vmatpush.msra.mxu0 %v2825_v6  ;;  %v2109_v6 = vld [vmem:[%s4950_s8 + $0x20] sm:$0xff] }
 0x346   :  { %v4388_v42 = vpop.f32.mrf.mxu2 }
 0x347   :  { %v4377_v25 = vpop.f32.mrf.mxu3  ;;  %v1580_v12 = vadd.f32 %v4358_v23, %v4388_v42 }
 0x34f   :  { %v1673_v53 = vpop.f32.mrf.mxu3 }
 0x356   :  { %v4408_v61 = vpop.f32.mrf.mxu2 }
 0x357   :  { %v1676_v7 = vpop.f32.mrf.mxu3  ;;  %v1583_v23 = vadd.f32 %v4377_v25, %v4408_v61  ;;  %v2075_v25 = vld [vmem:[%s4949_s7 + $0x78] sm:$0xff]  ;;  %v2118_v61 = vld [vmem:[%s4950_s8 + $0x68] sm:$0xff] }
 0x358   :  { %2076 = vmatpush.msra.mxu1 %v2075_v25 }
 0x35e   :  { %v1620_v21 = vpop.f32.mrf.mxu2 }
 0x35f   :  { %v1679_v0 = vpop.f32.mrf.mxu3  ;;  %v1674_v34 = vadd.f32 %v1673_v53, %v1620_v21 }
 0x361   :  { %v1709_v55 = vmax.f32 %v1550_v27, %v1674_v34  ;;  %v2120_v34 = vld [vmem:[%s4950_s8 + $0x78] sm:$0xff] }
 0x362   :  { %2121 = vmatpush.msra.mxu2 %v2120_v34 }
 0x363   :  { %2783 = vmatmul.msk.f32.vlgmr.msrb.gmra.mxu1 %vm1740_vm3, %v1709_v55 }
 0x364   :  { %2122 = vmatpush.msra.mxu2 %v2119_v31 }
 0x366   :  { %v1623_v46 = vpop.f32.mrf.mxu2  ;;  %2123 = vmatpush.msra.mxu2 %v2118_v61 }
 0x367   :  { %v1677_v59 = vadd.f32 %v1676_v7, %v1623_v46  ;;  %v1682_v62 = vpop.f32.mrf.mxu3  ;;  %v1577_v7 = vadd.f32 %v4345_v30, %v4375_v49  ;;  %v2074_v46 = vld [vmem:[%s4949_s7 + $0x70] sm:$0xff] }
 0x368   :  { %2077 = vmatpush.msra.mxu1 %v2074_v46 }
 0x369   :  { %v1710_v37 = vmax.f32 %v1553_v38, %v1677_v59  ;;  %v2117_v59 = vld [vmem:[%s4950_s8 + $0x60] sm:$0xff] }
 0x36a   :  { %2124 = vmatpush.msra.mxu2 %v2117_v59 }
 0x36b   :  { %2775 = vmatmul.msk.f32.vlgmr.msrb.gmra.mxu0 %vm1740_vm3, %v1710_v37  ;;  %2784 = vmatmul.msk.f32.gmra.mxu1 %vm1740_vm3, %v1710_v37  ;;  %v2116_v37 = vld [vmem:[%s4950_s8 + $0x58] sm:$0xff] }
 0x36c   :  { %2125 = vmatpush.msra.mxu2 %v2116_v37 }
 0x36e   :  { %v1626_v35 = vpop.f32.mrf.mxu2 }
 0x36f   :  { %v1680_v22 = vadd.f32 %v1679_v0, %v1626_v35  ;;  %v1685_v10 = vpop.f32.mrf.mxu3 }
 0x371   :  { %v1711_v19 = vmax.f32 %v1556_v13, %v1680_v22  ;;  %v2115_v13 = vld [vmem:[%s4950_s8 + $0x50] sm:$0xff]  ;;  %v2071_v22 = vld [vmem:[%s4949_s7 + $0x58] sm:$0xff] }
 0x372   :  { %2126 = vmatpush.msra.mxu2 %v2115_v13 }
 0x373   :  { %2776 = vmatmul.msk.f32.gmra.mxu0 %vm1740_vm3, %v1711_v19  ;;  %2785 = vmatmul.msk.f32.gmra.mxu1 %vm1740_vm3, %v1711_v19 }
 0x374   :  { %2800 = vmatmul.msk.f32.vlgmr.msrb.gmra.mxu2 %vm1740_vm3, %v1711_v19  ;;  %v2114_v19 = vld [vmem:[%s4950_s8 + $0x48] sm:$0xff] }
 0x375   :  { %2127 = vmatpush.msra.mxu2 %v2114_v19 }
 0x376   :  { %v1629_v45 = vpop.f32.mrf.mxu2 }
 0x377   :  { %v1683_v54 = vadd.f32 %v1682_v62, %v1629_v45  ;;  %v1688_v8 = vpop.f32.mrf.mxu3  ;;  %v2073_v62 = vld [vmem:[%s4949_s7 + $0x68] sm:$0xff] }
 0x378   :  { %2078 = vmatpush.msra.mxu1 %v2073_v62 }
 0x379   :  { %v1712_v26 = vmax.f32 %v1559_v16, %v1683_v54  ;;  %v2113_v16 = vld [vmem:[%s4950_s8 + $0x40] sm:$0xff] }
 0x37a   :  { %2079 = vmatpush.msra.mxu1 %v2072_v57  ;;  %v2068_v54 = vld [vmem:[%s4949_s7 + $0x40] sm:$0xff]  ;;  %2128 = vmatpush.msra.mxu2 %v2113_v16 }
 0x37b   :  { %2777 = vmatmul.msk.f32.gmra.mxu0 %vm1740_vm3, %v1712_v26  ;;  %2786 = vmatmul.msk.f32.gmra.mxu1 %vm1740_vm3, %v1712_v26 }
 0x37c   :  { %2801 = vmatmul.msk.f32.gmra.mxu2 %vm1740_vm3, %v1712_v26  ;;  %2817 = vmatmul.msk.f32.vlgmr.msra.gmra.mxu3 %vm1740_vm3, %v1712_v26  ;;  %v2067_v26 = vld [vmem:[%s4949_s7 + $0x38] sm:$0xff] }
 0x37d   :  { %2080 = vmatpush.msra.mxu1 %v2071_v22  ;;  %2129 = vmatpush.msra.mxu2 %v2112_v20 }
 0x37e   :  { %v1632_v33 = vpop.f32.mrf.mxu2 }
 0x37f   :  { %v1686_v44 = vadd.f32 %v1685_v10, %v1632_v33  ;;  %v1691_v28 = vpop.f32.mrf.mxu3  ;;  %2081 = vmatpush.msra.mxu1 %v2070_v48  ;;  %v2069_v10 = vld [vmem:[%s4949_s7 + $0x48] sm:$0xff]  ;;  %2130 = vmatpush.msra.mxu2 %v2111_v5 }
 0x380   :  { %v2065_v33 = vld [vmem:[%s4949_s7 + $0x28] sm:$0xff] }
 0x381   :  { %v1713_v36 = vmax.f32 %v1562_v40, %v1686_v44  ;;  %2082 = vmatpush.msra.mxu1 %v2069_v10  ;;  %v2110_v40 = vld [vmem:[%s4950_s8 + $0x28] sm:$0xff] }
 0x382   :  { %2131 = vmatpush.msra.mxu2 %v2110_v40 }
 0x383   :  { %2778 = vmatmul.msk.f32.gmra.mxu0 %vm1740_vm3, %v1713_v36  ;;  %2787 = vmatmul.msk.f32.gmra.mxu1 %vm1740_vm3, %v1713_v36 }
 0x384   :  { %2802 = vmatmul.msk.f32.gmra.mxu2 %vm1740_vm3, %v1713_v36  ;;  %2818 = vmatmul.msk.f32.gmra.mxu3 %vm1740_vm3, %v1713_v36 }
 0x385   :  { %2083 = vmatpush.msra.mxu1 %v2068_v54  ;;  %2132 = vmatpush.msra.mxu2 %v2109_v6 }
 0x386   :  { %v1635_v18 = vpop.f32.mrf.mxu2 }
 0x387   :  { %v1689_v56 = vadd.f32 %v1688_v8, %v1635_v18  ;;  %v1694_v53 = vpop.f32.mrf.mxu3  ;;  %2084 = vmatpush.msra.mxu1 %v2067_v26  ;;  %v2066_v8 = vld [vmem:[%s4949_s7 + $0x30] sm:$0xff]  ;;  %v2108_v18 = vld [vmem:[%s4950_s8 + $0x18] sm:$0xff] }
 0x388   :  { %2133 = vmatpush.msra.mxu2 %v2108_v18  ;;  %v2854_v18 = vld [vmem:[%s4951_s9 + $0xe0] sm:$0xff] }
 0x389   :  { %v1714_v52 = vmax.f32 %v1565_v17, %v1689_v56  ;;  %2085 = vmatpush.msra.mxu1 %v2066_v8 }
 0x38b   :  { %2779 = vmatmul.msk.f32.gmra.mxu0 %vm1740_vm3, %v1714_v52  ;;  %2788 = vmatmul.msk.f32.gmra.mxu1 %vm1740_vm3, %v1714_v52 }
 0x38c   :  { %2803 = vmatmul.msk.f32.gmra.mxu2 %vm1740_vm3, %v1714_v52  ;;  %2819 = vmatmul.msk.f32.gmra.mxu3 %vm1740_vm3, %v1714_v52 }
 0x38d   :  { %2086 = vmatpush.msra.mxu1 %v2065_v33 }
 0x38e   :  { %v1638_v32 = vpop.f32.mrf.mxu2 }
 0x38f   :  { %v1692_v4 = vadd.f32 %v1691_v28, %v1638_v32  ;;  %v1697_v39 = vpop.f32.mrf.mxu3  ;;  %v2063_v28 = vld [vmem:[%s4949_s7 + $0x18] sm:$0xff]  ;;  %v2107_v32 = vld [vmem:[%s4950_s8 + $0x10] sm:$0xff] }
 0x390   :  { %2134 = vmatpush.msra.mxu2 %v2107_v32  ;;  %v2852_v32 = vld [vmem:[%s4951_s9 + $0xd0] sm:$0xff] }
 0x391   :  { %v1715_v29 = vmax.f32 %v1568_v2, %v1692_v4  ;;  %v2061_v4 = vld [vmem:[%s4949_s7 + $0x8] sm:$0xff] }
 0x393   :  { %2780 = vmatmul.msk.f32.gmra.mxu0 %vm1740_vm3, %v1715_v29  ;;  %2789 = vmatmul.msk.f32.gmra.mxu1 %vm1740_vm3, %v1715_v29 }
 0x394   :  { %2804 = vmatmul.msk.f32.gmra.mxu2 %vm1740_vm3, %v1715_v29  ;;  %2820 = vmatmul.msk.f32.gmra.mxu3 %vm1740_vm3, %v1715_v29 }
 0x396   :  { %v1641_v58 = vpop.f32.mrf.mxu2 }
 0x397   :  { %v1695_v50 = vadd.f32 %v1694_v53, %v1641_v58  ;;  %v1700_v51 = vpop.f32.mrf.mxu3  ;;  %v2106_v53 = vld [vmem:[%s4950_s8 + $0x8] sm:$0xff]  ;;  %v2060_v58 = vld [vmem:[%s4949_s7] sm:$0xff] }
 0x398   :  { %2135 = vmatpush.msra.mxu2 %v2106_v53  ;;  %v2165_v53 = vld [vmem:[%s4951_s9 + $0x58] sm:$0xff] }
 0x399   :  { %v1716_v41 = vmax.f32 %v1571_v24, %v1695_v50  ;;  %v2105_v24 = vld [vmem:[%s4950_s8] sm:$0xff] }
 0x39a   :  { %2136 = vmatpush.msra.mxu2 %v2105_v24 }
 0x39b   :  { %2781 = vmatmul.msk.f32.gmra.mxu0 %vm1740_vm3, %v1716_v41  ;;  %2790 = vmatmul.msk.f32.gmra.mxu1 %vm1740_vm3, %v1716_v41 }
 0x39c   :  { %2805 = vmatmul.msk.f32.gmra.mxu2 %vm1740_vm3, %v1716_v41  ;;  %2821 = vmatmul.msk.f32.gmra.mxu3 %vm1740_vm3, %v1716_v41 }
 0x39e   :  { %v1644_v14 = vpop.f32.mrf.mxu2 }
 0x39f   :  { %v1698_v9 = vadd.f32 %v1697_v39, %v1644_v14  ;;  %v1703_v60 = vpop.f32.mrf.mxu3 }
 0x3a1   :  { %v1717_v15 = vmax.f32 %v1574_v3, %v1698_v9 }
 0x3a3   :  { %2782 = vmatmul.msk.f32.gmra.mxu0 %vm1740_vm3, %v1717_v15 }
 0x3a4   :  { %2806 = vmatmul.msk.f32.gmra.mxu2 %vm1740_vm3, %v1717_v15  ;;  %2822 = vmatmul.msk.f32.gmra.mxu3 %vm1740_vm3, %v1717_v15 }
 0x3a6   :  { %v1647_v43 = vpop.f32.mrf.mxu2 }
 0x3a7   :  { %v1701_v1 = vadd.f32 %v1700_v51, %v1647_v43  ;;  %v1706_v49 = vpop.f32.mrf.mxu3 }
 0x3a9   :  { %v1718_v11 = vmax.f32 %v1577_v7, %v1701_v1 }
 0x3ab   :  { %2834 = vmatmul.msk.f32.vlgmr.msra.gmra.mxu0 %vm1740_vm3, %v1713_v36  ;;  %v2064_v36 = vld [vmem:[%s4949_s7 + $0x20] sm:$0xff] }
 0x3ac   :  { %2807 = vmatmul.msk.f32.gmra.mxu2 %vm1740_vm3, %v1718_v11  ;;  %2823 = vmatmul.msk.f32.gmra.mxu3 %vm1740_vm3, %v1718_v11 }
 0x3ad   :  { %2087 = vmatpush.msra.mxu1 %v2064_v36 }
 0x3ae   :  { %v1650_v63 = vpop.f32.mrf.mxu2 }
 0x3af   :  { %v1704_v47 = vadd.f32 %v1703_v60, %v1650_v63  ;;  %2088 = vmatpush.msra.mxu1 %v2063_v28  ;;  %v2856_v28 = vld [vmem:[%s4951_s9 + $0xf0] sm:$0xff] }
 0x3b0   :  { %2199 = vmatpush.msrb.mxu3 %v2856_v28  ;;  %v2843_v28 = vld [vmem:[%s4951_s9 + $0x88] sm:$0xff] }
 0x3b1   :  { %v1719_v21 = vmax.f32 %v1580_v12, %v1704_v47  ;;  %v4621_v12 = vld [vmem:[%s4948_s6] ss:$0 sm:$0xff] }
 0x3b2   :  { %2200 = vmatpush.msrb.mxu3 %v2854_v18  ;;  %v2877_v18 = vld [vmem:[%s4951_s9 + $0x178] sm:$0xff] }
 0x3b3   :  { %2835 = vmatmul.msk.f32.gmra.mxu0 %vm1740_vm3, %v1714_v52  ;;  %v2062_v52 = vld [vmem:[%s4949_s7 + $0x10] sm:$0xff] }
 0x3b4   :  { %2824 = vmatmul.msk.f32.gmra.mxu3 %vm1740_vm3, %v1719_v21  ;;  %2089 = vmatpush.msra.mxu1 %v2062_v52 }
 0x3b5   :  { %2201 = vmatpush.msrb.mxu3 %v2852_v32  ;;  %v2867_v32 = vld [vmem:[%s4951_s9 + $0x128] sm:$0xff] }
 0x3b6   :  { %v1653_v30 = vpop.f32.mrf.mxu2  ;;  %2090 = vmatpush.msra.mxu1 %v2061_v4  ;;  %v2167_v4 = vld [vmem:[%s4951_s9 + $0x68] sm:$0xff] }
 0x3b7   :  { %v1707_v0 = vadd.f32 %v1706_v49, %v1653_v30 }
 0x3b8   :  { %2091 = vmatpush.msra.mxu1 %v2060_v58 }
 0x3b9   :  { %v1720_v42 = vmax.f32 %v1583_v23, %v1707_v0 }
 0x3bb   :  { %2836 = vmatmul.msk.f32.gmra.mxu0 %vm1740_vm3, %v1715_v29 }
 0x3c3   :  { %2837 = vmatmul.msk.f32.gmra.mxu0 %vm1740_vm3, %v1716_v41 }
 0x3cb   :  { %2838 = vmatmul.msk.f32.gmra.mxu0 %vm1740_vm3, %v1717_v15 }
 0x3d3   :  { %2839 = vmatmul.msk.f32.gmra.mxu0 %vm1740_vm3, %v1718_v11 }
 0x3db   :  { %2840 = vmatmul.msk.f32.gmra.mxu0 %vm1740_vm3, %v1719_v21 }
 0x3e0   :  { %v1826_v17 = vpop.f32.mrf.mxu1 }
 0x3e3   :  { %2841 = vmatmul.msk.f32.gmra.mxu0 %vm1740_vm3, %v1720_v42 }
 0x3e8   :  { %v4504_v27 = vpop.f32.mrf.mxu0  ;;  %v1829_v50 = vpop.f32.mrf.mxu1 }
 0x3e9   :  { %v1827_v3 = vadd.f32 %v1826_v17, %v4504_v27  ;;  %v2168_v17 = vld [vmem:[%s4951_s9 + $0x70] sm:$0xff] }
 0x3ea   :  { %2242 = vmatpush.msrb.mxu1 %v2168_v17  ;;  %v2875_v17 = vld [vmem:[%s4951_s9 + $0x168] sm:$0xff] }
 0x3f0   :  { %v4509_v55 = vpop.f32.mrf.mxu0  ;;  %v1832_v9 = vpop.f32.mrf.mxu1 }
 0x3f1   :  { %v1830_v1 = vadd.f32 %v1829_v50, %v4509_v55  ;;  %v2850_v50 = vld [vmem:[%s4951_s9 + $0xc0] sm:$0xff] }
 0x3f2   :  { %2202 = vmatpush.msrb.mxu3 %v2850_v50  ;;  %v2892_v50 = vld [vmem:[%s4951_s9 + $0x1e0] sm:$0xff] }
 0x3f7   :  { %v1880_v56 = vpop.f32.mrf.mxu2 }
 0x3f8   :  { %v4523_v38 = vpop.f32.mrf.mxu0  ;;  %v1904_v43 = vadd.f32 %v1880_v56, %v1827_v3  ;;  %v1835_v30 = vpop.f32.mrf.mxu1 }
 0x3f9   :  { %v1833_v31 = vadd.f32 %v1832_v9, %v4523_v38 }
 0x3ff   :  { %v1942_v2 = vpop.f32.mrf.mxu3  ;;  %v1883_v41 = vpop.f32.mrf.mxu2 }
 0x400   :  { %v4537_v35 = vpop.f32.mrf.mxu0  ;;  %v1966_v11 = vadd.f32 %v1942_v2, %v1904_v43  ;;  %v1905_v60 = vadd.f32 %v1883_v41, %v1830_v1  ;;  %v1838_v62 = vpop.f32.mrf.mxu1  ;;  %v2166_v2 = vld [vmem:[%s4951_s9 + $0x60] sm:$0xff] }
 0x401   :  { %v1836_v59 = vadd.f32 %v1835_v30, %v4537_v35  ;;  %2243 = vmatpush.msrb.mxu1 %v2166_v2 }
 0x407   :  { %v1945_v39 = vpop.f32.mrf.mxu3  ;;  %v1886_v15 = vpop.f32.mrf.mxu2 }
 0x408   :  { %v4554_v45 = vpop.f32.mrf.mxu0  ;;  %v1967_v47 = vadd.f32 %v1945_v39, %v1905_v60  ;;  %v1906_v46 = vadd.f32 %v1886_v15, %v1833_v31  ;;  %v1841_v26 = vpop.f32.mrf.mxu1 }
 0x409   :  { %v1839_v33 = vadd.f32 %v1838_v62, %v4554_v45  ;;  %v2169_v45 = vld [vmem:[%s4951_s9 + $0x78] sm:$0xff] }
 0x40a   :  { %2262 = vmatpush.msrb.mxu2 %v2169_v45  ;;  %v2873_v45 = vld [vmem:[%s4951_s9 + $0x158] sm:$0xff] }
 0x40c   :  { %2263 = vmatpush.msrb.mxu2 %v2167_v4 }
 0x40e   :  { %2264 = vmatpush.msrb.mxu2 %v2165_v53 }
 0x40f   :  { %v1948_v7 = vpop.f32.mrf.mxu3  ;;  %v1889_v23 = vpop.f32.mrf.mxu2 }
 0x410   :  { %v4580_v44 = vpop.f32.mrf.mxu0  ;;  %v1968_v37 = vadd.f32 %v1948_v7, %v1906_v46  ;;  %v1907_v13 = vadd.f32 %v1889_v23, %v1836_v59  ;;  %v1844_v41 = vpop.f32.mrf.mxu1 }
 0x411   :  { %v1842_v56 = vadd.f32 %v1841_v26, %v4580_v44  ;;  %v2164_v44 = vld [vmem:[%s4951_s9 + $0x50] sm:$0xff]  ;;  %v2155_v26 = vld [vmem:[%s4951_s9 + $0x8] sm:$0xff] }
 0x412   :  { %2244 = vmatpush.msrb.mxu1 %v2164_v44  ;;  %v2865_v44 = vld [vmem:[%s4951_s9 + $0x118] sm:$0xff] }
 0x417   :  { %v1951_v27 = vpop.f32.mrf.mxu3  ;;  %v1892_v57 = vpop.f32.mrf.mxu2 }
 0x418   :  { %v4606_v29 = vpop.f32.mrf.mxu0  ;;  %v1969_v48 = vadd.f32 %v1951_v27, %v1907_v13  ;;  %v1908_v6 = vadd.f32 %v1892_v57, %v1839_v33  ;;  %v1847_v30 = vpop.f32.mrf.mxu1  ;;  %v2160_v57 = vld [vmem:[%s4951_s9 + $0x30] sm:$0xff]  ;;  %v2853_v33 = vld [vmem:[%s4951_s9 + $0xd8] sm:$0xff] }
 0x419   :  { %v1845_v60 = vadd.f32 %v1844_v41, %v4606_v29  ;;  %v2848_v13 = vld [vmem:[%s4951_s9 + $0xb0] sm:$0xff] }
 0x41a   :  { %2203 = vmatpush.msrb.mxu3 %v2848_v13  ;;  %v2890_v41 = vld [vmem:[%s4951_s9 + $0x1d0] sm:$0xff]  ;;  %v2421_v13 = vld [vmem:[%s4953_s11 + $0x68] sm:$0xff] }
 0x41f   :  { %v1954_v19 = vpop.f32.mrf.mxu3  ;;  %v1895_v5 = vpop.f32.mrf.mxu2 }
 0x420   :  { %v4614_v14 = vpop.f32.mrf.mxu0  ;;  %v1970_v52 = vadd.f32 %v1954_v19, %v1908_v6  ;;  %v1909_v58 = vadd.f32 %v1895_v5, %v1842_v56  ;;  %v2159_v19 = vld [vmem:[%s4951_s9 + $0x28] sm:$0xff]  ;;  %v2845_v6 = vld [vmem:[%s4951_s9 + $0x98] sm:$0xff] }
 0x421   :  { %v2855_v5 = vld [vmem:[%s4951_s9 + $0xe8] sm:$0xff] }
 0x422   :  { %v2871_v56 = vld [vmem:[%s4951_s9 + $0x148] sm:$0xff] }
 0x427   :  { %v1957_v40 = vpop.f32.mrf.mxu3  ;;  %v1898_v3 = vpop.f32.mrf.mxu2 }
 0x428   :  { %v2004_v51 = vpop.f32.mrf.mxu0  ;;  %v1971_v39 = vadd.f32 %v1957_v40, %v1909_v58  ;;  %v2849_v40 = vld [vmem:[%s4951_s9 + $0xb8] sm:$0xff]  ;;  %v2863_v58 = vld [vmem:[%s4951_s9 + $0x108] sm:$0xff] }
 0x429   :  { %v2028_v63 = vadd.f32 %v2004_v51, %v1966_v11 }
 0x42b   :  { %v2040_v49 = vadd.f32 %v4621_v12, %v2028_v63 }
 0x42d   :  { %v2048_v34 = vmax.f32 %v2040_v49, 0.0 }
 0x42f   :  { %v1960_v43 = vpop.f32.mrf.mxu3  ;;  %v1901_v49 = vpop.f32.mrf.mxu2 }
 0x430   :  { %v2007_v21 = vpop.f32.mrf.mxu0 }
 0x431   :  { %v2029_v0 = vadd.f32 %v2007_v21, %v1967_v47  ;;  %v1910_v21 = vadd.f32 %v1898_v3, %v1845_v60  ;;  %v2886_v3 = vld [vmem:[%s4951_s9 + $0x1b0] sm:$0xff]  ;;  %v2874_v60 = vld [vmem:[%s4951_s9 + $0x160] sm:$0xff] }
 0x433   :  { %v2041_v42 = vadd.f32 %v4621_v12, %v2029_v0  ;;  %v1848_v0 = vadd.f32 %v1847_v30, %v4614_v14  ;;  %v1972_v23 = vadd.f32 %v1960_v43, %v1910_v21  ;;  %v2162_v14 = vld [vmem:[%s4951_s9 + $0x40] sm:$0xff]  ;;  %v2882_v43 = vld [vmem:[%s4951_s9 + $0x190] sm:$0xff] }
 0x434   :  { %2245 = vmatpush.msrb.mxu1 %v2162_v14  ;;  %v2870_v21 = vld [vmem:[%s4951_s9 + $0x140] sm:$0xff]  ;;  %v2868_v30 = vld [vmem:[%s4951_s9 + $0x130] sm:$0xff] }
 0x435   :  { %v2049_v55 = vmax.f32 %v2041_v42, 0.0  ;;  %v1911_v27 = vadd.f32 %v1901_v49, %v1848_v0  ;;  %v2866_v49 = vld [vmem:[%s4951_s9 + $0x120] sm:$0xff]  ;;  %v2864_v0 = vld [vmem:[%s4951_s9 + $0x110] sm:$0xff] }
 0x436   :  { %2246 = vmatpush.msrb.mxu1 %v2160_v57 }
 0x437   :  { %v2056_v25 = vmax.f32 %v2048_v34, %v2049_v55  ;;  %v1963_v42 = vpop.f32.mrf.mxu3 }
 0x438   :  { %v2010_v61 = vpop.f32.mrf.mxu0  ;;  %v1973_v55 = vadd.f32 %v1963_v42, %v1911_v27 }
 0x439   :  { %2092 = vmatmul.f32.vlgmr.msra.gmra.mxu1 %v2056_v25  ;;  %2137 = vmatmul.f32.vlgmr.msra.gmra.mxu2 %v2056_v25  ;;  %v2030_v22 = vadd.f32 %v2010_v61, %v1968_v37  ;;  %v2163_v37 = vld [vmem:[%s4951_s9 + $0x48] sm:$0xff] }
 0x43a   :  { %2265 = vmatpush.msrb.mxu2 %v2163_v37 }
 0x43b   :  { %v2042_v16 = vadd.f32 %v4621_v12, %v2030_v22  ;;  %v2158_v22 = vld [vmem:[%s4951_s9 + $0x20] sm:$0xff] }
 0x43c   :  { %2247 = vmatpush.msrb.mxu1 %v2158_v22  ;;  %v2420_v22 = vld [vmem:[%s4953_s11 + $0x60] sm:$0xff] }
 0x43d   :  { %v2050_v20 = vmax.f32 %v2042_v16, 0.0  ;;  %v2157_v16 = vld [vmem:[%s4951_s9 + $0x18] sm:$0xff] }
 0x440   :  { %v2013_v10 = vpop.f32.mrf.mxu0 }
 0x441   :  { %v2031_v54 = vadd.f32 %v2013_v10, %v1969_v48  ;;  %v2846_v48 = vld [vmem:[%s4951_s9 + $0xa0] sm:$0xff]  ;;  %v2156_v10 = vld [vmem:[%s4951_s9 + $0x10] sm:$0xff] }
 0x442   :  { %2204 = vmatpush.msrb.mxu3 %v2846_v48  ;;  %2248 = vmatpush.msrb.mxu1 %v2156_v10  ;;  %v2418_v48 = vld [vmem:[%s4953_s11 + $0x50] sm:$0xff]  ;;  %v2417_v10 = vld [vmem:[%s4953_s11 + $0x48] sm:$0xff] }
 0x443   :  { %v2043_v38 = vadd.f32 %v4621_v12, %v2031_v54  ;;  %v2844_v54 = vld [vmem:[%s4951_s9 + $0x90] sm:$0xff] }
 0x444   :  { %2205 = vmatpush.msrb.mxu3 %v2844_v54  ;;  %v2415_v54 = vld [vmem:[%s4953_s11 + $0x38] sm:$0xff] }
 0x445   :  { %v2051_v8 = vmax.f32 %v2043_v38, 0.0  ;;  %v2154_v38 = vld [vmem:[%s4951_s9] sm:$0xff] }
 0x446   :  { %2249 = vmatpush.msrb.mxu1 %v2154_v38  ;;  %v2439_v38 = vld [vmem:[%s4953_s11 + $0xf8] sm:$0xff] }
 0x447   :  { %v2057_v35 = vmax.f32 %v2050_v20, %v2051_v8  ;;  %v2842_v20 = vld [vmem:[%s4951_s9 + $0x80] sm:$0xff]  ;;  %v2857_v8 = vld [vmem:[%s4951_s9 + $0xf8] sm:$0xff] }
 0x448   :  { %v2016_v36 = vpop.f32.mrf.mxu0  ;;  %2206 = vmatpush.msrb.mxu3 %v2842_v20  ;;  %2322 = vmatpush.msra.mxu1 %v2877_v18  ;;  %v2414_v20 = vld [vmem:[%s4953_s11 + $0x30] sm:$0xff] }
 0x449   :  { %2095 = vmatmul.f32.gmra.mxu1 %v2057_v35  ;;  %2140 = vmatmul.f32.gmra.mxu2 %v2057_v35  ;;  %v2032_v24 = vadd.f32 %v2016_v36, %v1970_v52  ;;  %v2851_v35 = vld [vmem:[%s4951_s9 + $0xc8] sm:$0xff]  ;;  %v2869_v52 = vld [vmem:[%s4951_s9 + $0x138] sm:$0xff]  ;;  %v2410_v18 = vld [vmem:[%s4953_s11 + $0x10] sm:$0xff] }
 0x44a   :  { %2219 = vmatpush.msra.mxu3 %v2857_v8  ;;  %v2847_v36 = vld [vmem:[%s4951_s9 + $0xa8] sm:$0xff]  ;;  %2323 = vmatpush.msra.mxu1 %v2875_v17  ;;  %v2432_v17 = vld [vmem:[%s4953_s11 + $0xc0] sm:$0xff] }
 0x44b   :  { %v2044_v15 = vadd.f32 %v4621_v12, %v2032_v24  ;;  %v2894_v24 = vld [vmem:[%s4951_s9 + $0x1f0] sm:$0xff]  ;;  %v2437_v8 = vld [vmem:[%s4953_s11 + $0xe8] sm:$0xff] }
 0x44c   :  { %2220 = vmatpush.msra.mxu3 %v2855_v5  ;;  %2324 = vmatpush.msra.mxu1 %v2873_v45  ;;  %v2436_v5 = vld [vmem:[%s4953_s11 + $0xe0] sm:$0xff]  ;;  %v2409_v45 = vld [vmem:[%s4953_s11 + $0x8] sm:$0xff] }
 0x44d   :  { %v2052_v1 = vmax.f32 %v2044_v15, 0.0 }
 0x44e   :  { %2221 = vmatpush.msra.mxu3 %v2853_v33  ;;  %2325 = vmatpush.msra.mxu1 %v2871_v56  ;;  %v2413_v33 = vld [vmem:[%s4953_s11 + $0x28] sm:$0xff]  ;;  %v2431_v56 = vld [vmem:[%s4953_s11 + $0xb8] sm:$0xff] }
 0x450   :  { %v2019_v9 = vpop.f32.mrf.mxu0  ;;  %2222 = vmatpush.msra.mxu3 %v2851_v35  ;;  %2326 = vmatpush.msra.mxu1 %v2869_v52  ;;  %v2435_v35 = vld [vmem:[%s4953_s11 + $0xd8] sm:$0xff]  ;;  %v2430_v52 = vld [vmem:[%s4953_s11 + $0xb0] sm:$0xff] }
 0x451   :  { %v2033_v51 = vadd.f32 %v2019_v9, %v1971_v39  ;;  %v2888_v39 = vld [vmem:[%s4951_s9 + $0x1c0] sm:$0xff] }
 0x452   :  { %2223 = vmatpush.msra.mxu3 %v2849_v40  ;;  %2327 = vmatpush.msra.mxu1 %v2867_v32  ;;  %v2884_v9 = vld [vmem:[%s4951_s9 + $0x1a0] sm:$0xff]  ;;  %v2434_v40 = vld [vmem:[%s4953_s11 + $0xd0] sm:$0xff]  ;;  %v2429_v32 = vld [vmem:[%s4953_s11 + $0xa8] sm:$0xff] }
 0x453   :  { %v2045_v7 = vadd.f32 %v4621_v12, %v2033_v51 }
 0x454   :  { %2224 = vmatpush.msra.mxu3 %v2847_v36  ;;  %2328 = vmatpush.msra.mxu1 %v2865_v44  ;;  %v2412_v36 = vld [vmem:[%s4953_s11 + $0x20] sm:$0xff]  ;;  %v2426_v44 = vld [vmem:[%s4953_s11 + $0x90] sm:$0xff] }
 0x455   :  { %v2053_v11 = vmax.f32 %v2045_v7, 0.0 }
 0x456   :  { %2225 = vmatpush.msra.mxu3 %v2845_v6  ;;  %2329 = vmatpush.msra.mxu1 %v2863_v58  ;;  %v2433_v6 = vld [vmem:[%s4953_s11 + $0xc8] sm:$0xff] }
 0x457   :  { %v2058_v63 = vmax.f32 %v2052_v1, %v2053_v11  ;;  %v2876_v1 = vld [vmem:[%s4951_s9 + $0x170] sm:$0xff]  ;;  %v2880_v11 = vld [vmem:[%s4951_s9 + $0x180] sm:$0xff]  ;;  %v2425_v58 = vld [vmem:[%s4953_s11 + $0x88] sm:$0xff] }
 0x458   :  { %v2022_v47 = vpop.f32.mrf.mxu0  ;;  %2226 = vmatpush.msra.mxu3 %v2843_v28  ;;  %v2411_v28 = vld [vmem:[%s4953_s11 + $0x18] sm:$0xff] }
 0x459   :  { %2098 = vmatmul.f32.gmra.mxu1 %v2058_v63  ;;  %2143 = vmatmul.f32.gmra.mxu2 %v2058_v63  ;;  %v2034_v34 = vadd.f32 %v2022_v47, %v1972_v23  ;;  %v2423_v63 = vld [vmem:[%s4953_s11 + $0x78] sm:$0xff]  ;;  %v2872_v47 = vld [vmem:[%s4951_s9 + $0x150] sm:$0xff]  ;;  %v2862_v23 = vld [vmem:[%s4951_s9 + $0x100] sm:$0xff] }
 0x45a   :  { %2444 = vmatpush.msrb.mxu0 %v2423_v63 }
 0x45b   :  { %v2046_v25 = vadd.f32 %v4621_v12, %v2034_v34 }
 0x45d   :  { %v2054_v46 = vmax.f32 %v2046_v25, 0.0  ;;  %v2891_v25 = vld [vmem:[%s4951_s9 + $0x1d8] sm:$0xff] }
 0x460   :  { %v2025_v31 = vpop.f32.mrf.mxu0 }
 0x461   :  { %v2035_v61 = vadd.f32 %v2025_v31, %v1973_v55  ;;  %v2895_v55 = vld [vmem:[%s4951_s9 + $0x1f8] sm:$0xff]  ;;  %v2893_v31 = vld [vmem:[%s4951_s9 + $0x1e8] sm:$0xff] }
 0x463   :  { %v2047_v29 = vadd.f32 %v4621_v12, %v2035_v61  ;;  %v2161_v12 = vld [vmem:[%s4951_s9 + $0x38] sm:$0xff]  ;;  %v2889_v61 = vld [vmem:[%s4951_s9 + $0x1c8] sm:$0xff] }
 0x464   :  { %2266 = vmatpush.msrb.mxu2 %v2161_v12  ;;  %v2422_v12 = vld [vmem:[%s4953_s11 + $0x70] sm:$0xff] }
 0x465   :  { %v2055_v59 = vmax.f32 %v2047_v29, 0.0  ;;  %v2887_v29 = vld [vmem:[%s4951_s9 + $0x1b8] sm:$0xff]  ;;  %2445 = vmatpush.msrb.mxu0 %v2422_v12 }
 0x466   :  { %2267 = vmatpush.msrb.mxu2 %v2159_v19  ;;  %v2419_v19 = vld [vmem:[%s4953_s11 + $0x58] sm:$0xff] }
 0x467   :  { %v2059_v62 = vmax.f32 %v2054_v46, %v2055_v59  ;;  %v2885_v46 = vld [vmem:[%s4951_s9 + $0x1a8] sm:$0xff]  ;;  %v2883_v59 = vld [vmem:[%s4951_s9 + $0x198] sm:$0xff]  ;;  %2446 = vmatpush.msrb.mxu0 %v2421_v13 }
 0x468   :  { %2268 = vmatpush.msrb.mxu2 %v2157_v16  ;;  %v2416_v16 = vld [vmem:[%s4953_s11 + $0x40] sm:$0xff] }
 0x469   :  { %2101 = vmatmul.f32.gmra.mxu1 %v2059_v62  ;;  %2146 = vmatmul.f32.gmra.mxu2 %v2059_v62  ;;  %v2881_v62 = vld [vmem:[%s4951_s9 + $0x188] sm:$0xff] }
 0x46a   :  { %2269 = vmatpush.msrb.mxu2 %v2155_v26  ;;  %2447 = vmatpush.msrb.mxu0 %v2420_v22  ;;  %v2438_v26 = vld [vmem:[%s4953_s11 + $0xf0] sm:$0xff] }
 0x46c   :  { %2364 = vmatpush.msra.mxu2 %v2894_v24  ;;  %2448 = vmatpush.msrb.mxu0 %v2419_v19  ;;  %v2408_v24 = vld [vmem:[%s4953_s11] sm:$0xff] }
 0x46e   :  { %2365 = vmatpush.msra.mxu2 %v2892_v50  ;;  %2449 = vmatpush.msrb.mxu0 %v2418_v48  ;;  %v2424_v50 = vld [vmem:[%s4953_s11 + $0x80] sm:$0xff] }
 0x470   :  { %2366 = vmatpush.msra.mxu2 %v2890_v41  ;;  %2450 = vmatpush.msrb.mxu0 %v2417_v10 }
 0x472   :  { %2367 = vmatpush.msra.mxu2 %v2888_v39  ;;  %2451 = vmatpush.msrb.mxu0 %v2416_v16 }
 0x474   :  { %2368 = vmatpush.msra.mxu2 %v2886_v3  ;;  %2452 = vmatpush.msrb.mxu0 %v2415_v54 }
 0x476   :  { %2369 = vmatpush.msra.mxu2 %v2884_v9  ;;  %2453 = vmatpush.msrb.mxu0 %v2414_v20 }
 0x478   :  { %2370 = vmatpush.msra.mxu2 %v2882_v43  ;;  %2454 = vmatpush.msrb.mxu0 %v2413_v33  ;;  %v2398_v43 = vld [vmem:[%s4952_s10] sm:$0x3] }
 0x479   :  { %v2401_v63 = vperm.slane %v2398_v43, 1 }
 0x47a   :  { %2371 = vmatpush.msra.mxu2 %v2880_v11  ;;  %2455 = vmatpush.msrb.mxu0 %v2412_v36 }
 0x47c   :  { %2456 = vmatpush.msrb.mxu0 %v2411_v28 }
 0x47e   :  { %2457 = vmatpush.msrb.mxu0 %v2410_v18 }
 0x480   :  { %2458 = vmatpush.msrb.mxu0 %v2409_v45 }
 0x482   :  { %2459 = vmatpush.msrb.mxu0 %v2408_v24 }
 0x4b6   :  { %v2093_v2 = vpop.f32.mrf.mxu1 }
 0x4bc   :  { %v2138_v4 = vpop.f32.mrf.mxu2 }
 0x4bd   :  { %v2150_v53 = vmax.f32 %v2093_v2, %v2138_v4  ;;  %v2428_v2 = vld [vmem:[%s4953_s11 + $0xa0] sm:$0xff]  ;;  %v2427_v4 = vld [vmem:[%s4953_s11 + $0x98] sm:$0xff] }
 0x4bf   :  { %2860 = vmatmul.msk.f32.vlgmr.msrb.gmra.mxu1 %vm2187_vm4, %v2150_v53  ;;  %2861 = vmatmul.msk.f32.vlgmr.msrb.gmra.mxu2 %vm2187_vm4, %v2150_v53 }
 0x4c0   :  { %2464 = vmatpush.msrb.mxu1 %v2439_v38 }
 0x4c2   :  { %2465 = vmatpush.msrb.mxu1 %v2438_v26 }
 0x4c4   :  { %2466 = vmatpush.msrb.mxu1 %v2437_v8 }
 0x4c6   :  { %v2096_v15 = vpop.f32.mrf.mxu1  ;;  %2467 = vmatpush.msrb.mxu1 %v2436_v5 }
 0x4c8   :  { %2468 = vmatpush.msrb.mxu1 %v2435_v35 }
 0x4ca   :  { %2469 = vmatpush.msrb.mxu1 %v2434_v40 }
 0x4cc   :  { %v2141_v51 = vpop.f32.mrf.mxu2  ;;  %2470 = vmatpush.msrb.mxu1 %v2433_v6 }
 0x4cd   :  { %v2151_v7 = vmax.f32 %v2096_v15, %v2141_v51 }
 0x4ce   :  { %2471 = vmatpush.msrb.mxu1 %v2432_v17 }
 0x4cf   :  { %2858 = vmatmul.msk.f32.vlgmr.msrb.gmra.mxu3 %vm2187_vm4, %v2151_v7 }
 0x4d0   :  { %2302 = vmatpush.msrb.mxu3 %v2876_v1  ;;  %2472 = vmatpush.msrb.mxu1 %v2431_v56 }
 0x4d2   :  { %2303 = vmatpush.msrb.mxu3 %v2874_v60  ;;  %2473 = vmatpush.msrb.mxu1 %v2430_v52  ;;  %v2400_v60 = vperm.slane %v2398_v43, 0 }
 0x4d4   :  { %2304 = vmatpush.msrb.mxu3 %v2872_v47  ;;  %2474 = vmatpush.msrb.mxu1 %v2429_v32 }
 0x4d6   :  { %2305 = vmatpush.msrb.mxu3 %v2870_v21  ;;  %v2099_v42 = vpop.f32.mrf.mxu1  ;;  %2475 = vmatpush.msrb.mxu1 %v2428_v2 }
 0x4d7   :  { %2859 = vmatmul.msk.f32.vlgmr.msra.gmra.mxu3 %vm2187_vm4, %v2151_v7 }
 0x4d8   :  { %2306 = vmatpush.msrb.mxu3 %v2868_v30  ;;  %2476 = vmatpush.msrb.mxu1 %v2427_v4 }
 0x4da   :  { %2307 = vmatpush.msrb.mxu3 %v2866_v49  ;;  %2477 = vmatpush.msrb.mxu1 %v2426_v44 }
 0x4dc   :  { %v2144_v27 = vpop.f32.mrf.mxu2  ;;  %2308 = vmatpush.msrb.mxu3 %v2864_v0  ;;  %2478 = vmatpush.msrb.mxu1 %v2425_v58 }
 0x4dd   :  { %v2152_v34 = vmax.f32 %v2099_v42, %v2144_v27 }
 0x4de   :  { %2309 = vmatpush.msrb.mxu3 %v2862_v23  ;;  %2479 = vmatpush.msrb.mxu1 %v2424_v50 }
 0x4df   :  { %2878 = vmatmul.msk.f32.vlgmr.msrb.gmra.mxu3 %vm2187_vm4, %v2152_v34  ;;  %2879 = vmatmul.msk.f32.vlgmr.msra.gmra.mxu1 %vm2187_vm4, %v2152_v34  ;;  %v2909_v34 = vld [vmem:[%s4954_s12] ss:$0 sm:$0xff] }
 0x4e0   :  { %2384 = vmatpush.msra.mxu3 %v2895_v55 }
 0x4e2   :  { %2385 = vmatpush.msra.mxu3 %v2893_v31 }
 0x4e4   :  { %2386 = vmatpush.msra.mxu3 %v2891_v25 }
 0x4e6   :  { %2387 = vmatpush.msra.mxu3 %v2889_v61  ;;  %v2102_v14 = vpop.f32.mrf.mxu1 }
 0x4e8   :  { %2388 = vmatpush.msra.mxu3 %v2887_v29 }
 0x4ea   :  { %2389 = vmatpush.msra.mxu3 %v2885_v46 }
 0x4ec   :  { %v2147_v37 = vpop.f32.mrf.mxu2  ;;  %2390 = vmatpush.msra.mxu3 %v2883_v59 }
 0x4ed   :  { %v2153_v57 = vmax.f32 %v2102_v14, %v2147_v37 }
 0x4ee   :  { %2391 = vmatpush.msra.mxu3 %v2881_v62 }
 0x4ef   :  { %2896 = vmatmul.msk.f32.vlgmr.msra.gmra.mxu2 %vm2187_vm4, %v2153_v57  ;;  %2897 = vmatmul.msk.f32.vlgmr.msra.gmra.mxu3 %vm2187_vm4, %v2153_v57 }
 0x53c   :  { %v2251_v39 = vpop.f32.mrf.mxu1 }
 0x542   :  { %v2271_v3 = vpop.f32.mrf.mxu2 }
 0x552   :  { %v2208_v53 = vpop.f32.mrf.mxu3 }
 0x553   :  { %v2252_v7 = vadd.f32 %v2251_v39, %v2208_v53 }
 0x55a   :  { %v2228_v41 = vpop.f32.mrf.mxu3 }
 0x55b   :  { %v2272_v15 = vadd.f32 %v2271_v3, %v2228_v41 }
 0x55c   :  { %v2331_v51 = vpop.f32.mrf.mxu1 }
 0x55d   :  { %v2335_v1 = vadd.f32 %v2331_v51, %v2272_v15 }
 0x562   :  { %v2311_v9 = vpop.f32.mrf.mxu3 }
 0x563   :  { %v2334_v11 = vadd.f32 %v2311_v9, %v2252_v7 }
 0x572   :  { %v2373_v47 = vpop.f32.mrf.mxu2  ;;  %v2393_v21 = vpop.f32.mrf.mxu3 }
 0x573   :  { %v2396_v30 = vadd.f32 %v2373_v47, %v2334_v11  ;;  %v2397_v49 = vadd.f32 %v2393_v21, %v2335_v1 }
 0x575   :  { %v2404_v0 = vadd.f32 %v2400_v60, %v2396_v30  ;;  %v2405_v23 = vadd.f32 %v2401_v63, %v2397_v49 }
 0x577   :  { %v2406_v42 = vmax.f32 %v2404_v0, 0.0  ;;  %v2407_v27 = vmax.f32 %v2405_v23, 0.0 }
 0x579   :  { %2460 = vmatmul.f32.vlgmr.msrb.gmra.mxu0 %v2406_v42  ;;  %2480 = vmatmul.f32.vlgmr.msrb.gmra.mxu1 %v2407_v27 }
 0x5f6   :  { %v2461_v55 = vpop.f32.mrf.mxu0  ;;  %v2481_v25 = vpop.f32.mrf.mxu1 }
 0x5f7   :  { %v2462_v31 = vadd.f32 %v2909_v34, %v2461_v55 }
 0x5f9   :  { %v2482_v61 = vadd.f32 %v2481_v25, %v2462_v31 }
 0x5fb   :  { %2485 = vst.msk [vmem:[%s4955_s13] sm:$0xff] %vm2484_vm5, %v2482_v61 }
 0x5fc   :  { %2490 = vsyncpa [#allocation3], 1 }
 0x5fd   :  { %2491 = vsyncpa [#allocation5], 1 }

</bundles_post_ra>
